<compile_context>
chip_gen: v7x
topology: tpu7x:2x2x1
jax: 0.10.0
libtpu: 0.0.40
codegen_flags: <defaults>
</compile_context>

<pallas_src>
import functools

import jax
import jax.numpy as jnp
from jax.experimental import pallas as pl
from jax.experimental.pallas import tpu as pltpu


# ---------------------------------------------------------------------------
# In-kernel helpers (operate on VMEM-resident values; all slices are
# contiguous and all reshapes preserve the minor / lane dimension).
# ---------------------------------------------------------------------------
def _zero_pad1_hw(x):
    """Zero-pad a (H, W, C) value by 1 on each spatial side -> (H+2, W+2, C)."""
    H, W, C = x.shape
    zr = jnp.zeros((1, W, C), x.dtype)
    x = jnp.concatenate([zr, x, zr], axis=0)          # pad rows
    zc = jnp.zeros((H + 2, 1, C), x.dtype)
    return jnp.concatenate([zc, x, zc], axis=1)       # pad cols


def _im2col_3x3_s1(xp, Ho, Wo):
    """xp: (Ho+2, Wo+2, C) padded value -> im2col panel (Ho*Wo, 9*C).

    K ordering is tap-major, channel-minor (K = (ki*3+kj)*C + c), matching a
    row-major reshape of HWIO weights to (9*C, Cout)."""
    C = xp.shape[-1]
    cols = [xp[ki:ki + Ho, kj:kj + Wo, :] for ki in range(3) for kj in range(3)]
    return jnp.concatenate(cols, axis=-1).reshape(Ho * Wo, 9 * C)


def _im2col_3x3_s2_phases(xph_ref, Ho, Wo):
    """xph_ref: (4, Hpp, Wpp, C) parity phases of the zero-padded input.
    Returns the stride-2 im2col panel (Ho*Wo, 9*C) using contiguous slices."""
    C = xph_ref.shape[-1]
    cols = []
    for ki in range(3):
        for kj in range(3):
            p = (ki % 2) * 2 + (kj % 2)               # parity phase of this tap
            oi, oj = ki // 2, kj // 2                 # contiguous offset inside phase
            cols.append(xph_ref[p, oi:oi + Ho, oj:oj + Wo, :])
    return jnp.concatenate(cols, axis=-1).reshape(Ho * Wo, 9 * C)


# ---------------------------------------------------------------------------
# Fused BasicBlock kernels (one pallas_call per block)
# ---------------------------------------------------------------------------
def _basic_block_s1_kernel(x_ref, w1_ref, b1_ref, w2_ref, b2_ref, o_ref, *, proj):
    # x_ref: (1, H, W, Cin) bf16; w1: (9*Cin, P); w2: (9*P [+Cin], P); b*: (1, P)
    _, H, W, Cin = x_ref.shape
    P = o_ref.shape[-1]
    x = x_ref[0]                                                    # (H, W, Cin)

    # conv1 (3x3, s=1, p=1) + folded BN1 + ReLU  -- one K=9*Cin matmul
    panel1 = _im2col_3x3_s1(_zero_pad1_hw(x), H, W)
    h = jnp.dot(panel1, w1_ref[...], preferred_element_type=jnp.float32)
    h = jnp.maximum(h + b1_ref[...], 0.0)
    # TODO(synk): training-mode dropout not implemented (identity in eval).
    h = h.astype(jnp.bfloat16).reshape(H, W, P)

    # conv2 (3x3, s=1, p=1) + folded BN2 [+ fused 1x1 shortcut] -- one matmul
    panel2 = _im2col_3x3_s1(_zero_pad1_hw(h), H, W)
    if proj:                       # 1x1-conv shortcut stacked along K
        panel2 = jnp.concatenate([panel2, x.reshape(H * W, Cin)], axis=-1)
    out = jnp.dot(panel2, w2_ref[...], preferred_element_type=jnp.float32)
    out = out + b2_ref[...]
    if not proj:                   # identity shortcut (Cin == P)
        out = out + x.reshape(H * W, Cin).astype(jnp.float32)
    out = jnp.maximum(out, 0.0)
    o_ref[...] = out.reshape(1, H, W, P).astype(o_ref.dtype)


def _basic_block_s2_kernel(xph_ref, w1_ref, b1_ref, w2_ref, b2_ref, o_ref, *, Ho, Wo):
    # xph_ref: (4, Hpp, Wpp, Cin) parity phases of padded x (projection shortcut).
    Cin = xph_ref.shape[-1]
    P = o_ref.shape[-1]

    # conv1 (3x3, s=2, p=1) + folded BN1 + ReLU  -- one K=9*Cin matmul
    panel1 = _im2col_3x3_s2_phases(xph_ref, Ho, Wo)
    h = jnp.dot(panel1, w1_ref[...], preferred_element_type=jnp.float32)
    h = jnp.maximum(h + b1_ref[...], 0.0)
    h = h.astype(jnp.bfloat16).reshape(Ho, Wo, P)

    # conv2 (3x3, s=1, p=1) + folded BN2 + fused 1x1 stride-2 shortcut
    panel2 = _im2col_3x3_s1(_zero_pad1_hw(h), Ho, Wo)
    xs = xph_ref[3, 0:Ho, 0:Wo, :]          # x[::2, ::2, :] = parity phase (1,1)
    panel2 = jnp.concatenate([panel2, xs.reshape(Ho * Wo, Cin)], axis=-1)
    out = jnp.dot(panel2, w2_ref[...], preferred_element_type=jnp.float32)
    out = jnp.maximum(out + b2_ref[...], 0.0)
    o_ref[...] = out.reshape(1, Ho, Wo, P).astype(o_ref.dtype)


# ---------------------------------------------------------------------------
# Wrapper: one pallas_call per BasicBlock
# ---------------------------------------------------------------------------
def _pad_and_phase2(x):
    """Host-side glue for stride-2 blocks only: zero-pad NHWC by 1 per side and
    split into the 4 (row,col)-parity phases -> (N*4, Hp/2, Wp/2, C).
    (Could be moved in-kernel with strided pl.ds reads; kept as one small XLA
    op for lowering robustness.)"""
    xp = jnp.pad(x, ((0, 0), (1, 1), (1, 1), (0, 0)))
    N, Hp, Wp, C = xp.shape
    if Hp % 2 or Wp % 2:
        xp = jnp.pad(xp, ((0, 0), (0, Hp % 2), (0, Wp % 2), (0, 0)))
        N, Hp, Wp, C = xp.shape
    phases = [xp[:, a::2, b::2, :] for a in range(2) for b in range(2)]
    xph = jnp.stack(phases, axis=1)                   # (N, 4, Hp/2, Wp/2, C)
    return xph.reshape(N * 4, Hp // 2, Wp // 2, C)


def basic_block_forward(x, blk, *, out_dtype=jnp.bfloat16):
    """x: (N, H, W, Cin) bf16 NHWC.  relu(bn2(conv2(relu(bn1(conv1 x)))) + skip(x))."""
    N, H, W, Cin = x.shape
    s = blk['stride']
    P = blk['planes']
    proj = blk['proj']
    assert s in (1, 2), "BasicBlock supports stride 1 or 2"
    Ho = (H + 2 - 3) // s + 1
    Wo = (W + 2 - 3) // s + 1
    if not proj:
        assert s == 1 and Cin == P

    w1, b1, w2, b2 = blk['w1_k'], blk['b1_k'], blk['w2_k'], blk['b2_k']

    if s == 1:
        x_in = x
        kernel = functools.partial(_basic_block_s1_kernel, proj=proj)
        x_spec = pl.BlockSpec((1, H, W, Cin), lambda n: (n, 0, 0, 0))
    else:
        x_in = _pad_and_phase2(x)
        _, Hpp, Wpp, _ = x_in.shape
        kernel = functools.partial(_basic_block_s2_kernel, Ho=Ho, Wo=Wo)
        x_spec = pl.BlockSpec((4, Hpp, Wpp, Cin), lambda n: (n, 0, 0, 0))

    weight_specs = [
        pl.BlockSpec(w1.shape, lambda n: (0, 0)),
        pl.BlockSpec(b1.shape, lambda n: (0, 0)),
        pl.BlockSpec(w2.shape, lambda n: (0, 0)),
        pl.BlockSpec(b2.shape, lambda n: (0, 0)),
    ]

    nbytes = lambda a: a.size * a.dtype.itemsize
    flops = 2 * N * Ho * Wo * (w1.shape[0] * P + w2.shape[0] * P)
    bytes_accessed = (nbytes(x_in) + nbytes(w1) + nbytes(b1) + nbytes(w2)
                      + nbytes(b2) + N * Ho * Wo * P * jnp.dtype(out_dtype).itemsize)

    return pl.pallas_call(
        kernel,
        out_shape=jax.ShapeDtypeStruct((N, Ho, Wo, P), out_dtype),
        grid=(N,),
        in_specs=[x_spec] + weight_specs,
        out_specs=pl.BlockSpec((1, Ho, Wo, P), lambda n: (n, 0, 0, 0)),
        compiler_params=pltpu.CompilerParams(dimension_semantics=("parallel",)),
        cost_estimate=pl.CostEstimate(flops=int(flops), transcendentals=0,
                                      bytes_accessed=int(bytes_accessed)),
    )(x_in, w1, b1, w2, b2)


# ---------------------------------------------------------------------------
# Parameter init (deterministic, synthetic) -- kernel-ready forms built ONCE:
# BN scale folded into f32 weights then cast to bf16; biases kept in f32.
# ---------------------------------------------------------------------------
def init_basic_block(key, in_planes, planes, stride, eps=1e-5):
    ks = jax.random.split(key, 6)

    def conv_w(k, kh, kw, cin, cout):
        std = 1.0 / float(kh * kw * cin) ** 0.5
        return jax.random.normal(k, (kh, kw, cin, cout), jnp.float32) * std

    def bn_fold(k, c):
        k1, k2, k3 = jax.random.split(k, 3)
        gamma = 1.0 + 0.1 * jax.random.normal(k1, (c,), jnp.float32)
        beta = 0.1 * jax.random.normal(k2, (c,), jnp.float32)
        mean = 0.1 * jax.random.normal(k3, (c,), jnp.float32)
        var = jnp.ones((c,), jnp.float32)
        scale = gamma / jnp.sqrt(var + eps)
        bias = beta - mean * scale
        return scale, bias

    p = {'stride': stride, 'planes': planes,
         'proj': (stride != 1) or (in_planes != planes)}   # BasicBlock.expansion == 1
    p['w1'] = conv_w(ks[0], 3, 3, in_planes, planes)
    p['s1'], p['b1'] = bn_fold(ks[1], planes)
    p['w2'] = conv_w(ks[2], 3, 3, planes, planes)
    p['s2'], p['b2'] = bn_fold(ks[3], planes)
    if p['proj']:
        p['sc_w'] = conv_w(ks[4], 1, 1, in_planes, planes)
        p['sc_s'], p['sc_b'] = bn_fold(ks[5], planes)

    p['w1_k'] = (p['w1'] * p['s1']).reshape(9 * in_planes, planes).astype(jnp.bfloat16)
    p['b1_k'] = p['b1'].reshape(1, planes)
    w2f = (p['w2'] * p['s2']).reshape(9 * planes, planes)
    if p['proj']:
        scwf = p['sc_w'].reshape(in_planes, planes) * p['sc_s']
        p['w2_k'] = jnp.concatenate([w2f, scwf], axis=0).astype(jnp.bfloat16)
        p['b2_k'] = (p['b2'] + p['sc_b']).reshape(1, planes)
    else:
        p['w2_k'] = w2f.astype(jnp.bfloat16)
        p['b2_k'] = p['b2'].reshape(1, planes)
    return p


# ---------------------------------------------------------------------------
# Pure-JAX f32 reference (sanity check)
# ---------------------------------------------------------------------------
def _conv_ref(x, w, stride, padding):
    return jax.lax.conv_general_dilated(
        x, w, window_strides=(stride, stride),
        padding=[(padding, padding), (padding, padding)],
        dimension_numbers=('NHWC', 'HWIO', 'NHWC'),
        precision=jax.lax.Precision.HIGHEST)


def basic_block_ref(x, blk):
    s = blk['stride']
    h = jnp.maximum(_conv_ref(x, blk['w1'], s, 1) * blk['s1'] + blk['b1'], 0.0)
    out = _conv_ref(h, blk['w2'], 1, 1) * blk['s2'] + blk['b2']
    if 'sc_w' in blk:
        sc = _conv_ref(x, blk['sc_w'], s, 0) * blk['sc_s'] + blk['sc_b']
    else:
        sc = x
    return jnp.maximum(out + sc, 0.0)


if __name__ == "__main__":
    key = jax.random.PRNGKey(0)
    kx, kb1, kb2 = jax.random.split(key, 3)

    N, Cin, H, W = 2, 16, 16, 16
    x_nchw = jax.random.normal(kx, (N, Cin, H, W), jnp.float32)   # PyTorch NCHW

    blk1 = init_basic_block(kb1, in_planes=Cin, planes=16, stride=1)  # identity skip
    blk2 = init_basic_block(kb2, in_planes=16, planes=32, stride=2)   # projection skip

    @jax.jit
    def fwd(x_nchw):
        x = jnp.transpose(x_nchw, (0, 2, 3, 1)).astype(jnp.bfloat16)  # NCHW -> NHWC
        h = basic_block_forward(x, blk1, out_dtype=jnp.bfloat16)
        y = basic_block_forward(h, blk2, out_dtype=jnp.float32)
        return jnp.transpose(y, (0, 3, 1, 2))                         # back to NCHW

    out = jax.block_until_ready(fwd(x_nchw))
    assert out.shape == (N, 32, H // 2, W // 2), out.shape
    assert bool(jnp.all(jnp.isfinite(out)))

    # f32 reference; bf16 matmul inputs + folded-BN bf16 weights => small deviation
    x_nhwc = jnp.transpose(x_nchw, (0, 2, 3, 1))
    ref = jnp.transpose(basic_block_ref(basic_block_ref(x_nhwc, blk1), blk2),
                        (0, 3, 1, 2))
    err = float(jnp.max(jnp.abs(out - ref)) / (jnp.max(jnp.abs(ref)) + 1e-6))
    assert err < 5e-2, f"max error (rel to max |ref|) = {err}"
    print("KERNEL_OK")
</pallas_src>

<mosaic_0001>
module attributes {stable_mosaic.version = 11 : i64} {
  func.func @_basic_block_s1_kernel(%arg0: i32, %arg1: memref<1x16x16x16xbf16, #tpu.memory_space<vmem>>, %arg2: memref<144x16xbf16, #tpu.memory_space<vmem>>, %arg3: memref<1x16xf32, #tpu.memory_space<vmem>>, %arg4: memref<144x16xbf16, #tpu.memory_space<vmem>>, %arg5: memref<1x16xf32, #tpu.memory_space<vmem>>, %arg6: memref<1x16x16x16xbf16, #tpu.memory_space<vmem>>) attributes {dimension_semantics = [#tpu.dimension_semantics<parallel>], iteration_bounds = array<i64: 2>, scalar_prefetch = 0 : i64, scratch_operands = 0 : i64, tpu.core_type = #tpu.core_type<tc>, window_params = [{transform_indices = @transform_0, window_bounds = array<i64: 1, 16, 16, 16>}, {pipeline_mode = #tpu.pipeline_mode<synchronous>, transform_indices = @transform_1, window_bounds = array<i64: 144, 16>}, {pipeline_mode = #tpu.pipeline_mode<synchronous>, transform_indices = @transform_2, window_bounds = array<i64: 1, 16>}, {pipeline_mode = #tpu.pipeline_mode<synchronous>, transform_indices = @transform_3, window_bounds = array<i64: 144, 16>}, {pipeline_mode = #tpu.pipeline_mode<synchronous>, transform_indices = @transform_4, window_bounds = array<i64: 1, 16>}, {transform_indices = @transform_5, window_bounds = array<i64: 1, 16, 16, 16>}]} {
    %c0 = arith.constant 0 : index
    %c0_0 = arith.constant 0 : index
    %c0_1 = arith.constant 0 : index
    %c0_2 = arith.constant 0 : index
    %0 = vector.load %arg1[%c0, %c0_0, %c0_1, %c0_2] : memref<1x16x16x16xbf16, #tpu.memory_space<vmem>>, vector<1x16x16x16xbf16>
    %1 = vector.shape_cast %0 : vector<1x16x16x16xbf16> to vector<16x16x16xbf16>
    %cst = arith.constant 0.000000e+00 : bf16
    %2 = vector.broadcast %cst : bf16 to vector<1x16x16xbf16>
    %3 = tpu.concatenate %2, %1, %2 in 0 : vector<1x16x16xbf16>, vector<16x16x16xbf16>, vector<1x16x16xbf16> -> vector<18x16x16xbf16>
    %cst_3 = arith.constant 0.000000e+00 : bf16
    %4 = vector.broadcast %cst_3 : bf16 to vector<18x1x16xbf16>
    %5 = tpu.concatenate %4, %3, %4 in 1 : vector<18x1x16xbf16>, vector<18x16x16xbf16>, vector<18x1x16xbf16> -> vector<18x18x16xbf16>
    %6 = vector.extract_strided_slice %5 {offsets = [0, 0, 0], sizes = [16, 16, 16], strides = [1, 1, 1]} : vector<18x18x16xbf16> to vector<16x16x16xbf16>
    %7 = vector.extract_strided_slice %5 {offsets = [0, 1, 0], sizes = [16, 16, 16], strides = [1, 1, 1]} : vector<18x18x16xbf16> to vector<16x16x16xbf16>
    %8 = vector.extract_strided_slice %5 {offsets = [0, 2, 0], sizes = [16, 16, 16], strides = [1, 1, 1]} : vector<18x18x16xbf16> to vector<16x16x16xbf16>
    %9 = vector.extract_strided_slice %5 {offsets = [1, 0, 0], sizes = [16, 16, 16], strides = [1, 1, 1]} : vector<18x18x16xbf16> to vector<16x16x16xbf16>
    %10 = vector.extract_strided_slice %5 {offsets = [1, 1, 0], sizes = [16, 16, 16], strides = [1, 1, 1]} : vector<18x18x16xbf16> to vector<16x16x16xbf16>
    %11 = vector.extract_strided_slice %5 {offsets = [1, 2, 0], sizes = [16, 16, 16], strides = [1, 1, 1]} : vector<18x18x16xbf16> to vector<16x16x16xbf16>
    %12 = vector.extract_strided_slice %5 {offsets = [2, 0, 0], sizes = [16, 16, 16], strides = [1, 1, 1]} : vector<18x18x16xbf16> to vector<16x16x16xbf16>
    %13 = vector.extract_strided_slice %5 {offsets = [2, 1, 0], sizes = [16, 16, 16], strides = [1, 1, 1]} : vector<18x18x16xbf16> to vector<16x16x16xbf16>
    %14 = vector.extract_strided_slice %5 {offsets = [2, 2, 0], sizes = [16, 16, 16], strides = [1, 1, 1]} : vector<18x18x16xbf16> to vector<16x16x16xbf16>
    %15 = tpu.concatenate %6, %7, %8, %9, %10, %11, %12, %13, %14 in 2 : vector<16x16x16xbf16>, vector<16x16x16xbf16>, vector<16x16x16xbf16>, vector<16x16x16xbf16>, vector<16x16x16xbf16>, vector<16x16x16xbf16>, vector<16x16x16xbf16>, vector<16x16x16xbf16>, vector<16x16x16xbf16> -> vector<16x16x144xbf16>
    %16 = vector.shape_cast %15 : vector<16x16x144xbf16> to vector<256x144xbf16>
    %c0_4 = arith.constant 0 : index
    %c0_5 = arith.constant 0 : index
    %17 = vector.load %arg2[%c0_4, %c0_5] : memref<144x16xbf16, #tpu.memory_space<vmem>>, vector<144x16xbf16>
    %cst_6 = arith.constant dense<0.000000e+00> : vector<256x16xf32>
    %18 = tpu.matmul %16, %17, %cst_6 {dimension_numbers = #tpu.dot_dimension_numbers<[1], [0], [0], [1], [0, 0, 1, 1], [], []>} : vector<256x144xbf16>, vector<144x16xbf16>, vector<256x16xf32> -> vector<256x16xf32>
    %c0_7 = arith.constant 0 : index
    %c0_8 = arith.constant 0 : index
    %19 = vector.load %arg3[%c0_7, %c0_8] : memref<1x16xf32, #tpu.memory_space<vmem>>, vector<1x16xf32>
    %20 = vector.broadcast %19 : vector<1x16xf32> to vector<256x16xf32>
    %21 = arith.addf %18, %20 : vector<256x16xf32>
    %cst_9 = arith.constant 0.000000e+00 : f32
    %22 = vector.broadcast %cst_9 : f32 to vector<256x16xf32>
    %23 = arith.maximumf %21, %22 : vector<256x16xf32>
    %24 = arith.truncf %23 : vector<256x16xf32> to vector<256x16xbf16>
    %25 = vector.shape_cast %24 : vector<256x16xbf16> to vector<16x16x16xbf16>
    %cst_10 = arith.constant 0.000000e+00 : bf16
    %26 = vector.broadcast %cst_10 : bf16 to vector<1x16x16xbf16>
    %27 = tpu.concatenate %26, %25, %26 in 0 : vector<1x16x16xbf16>, vector<16x16x16xbf16>, vector<1x16x16xbf16> -> vector<18x16x16xbf16>
    %cst_11 = arith.constant 0.000000e+00 : bf16
    %28 = vector.broadcast %cst_11 : bf16 to vector<18x1x16xbf16>
    %29 = tpu.concatenate %28, %27, %28 in 1 : vector<18x1x16xbf16>, vector<18x16x16xbf16>, vector<18x1x16xbf16> -> vector<18x18x16xbf16>
    %30 = vector.extract_strided_slice %29 {offsets = [0, 0, 0], sizes = [16, 16, 16], strides = [1, 1, 1]} : vector<18x18x16xbf16> to vector<16x16x16xbf16>
    %31 = vector.extract_strided_slice %29 {offsets = [0, 1, 0], sizes = [16, 16, 16], strides = [1, 1, 1]} : vector<18x18x16xbf16> to vector<16x16x16xbf16>
    %32 = vector.extract_strided_slice %29 {offsets = [0, 2, 0], sizes = [16, 16, 16], strides = [1, 1, 1]} : vector<18x18x16xbf16> to vector<16x16x16xbf16>
    %33 = vector.extract_strided_slice %29 {offsets = [1, 0, 0], sizes = [16, 16, 16], strides = [1, 1, 1]} : vector<18x18x16xbf16> to vector<16x16x16xbf16>
    %34 = vector.extract_strided_slice %29 {offsets = [1, 1, 0], sizes = [16, 16, 16], strides = [1, 1, 1]} : vector<18x18x16xbf16> to vector<16x16x16xbf16>
    %35 = vector.extract_strided_slice %29 {offsets = [1, 2, 0], sizes = [16, 16, 16], strides = [1, 1, 1]} : vector<18x18x16xbf16> to vector<16x16x16xbf16>
    %36 = vector.extract_strided_slice %29 {offsets = [2, 0, 0], sizes = [16, 16, 16], strides = [1, 1, 1]} : vector<18x18x16xbf16> to vector<16x16x16xbf16>
    %37 = vector.extract_strided_slice %29 {offsets = [2, 1, 0], sizes = [16, 16, 16], strides = [1, 1, 1]} : vector<18x18x16xbf16> to vector<16x16x16xbf16>
    %38 = vector.extract_strided_slice %29 {offsets = [2, 2, 0], sizes = [16, 16, 16], strides = [1, 1, 1]} : vector<18x18x16xbf16> to vector<16x16x16xbf16>
    %39 = tpu.concatenate %30, %31, %32, %33, %34, %35, %36, %37, %38 in 2 : vector<16x16x16xbf16>, vector<16x16x16xbf16>, vector<16x16x16xbf16>, vector<16x16x16xbf16>, vector<16x16x16xbf16>, vector<16x16x16xbf16>, vector<16x16x16xbf16>, vector<16x16x16xbf16>, vector<16x16x16xbf16> -> vector<16x16x144xbf16>
    %40 = vector.shape_cast %39 : vector<16x16x144xbf16> to vector<256x144xbf16>
    %c0_12 = arith.constant 0 : index
    %c0_13 = arith.constant 0 : index
    %41 = vector.load %arg4[%c0_12, %c0_13] : memref<144x16xbf16, #tpu.memory_space<vmem>>, vector<144x16xbf16>
    %cst_14 = arith.constant dense<0.000000e+00> : vector<256x16xf32>
    %42 = tpu.matmul %40, %41, %cst_14 {dimension_numbers = #tpu.dot_dimension_numbers<[1], [0], [0], [1], [0, 0, 1, 1], [], []>} : vector<256x144xbf16>, vector<144x16xbf16>, vector<256x16xf32> -> vector<256x16xf32>
    %c0_15 = arith.constant 0 : index
    %c0_16 = arith.constant 0 : index
    %43 = vector.load %arg5[%c0_15, %c0_16] : memref<1x16xf32, #tpu.memory_space<vmem>>, vector<1x16xf32>
    %44 = vector.broadcast %43 : vector<1x16xf32> to vector<256x16xf32>
    %45 = arith.addf %42, %44 : vector<256x16xf32>
    %46 = vector.shape_cast %1 : vector<16x16x16xbf16> to vector<256x16xbf16>
    %47 = arith.extf %46 : vector<256x16xbf16> to vector<256x16xf32>
    %48 = arith.addf %45, %47 : vector<256x16xf32>
    %cst_17 = arith.constant 0.000000e+00 : f32
    %49 = vector.broadcast %cst_17 : f32 to vector<256x16xf32>
    %50 = arith.maximumf %48, %49 : vector<256x16xf32>
    %51 = vector.shape_cast %50 : vector<256x16xf32> to vector<1x16x16x16xf32>
    %52 = arith.truncf %51 : vector<1x16x16x16xf32> to vector<1x16x16x16xbf16>
    %c0_18 = arith.constant 0 : index
    %c0_19 = arith.constant 0 : index
    %c0_20 = arith.constant 0 : index
    %c0_21 = arith.constant 0 : index
    %53 = vector.load %arg6[%c0_18, %c0_19, %c0_20, %c0_21] : memref<1x16x16x16xbf16, #tpu.memory_space<vmem>>, vector<1x16x16x16xbf16>
    tpu.vector_store %arg6[%c0_18, %c0_19, %c0_20, %c0_21], %52 {strides = array<i32>} : memref<1x16x16x16xbf16, #tpu.memory_space<vmem>>, vector<1x16x16x16xbf16>,
    return
  }
  func.func @transform_0(%arg0: i32) -> (i32, i32, i32, i32) {
    %c0_i32 = arith.constant 0 : i32
    %c0_i32_0 = arith.constant 0 : i32
    %c0_i32_1 = arith.constant 0 : i32
    %c0_i32_2 = arith.constant 0 : i32
    return %arg0, %c0_i32, %c0_i32_0, %c0_i32_1 : i32, i32, i32, i32
  }
  func.func @transform_1(%arg0: i32) -> (i32, i32) {
    %c0_i32 = arith.constant 0 : i32
    %c0_i32_0 = arith.constant 0 : i32
    %c0_i32_1 = arith.constant 0 : i32
    return %c0_i32, %c0_i32_0 : i32, i32
  }
  func.func @transform_2(%arg0: i32) -> (i32, i32) {
    %c0_i32 = arith.constant 0 : i32
    %c0_i32_0 = arith.constant 0 : i32
    %c0_i32_1 = arith.constant 0 : i32
    return %c0_i32, %c0_i32_0 : i32, i32
  }
  func.func @transform_3(%arg0: i32) -> (i32, i32) {
    %c0_i32 = arith.constant 0 : i32
    %c0_i32_0 = arith.constant 0 : i32
    %c0_i32_1 = arith.constant 0 : i32
    return %c0_i32, %c0_i32_0 : i32, i32
  }
  func.func @transform_4(%arg0: i32) -> (i32, i32) {
    %c0_i32 = arith.constant 0 : i32
    %c0_i32_0 = arith.constant 0 : i32
    %c0_i32_1 = arith.constant 0 : i32
    return %c0_i32, %c0_i32_0 : i32, i32
  }
  func.func @transform_5(%arg0: i32) -> (i32, i32, i32, i32) {
    %c0_i32 = arith.constant 0 : i32
    %c0_i32_0 = arith.constant 0 : i32
    %c0_i32_1 = arith.constant 0 : i32
    %c0_i32_2 = arith.constant 0 : i32
    return %arg0, %c0_i32, %c0_i32_0, %c0_i32_1 : i32, i32, i32, i32
  }
}

module attributes {stable_mosaic.version = 11 : i64} {
  func.func @_basic_block_s2_kernel(%arg0: i32, %arg1: memref<4x9x9x16xbf16, #tpu.memory_space<vmem>>, %arg2: memref<144x32xbf16, #tpu.memory_space<vmem>>, %arg3: memref<1x32xf32, #tpu.memory_space<vmem>>, %arg4: memref<304x32xbf16, #tpu.memory_space<vmem>>, %arg5: memref<1x32xf32, #tpu.memory_space<vmem>>, %arg6: memref<1x8x8x32xf32, #tpu.memory_space<vmem>>) attributes {dimension_semantics = [#tpu.dimension_semantics<parallel>], iteration_bounds = array<i64: 2>, scalar_prefetch = 0 : i64, scratch_operands = 0 : i64, tpu.core_type = #tpu.core_type<tc>, window_params = [{transform_indices = @transform_0, window_bounds = array<i64: 4, 9, 9, 16>}, {pipeline_mode = #tpu.pipeline_mode<synchronous>, transform_indices = @transform_1, window_bounds = array<i64: 144, 32>}, {pipeline_mode = #tpu.pipeline_mode<synchronous>, transform_indices = @transform_2, window_bounds = array<i64: 1, 32>}, {pipeline_mode = #tpu.pipeline_mode<synchronous>, transform_indices = @transform_3, window_bounds = array<i64: 304, 32>}, {pipeline_mode = #tpu.pipeline_mode<synchronous>, transform_indices = @transform_4, window_bounds = array<i64: 1, 32>}, {transform_indices = @transform_5, window_bounds = array<i64: 1, 8, 8, 32>}]} {
    %c0 = arith.constant 0 : index
    %c0_0 = arith.constant 0 : index
    %c0_1 = arith.constant 0 : index
    %c0_2 = arith.constant 0 : index
    %0 = vector.load %arg1[%c0, %c0_0, %c0_1, %c0_2] : memref<4x9x9x16xbf16, #tpu.memory_space<vmem>>, vector<1x8x8x16xbf16>
    %1 = vector.shape_cast %0 : vector<1x8x8x16xbf16> to vector<8x8x16xbf16>
    %c1 = arith.constant 1 : index
    %c0_3 = arith.constant 0 : index
    %c0_4 = arith.constant 0 : index
    %c0_5 = arith.constant 0 : index
    %2 = vector.load %arg1[%c1, %c0_3, %c0_4, %c0_5] : memref<4x9x9x16xbf16, #tpu.memory_space<vmem>>, vector<1x8x8x16xbf16>
    %3 = vector.shape_cast %2 : vector<1x8x8x16xbf16> to vector<8x8x16xbf16>
    %c0_6 = arith.constant 0 : index
    %c0_7 = arith.constant 0 : index
    %c1_8 = arith.constant 1 : index
    %c0_9 = arith.constant 0 : index
    %4 = vector.load %arg1[%c0_6, %c0_7, %c1_8, %c0_9] : memref<4x9x9x16xbf16, #tpu.memory_space<vmem>>, vector<1x8x8x16xbf16>
    %5 = vector.shape_cast %4 : vector<1x8x8x16xbf16> to vector<8x8x16xbf16>
    %c2 = arith.constant 2 : index
    %c0_10 = arith.constant 0 : index
    %c0_11 = arith.constant 0 : index
    %c0_12 = arith.constant 0 : index
    %6 = vector.load %arg1[%c2, %c0_10, %c0_11, %c0_12] : memref<4x9x9x16xbf16, #tpu.memory_space<vmem>>, vector<1x8x8x16xbf16>
    %7 = vector.shape_cast %6 : vector<1x8x8x16xbf16> to vector<8x8x16xbf16>
    %c3 = arith.constant 3 : index
    %c0_13 = arith.constant 0 : index
    %c0_14 = arith.constant 0 : index
    %c0_15 = arith.constant 0 : index
    %8 = vector.load %arg1[%c3, %c0_13, %c0_14, %c0_15] : memref<4x9x9x16xbf16, #tpu.memory_space<vmem>>, vector<1x8x8x16xbf16>
    %9 = vector.shape_cast %8 : vector<1x8x8x16xbf16> to vector<8x8x16xbf16>
    %c2_16 = arith.constant 2 : index
    %c0_17 = arith.constant 0 : index
    %c1_18 = arith.constant 1 : index
    %c0_19 = arith.constant 0 : index
    %10 = vector.load %arg1[%c2_16, %c0_17, %c1_18, %c0_19] : memref<4x9x9x16xbf16, #tpu.memory_space<vmem>>, vector<1x8x8x16xbf16>
    %11 = vector.shape_cast %10 : vector<1x8x8x16xbf16> to vector<8x8x16xbf16>
    %c0_20 = arith.constant 0 : index
    %c1_21 = arith.constant 1 : index
    %c0_22 = arith.constant 0 : index
    %c0_23 = arith.constant 0 : index
    %12 = vector.load %arg1[%c0_20, %c1_21, %c0_22, %c0_23] : memref<4x9x9x16xbf16, #tpu.memory_space<vmem>>, vector<1x8x8x16xbf16>
    %13 = vector.shape_cast %12 : vector<1x8x8x16xbf16> to vector<8x8x16xbf16>
    %c1_24 = arith.constant 1 : index
    %c1_25 = arith.constant 1 : index
    %c0_26 = arith.constant 0 : index
    %c0_27 = arith.constant 0 : index
    %14 = vector.load %arg1[%c1_24, %c1_25, %c0_26, %c0_27] : memref<4x9x9x16xbf16, #tpu.memory_space<vmem>>, vector<1x8x8x16xbf16>
    %15 = vector.shape_cast %14 : vector<1x8x8x16xbf16> to vector<8x8x16xbf16>
    %c0_28 = arith.constant 0 : index
    %c1_29 = arith.constant 1 : index
    %c1_30 = arith.constant 1 : index
    %c0_31 = arith.constant 0 : index
    %16 = vector.load %arg1[%c0_28, %c1_29, %c1_30, %c0_31] : memref<4x9x9x16xbf16, #tpu.memory_space<vmem>>, vector<1x8x8x16xbf16>
    %17 = vector.shape_cast %16 : vector<1x8x8x16xbf16> to vector<8x8x16xbf16>
    %18 = tpu.concatenate %1, %3, %5, %7, %9, %11, %13, %15, %17 in 2 : vector<8x8x16xbf16>, vector<8x8x16xbf16>, vector<8x8x16xbf16>, vector<8x8x16xbf16>, vector<8x8x16xbf16>, vector<8x8x16xbf16>, vector<8x8x16xbf16>, vector<8x8x16xbf16>, vector<8x8x16xbf16> -> vector<8x8x144xbf16>
    %19 = vector.shape_cast %18 : vector<8x8x144xbf16> to vector<64x144xbf16>
    %c0_32 = arith.constant 0 : index
    %c0_33 = arith.constant 0 : index
    %20 = vector.load %arg2[%c0_32, %c0_33] : memref<144x32xbf16, #tpu.memory_space<vmem>>, vector<144x32xbf16>
    %cst = arith.constant dense<0.000000e+00> : vector<64x32xf32>
    %21 = tpu.matmul %19, %20, %cst {dimension_numbers = #tpu.dot_dimension_numbers<[1], [0], [0], [1], [0, 0, 1, 1], [], []>} : vector<64x144xbf16>, vector<144x32xbf16>, vector<64x32xf32> -> vector<64x32xf32>
    %c0_34 = arith.constant 0 : index
    %c0_35 = arith.constant 0 : index
    %22 = vector.load %arg3[%c0_34, %c0_35] : memref<1x32xf32, #tpu.memory_space<vmem>>, vector<1x32xf32>
    %23 = vector.broadcast %22 : vector<1x32xf32> to vector<64x32xf32>
    %24 = arith.addf %21, %23 : vector<64x32xf32>
    %cst_36 = arith.constant 0.000000e+00 : f32
    %25 = vector.broadcast %cst_36 : f32 to vector<64x32xf32>
    %26 = arith.maximumf %24, %25 : vector<64x32xf32>
    %27 = arith.truncf %26 : vector<64x32xf32> to vector<64x32xbf16>
    %28 = vector.shape_cast %27 : vector<64x32xbf16> to vector<8x8x32xbf16>
    %cst_37 = arith.constant 0.000000e+00 : bf16
    %29 = vector.broadcast %cst_37 : bf16 to vector<1x8x32xbf16>
    %30 = tpu.concatenate %29, %28, %29 in 0 : vector<1x8x32xbf16>, vector<8x8x32xbf16>, vector<1x8x32xbf16> -> vector<10x8x32xbf16>
    %cst_38 = arith.constant 0.000000e+00 : bf16
    %31 = vector.broadcast %cst_38 : bf16 to vector<10x1x32xbf16>
    %32 = tpu.concatenate %31, %30, %31 in 1 : vector<10x1x32xbf16>, vector<10x8x32xbf16>, vector<10x1x32xbf16> -> vector<10x10x32xbf16>
    %33 = vector.extract_strided_slice %32 {offsets = [0, 0, 0], sizes = [8, 8, 32], strides = [1, 1, 1]} : vector<10x10x32xbf16> to vector<8x8x32xbf16>
    %34 = vector.extract_strided_slice %32 {offsets = [0, 1, 0], sizes = [8, 8, 32], strides = [1, 1, 1]} : vector<10x10x32xbf16> to vector<8x8x32xbf16>
    %35 = vector.extract_strided_slice %32 {offsets = [0, 2, 0], sizes = [8, 8, 32], strides = [1, 1, 1]} : vector<10x10x32xbf16> to vector<8x8x32xbf16>
    %36 = vector.extract_strided_slice %32 {offsets = [1, 0, 0], sizes = [8, 8, 32], strides = [1, 1, 1]} : vector<10x10x32xbf16> to vector<8x8x32xbf16>
    %37 = vector.extract_strided_slice %32 {offsets = [1, 1, 0], sizes = [8, 8, 32], strides = [1, 1, 1]} : vector<10x10x32xbf16> to vector<8x8x32xbf16>
    %38 = vector.extract_strided_slice %32 {offsets = [1, 2, 0], sizes = [8, 8, 32], strides = [1, 1, 1]} : vector<10x10x32xbf16> to vector<8x8x32xbf16>
    %39 = vector.extract_strided_slice %32 {offsets = [2, 0, 0], sizes = [8, 8, 32], strides = [1, 1, 1]} : vector<10x10x32xbf16> to vector<8x8x32xbf16>
    %40 = vector.extract_strided_slice %32 {offsets = [2, 1, 0], sizes = [8, 8, 32], strides = [1, 1, 1]} : vector<10x10x32xbf16> to vector<8x8x32xbf16>
    %41 = vector.extract_strided_slice %32 {offsets = [2, 2, 0], sizes = [8, 8, 32], strides = [1, 1, 1]} : vector<10x10x32xbf16> to vector<8x8x32xbf16>
    %42 = tpu.concatenate %33, %34, %35, %36, %37, %38, %39, %40, %41 in 2 : vector<8x8x32xbf16>, vector<8x8x32xbf16>, vector<8x8x32xbf16>, vector<8x8x32xbf16>, vector<8x8x32xbf16>, vector<8x8x32xbf16>, vector<8x8x32xbf16>, vector<8x8x32xbf16>, vector<8x8x32xbf16> -> vector<8x8x288xbf16>
    %43 = vector.shape_cast %42 : vector<8x8x288xbf16> to vector<64x288xbf16>
    %c3_39 = arith.constant 3 : index
    %c0_40 = arith.constant 0 : index
    %c0_41 = arith.constant 0 : index
    %c0_42 = arith.constant 0 : index
    %44 = vector.load %arg1[%c3_39, %c0_40, %c0_41, %c0_42] : memref<4x9x9x16xbf16, #tpu.memory_space<vmem>>, vector<1x8x8x16xbf16>
    %45 = vector.shape_cast %44 : vector<1x8x8x16xbf16> to vector<8x8x16xbf16>
    %46 = vector.shape_cast %45 : vector<8x8x16xbf16> to vector<64x16xbf16>
    %47 = tpu.concatenate %43, %46 in 1 : vector<64x288xbf16>, vector<64x16xbf16> -> vector<64x304xbf16>
    %c0_43 = arith.constant 0 : index
    %c0_44 = arith.constant 0 : index
    %48 = vector.load %arg4[%c0_43, %c0_44] : memref<304x32xbf16, #tpu.memory_space<vmem>>, vector<304x32xbf16>
    %cst_45 = arith.constant dense<0.000000e+00> : vector<64x32xf32>
    %49 = tpu.matmul %47, %48, %cst_45 {dimension_numbers = #tpu.dot_dimension_numbers<[1], [0], [0], [1], [0, 0, 1, 1], [], []>} : vector<64x304xbf16>, vector<304x32xbf16>, vector<64x32xf32> -> vector<64x32xf32>
    %c0_46 = arith.constant 0 : index
    %c0_47 = arith.constant 0 : index
    %50 = vector.load %arg5[%c0_46, %c0_47] : memref<1x32xf32, #tpu.memory_space<vmem>>, vector<1x32xf32>
    %51 = vector.broadcast %50 : vector<1x32xf32> to vector<64x32xf32>
    %52 = arith.addf %49, %51 : vector<64x32xf32>
    %cst_48 = arith.constant 0.000000e+00 : f32
    %53 = vector.broadcast %cst_48 : f32 to vector<64x32xf32>
    %54 = arith.maximumf %52, %53 : vector<64x32xf32>
    %55 = vector.shape_cast %54 : vector<64x32xf32> to vector<1x8x8x32xf32>
    %c0_49 = arith.constant 0 : index
    %c0_50 = arith.constant 0 : index
    %c0_51 = arith.constant 0 : index
    %c0_52 = arith.constant 0 : index
    %56 = vector.load %arg6[%c0_49, %c0_50, %c0_51, %c0_52] : memref<1x8x8x32xf32, #tpu.memory_space<vmem>>, vector<1x8x8x32xf32>
    tpu.vector_store %arg6[%c0_49, %c0_50, %c0_51, %c0_52], %55 {strides = array<i32>} : memref<1x8x8x32xf32, #tpu.memory_space<vmem>>, vector<1x8x8x32xf32>,
    return
  }
  func.func @transform_0(%arg0: i32) -> (i32, i32, i32, i32) {
    %c0_i32 = arith.constant 0 : i32
    %c0_i32_0 = arith.constant 0 : i32
    %c0_i32_1 = arith.constant 0 : i32
    %c0_i32_2 = arith.constant 0 : i32
    return %arg0, %c0_i32, %c0_i32_0, %c0_i32_1 : i32, i32, i32, i32
  }
  func.func @transform_1(%arg0: i32) -> (i32, i32) {
    %c0_i32 = arith.constant 0 : i32
    %c0_i32_0 = arith.constant 0 : i32
    %c0_i32_1 = arith.constant 0 : i32
    return %c0_i32, %c0_i32_0 : i32, i32
  }
  func.func @transform_2(%arg0: i32) -> (i32, i32) {
    %c0_i32 = arith.constant 0 : i32
    %c0_i32_0 = arith.constant 0 : i32
    %c0_i32_1 = arith.constant 0 : i32
    return %c0_i32, %c0_i32_0 : i32, i32
  }
  func.func @transform_3(%arg0: i32) -> (i32, i32) {
    %c0_i32 = arith.constant 0 : i32
    %c0_i32_0 = arith.constant 0 : i32
    %c0_i32_1 = arith.constant 0 : i32
    return %c0_i32, %c0_i32_0 : i32, i32
  }
  func.func @transform_4(%arg0: i32) -> (i32, i32) {
    %c0_i32 = arith.constant 0 : i32
    %c0_i32_0 = arith.constant 0 : i32
    %c0_i32_1 = arith.constant 0 : i32
    return %c0_i32, %c0_i32_0 : i32, i32
  }
  func.func @transform_5(%arg0: i32) -> (i32, i32, i32, i32) {
    %c0_i32 = arith.constant 0 : i32
    %c0_i32_0 = arith.constant 0 : i32
    %c0_i32_1 = arith.constant 0 : i32
    %c0_i32_2 = arith.constant 0 : i32
    return %arg0, %c0_i32, %c0_i32_0, %c0_i32_1 : i32, i32, i32, i32
  }
}

</mosaic_0001>

<bundles_post_ra>
// kernel: fwd.3
= control target key start
LH: loop header
LB: loop body
LE: loop exit
PB: predicated region body
PF: predicated region fallthrough
CT: control target
= control target key end

     0   :  { %10 = vsyncpa [#allocation3], 0  ;;  %s3466_s0 = inlined_call_operand.vmem [shape: bf16[8,9,9,16], index: 0, kind: input, shape index: {}]   ;;  %s3467_s1 = inlined_call_operand.vmem [shape: bf16[144,32], index: 1, kind: input, shape index: {}]   ;;  %s3468_s2 = inlined_call_operand.vmem [shape: f32[1,32], index: 2, kind: input, shape index: {}]   ;;  %s3469_s3 = inlined_call_operand.vmem [shape: bf16[304,32], index: 3, kind: input, shape index: {}]   ;;  %s3470_s4 = inlined_call_operand.vmem [shape: f32[1,32], index: 4, kind: input, shape index: {}]   ;;  %s3471_s5 = inlined_call_operand.hbm [shape: f32[2,8,8,32], index: 5, kind: output, shape index: {}]  }
   0x1   :  { %12 = vsyncpa [#allocation3 + $0x1], 0  ;;  %s2524_s18 = smov 0   ;;  %s2526_s19 = smov 0  }
   0x2   :  { %s2528_s20 = smov 0   ;;  %s2530_s21 = smov 0  }
   0x3 LB: > { %s2545_s22 = sadd.s32 4294967295, %s2481_s21   ;;  %s1995_s23 = sadd.s32 4294967294, %s2481_s21   ;;  %s2481_s21 = sphi %s2530_s21, %s3481_s21   ;;  %s2477_s20 = sphi %s2528_s20, %s3480_s20   ;;  %s2473_s19 = sphi %s2526_s19, %s3479_s19   ;;  %s2469_s18 = sphi %s2524_s18, %s3478_s18  }
   0x4   : > { %s2549_s24 = sadd.s32 1, %s2481_s21   ;;  %s135_s25 = sadd.s32 1, %s2477_s20 }
   0x5   : > { %s132_s26 = ssub.s32 %s2481_s21, %s2549_s24  ;;  %p145_p0 = scmp.ne.s32.totalorder %s2477_s20, %s2473_s19 }
   0x6   : > { %p133_p1 = scmp.eq.s32.totalorder %s132_s26, 0  ;;  %p146_p2 = scmp.eq.s32.totalorder %s2545_s22, 1 }
   0x7   : > { %p151_p3 = scmp.ne.s32.totalorder %s2473_s19, %s2469_s18  ;;  %p152_p4 = scmp.eq.s32.totalorder %s1995_s23, 1 }
   0x8   : > { %s2560_s27 = scalar_select %p133_p1, %s2477_s20, %s135_s25  }
   0x9   : > { %p2562_p5 = por %p146_p2, %p145_p0  ;;  %p2566_p6 = por %p152_p4, %p151_p3 }
   0xa   : > { %p1998_p7 = scmp.ge.s32.totalorder %s2481_s21, 1  ;;  %p192_p8 = scmp.lt.s32.totalorder %s2481_s21, 3 }
   0xc   : > { %p193_p9 = pnand %p1998_p7, %p192_p8 }
   0xd   : > { %s2000_s30 = sshll.u32 (!%p193_p9), %s2545_s22, 2  ;;  %v2389_v0 = vld [vmem:[%s3467_s1] sm:$0xff] (!%p193_p9)   ;;  %v2483_v1 = vmov (!%p193_p9), 0   ;;  %v2392_v2 = vld [vmem:[%s3467_s1 + $0x8] sm:$0xff] (!%p193_p9)   ;;  %v2393_v3 = vld [vmem:[%s3467_s1 + $0x10] sm:$0xff] (!%p193_p9)   ;;  %s2484_s23 = smov (!%p193_p9), 48  }
   0xe   : > { %196 = sbr.rel (%p193_p9) target bundleno = 864 (0x360), region = 40  ;;  %p222_p10 = scmp.lt.s32.totalorder (!%p193_p9), %s2000_s30, 7  ;;  %1048 = vmatprep.subr.bf16.mxu0 (!%p193_p9), %v2483_v1  ;;  %v2394_v6 = vld [vmem:[%s3467_s1 + $0x18] sm:$0xff] (!%p193_p9)   ;;  %v2395_v26 = vld [vmem:[%s3467_s1 + $0x20] sm:$0xff] (!%p193_p9)   ;;  %v2396_v35 = vld [vmem:[%s3467_s1 + $0x28] sm:$0xff] (!%p193_p9)   ;;  %vm794_vm0 = vcmask (!%p193_p9), 130048  }
   0xf   : > { %1049 = vmatpush1.bf16.msra.mxu0 (!%p193_p9), %v2389_v0  ;;  %s2485_s25 = smov (!%p193_p9), 16   ;;  %s2486_s6 = smov (!%p193_p9), 64   ;;  %v2397_v54 = vld [vmem:[%s3467_s1 + $0x30] sm:$0xff] (!%p193_p9)   ;;  %v2398_v59 = vld [vmem:[%s3467_s1 + $0x38] sm:$0xff] (!%p193_p9)   ;;  %vm819_vm1 = vcmask (!%p193_p9), 261120   ;;  %vm836_vm2 = vcmask (!%p193_p9), 392192  }
  0x10   : > { %1050 = vmatprep.subr.bf16.mxu0 (!%p193_p9), %v2483_v1  ;;  %s2487_s9 = smov (!%p193_p9), 32   ;;  %s2488_s14 = smov (!%p193_p9), 80   ;;  %vm853_vm3 = vcmask (!%p193_p9), 523264   ;;  %vm870_vm4 = vcmask (!%p193_p9), 654336   ;;  %vm887_vm5 = vcmask (!%p193_p9), 785408   ;;  %vm904_vm6 = vcmask (!%p193_p9), 916480  }
  0x11   : > { %s2489_s26 = smov (!%p193_p9), 96   ;;  %vm1217_vm7 = vcmask (!%p193_p9), 1040384   ;;  %vm1218_vm8 = vsmask.f32 (!%p193_p9), 256  ;;  %vm1229_vm10 = vcmask (!%p193_p9), 1044480   ;;  %s2205_s7 = sshll.u32 (!%p193_p9), %s2545_s22, 10 }
  0x12   : > { %vm2974_vm9 = vmand (!%p193_p9), %vm1217_vm7, %vm1218_vm8  ;;  %vm1230_vm11 = vsmask.f32 (!%p193_p9), 4352  ;;  %s3413_s12 = scalar_lea.hbm (!%p193_p9), %s3471_s5, %s2205_s7 }
  0x13   : > { %1051 = vmatpush1.bf16.msra.mxu0 (!%p193_p9), %v2392_v2  ;;  %v2399_v2 = vld [vmem:[%s3467_s1 + $0x40] sm:$0xff] (!%p193_p9)   ;;  %vm2980_vm12 = vmand (!%p193_p9), %vm1229_vm10, %vm1230_vm11 }
  0x14   : > { %1052 = vmatprep.subr.bf16.mxu0 (!%p193_p9), %v2483_v1 }
  0x15   : > { %s3483_s30 = smov (!%p222_p10, %s2000_s30), 7 }
  0x16   : > { %s2273_s10 = smul.u32 72, %s3483_s30  ;;  %s2490_s30 = smov 112  }
  0x17   : > { %1053 = vmatpush1.bf16.msra.mxu0 %v2393_v3 }
  0x18   : > { %s2587_s15 = scalar_lea.vmem %s3466_s0, %s2273_s10  ;;  %1054 = vmatprep.subr.bf16.mxu0 %v2483_v1 }
  0x19   : > { %v2011_v4 = vld [vmem:[%s2587_s15 + $0x98] sm:$0xf]  ;;  %v2027_v5 = vld [vmem:[%s2587_s15 + $0x9c] sm:$0x1]  ;;  %v2325_v8 = vld [vmem:[%s2587_s15 + $0x48] ss:$0 sps:$4 sm:$0xff]  }
  0x1a   : > { %v2075_v7 = vcombine.low %v2011_v4, %v2011_v4  ;;  %v2597_v9 = vld [vmem:[%s2587_s15 + $0xe0] sm:$0xf]  ;;  %v2327_v10 = vld [vmem:[%s2587_s15 + $0x50] ss:$0 sps:$4 sm:$0xff]   ;;  %v2026_v12 = vld [vmem:[%s2587_s15 + $0x94] sm:$0x1]  ;;  %330 = vrot.lane.b32.xlu0 %v2325_v8, %s2485_s25  ;;  %v2091_v17 = vcombine.low %v2011_v4, %v2027_v5 }
  0x1b   : > { %v2010_v11 = vld [vmem:[%s2587_s15 + $0x90] sm:$0xf]  ;;  %v2083_v13 = vcombine.low %v2597_v9, %v2597_v9  ;;  %v2607_v15 = vld [vmem:[%s2587_s15] sm:$0xf]  ;;  %v246_v16 = vld [vmem:[%s2587_s15 + $0x4] sm:$0x1]  ;;  %1055 = vmatpush1.bf16.msra.mxu0 %v2394_v6 }
  0x1c   : > { %484 = vrot.lane.b32.xlu1 %v2075_v7, %s2484_s23  ;;  %v2090_v14 = vcombine.low %v2010_v11, %v2026_v12  ;;  %v2066_v18 = vcombine.low %v2607_v15, %v246_v16  ;;  %v2612_v19 = vld [vmem:[%s2587_s15 + $0xd8] sm:$0xf]  ;;  %v2615_v20 = vld [vmem:[%s2587_s15 + $0x8] sm:$0xf]  ;;  %v247_v21 = vld [vmem:[%s2587_s15 + $0xc] sm:$0x1]  ;;  %v2074_v27 = vcombine.low %v2010_v11, %v2010_v11  ;;  %1056 = vmatprep.subr.bf16.mxu0 %v2483_v1 }
  0x1d   : > { %v2164_v22 = vcombine.low %v2612_v19, %v2597_v9  ;;  %v2067_v23 = vcombine.low %v2615_v20, %v247_v21  ;;  %v572_v30 = vshll.u32 %v2091_v17, 16  ;;  %v2082_v36 = vcombine.low %v2612_v19, %v2612_v19  ;;  %v2637_v42 = vld [vmem:[%s2587_s15 + $0x8] sm:$0xf]  ;;  %v2640_v43 = vld [vmem:[%s2587_s15 + $0x10] sm:$0xf] }
  0x1e   : > { %v387_v24 = vshrl.u32 %v2066_v18, 16  ;;  %v389_v25 = vshll.u32 %v2066_v18, 16  ;;  %332 = vrot.lane.b32.xlu0 %v2327_v10, %s2485_s25  ;;  %v565_v29 = vshll.u32 %v2090_v14, 16  ;;  %v563_v37 = vshrl.u32 %v2090_v14, 16  ;;  %v248_v44 = vld [vmem:[%s2587_s15 + $0x14] sm:$0x1] }
  0x1f   : > { %v396_v28 = vshll.u32 %v2067_v23, 16  ;;  %v394_v32 = vshrl.u32 %v2067_v23, 16  ;;  %1057 = vmatpush1.bf16.msra.mxu0 %v2395_v26  ;;  %v570_v39 = vshrl.u32 %v2091_v17, 16  ;;  %v574_v41 = vrot.slane %v572_v30, 1  ;;  %v2645_v46 = vld [vmem:[%s2587_s15 + $0x10] sm:$0xf] }
  0x20   : > { %524 = vrot.lane.b32.xlu1 %v2083_v13, %s2486_s6  ;;  %v391_v31 = vrot.slane %v389_v25, 1  ;;  %v567_v38 = vrot.slane %v565_v29, 1  ;;  %1058 = vmatprep.subr.bf16.mxu0 %v2483_v1  ;;  %v2648_v47 = vld [vmem:[%s2587_s15 + $0xe8] sm:$0xf]  ;;  %v2651_v48 = vld [vmem:[%s2587_s15 + $0xf0] sm:$0xf]  ;;  %v2098_v60 = vcombine.low %v2637_v42, %v2637_v42  ;;  %v2068_v61 = vcombine.low %v2640_v43, %v248_v44 }
  0x21   : > { %v398_v33 = vrot.slane %v396_v28, 1  ;;  %v2052_v49 = vld [vmem:[%s2587_s15 + $0x1c] sm:$0x1]  ;;  %v575_v50 = vor.u32 %v574_v41, %v570_v39  ;;  %v2657_v51 = vld [vmem:[%s2587_s15 + $0x18] sm:$0xf]  ;;  %v2165_v52 = vcombine.low %v2648_v47, %v2651_v48  ;;  %v2099_v63 = vcombine.low %v2645_v46, %v2645_v46 }
  0x22   : > { %v392_v34 = vor.u32 %v391_v31, %v387_v24  ;;  %482 = vrot.lane.b32.xlu0 %v2074_v27, %s2484_s23  ;;  %v568_v45 = vor.u32 %v567_v38, %v563_v37  ;;  %v2053_v53 = vld [vmem:[%s2587_s15 + $0x24] sm:$0x1]  ;;  %v249_v55 = vld [vmem:[%s2587_s15 + $0x1c] sm:$0x1]  ;;  %v2667_v56 = vld [vmem:[%s2587_s15 + $0x18] sm:$0xf] }
  0x23   : > { %v399_v40 = vor.u32 %v398_v33, %v394_v32  ;;  %1059 = vmatpush1.bf16.msra.mxu0 %v2396_v35  ;;  %v2670_v57 = vcombine.low %v2667_v56, %v2052_v49  ;;  %v2673_v58 = vld [vmem:[%s2587_s15 + $0x20] sm:$0xf]  ;;  %v2069_v0 = vcombine.low %v2657_v51, %v249_v55  ;;  %v2338_v3 = vld [vmem:[%s2587_s15 + $0x50] ss:$0 sps:$4 sm:$0xff]   ;;  %v403_v4 = vshll.u32 %v2068_v61, 16 }
  0x24   : > { %442 = vrot.lane.b32.xlu1 %v392_v34, %s2487_s9  ;;  %1060 = vmatprep.subr.bf16.mxu0 %v2483_v1  ;;  %v2683_v62 = vcombine.low %v2673_v58, %v2053_v53  ;;  %v2339_v5 = vld [vmem:[%s2587_s15 + $0x58] ss:$0 sps:$4 sm:$0xff]   ;;  %v2028_v8 = vld [vmem:[%s2587_s15 + $0xa4] sm:$0x1]  ;;  %v2341_v10 = vld [vmem:[%s2587_s15 + $0x60] ss:$0 sps:$4 sm:$0xff]  }
  0x25   : > { %v410_v6 = vshll.u32 %v2069_v0, 16  ;;  %v2340_v7 = vld [vmem:[%s2587_s15 + $0x58] ss:$0 sps:$4 sm:$0xff]   ;;  %v2012_v11 = vld [vmem:[%s2587_s15 + $0xa0] sm:$0xf]  ;;  %v401_v16 = vshrl.u32 %v2068_v61, 16 }
  0x26   : > { %522 = vrot.lane.b32.xlu0 %v2082_v36, %s2486_s6  ;;  %v2703_v12 = vld [vmem:[%s2587_s15 + $0xf8] sm:$0xf]  ;;  %v2706_v13 = vld [vmem:[%s2587_s15 + $0x100] sm:$0xf]  ;;  %v2054_v14 = vld [vmem:[%s2587_s15 + $0x2c] sm:$0x1]  ;;  %v2092_v27 = vcombine.low %v2012_v11, %v2028_v8 }
  0x27   : > { %1061 = vmatpush1.bf16.msra.mxu0 %v2397_v54  ;;  %v405_v17 = vrot.slane %v403_v4, 1  ;;  %v2029_v18 = vld [vmem:[%s2587_s15 + $0xac] sm:$0x1]  ;;  %v2166_v21 = vcombine.low %v2703_v12, %v2706_v13  ;;  %v2055_v23 = vld [vmem:[%s2587_s15 + $0x34] sm:$0x1]  ;;  %v408_v24 = vshrl.u32 %v2069_v0, 16 }
  0x28   : > { %444 = vrot.lane.b32.xlu1 %v399_v40, %s2487_s9  ;;  %1062 = vmatprep.subr.bf16.mxu0 %v2483_v1  ;;  %v412_v25 = vrot.slane %v410_v6, 1  ;;  %v2716_v26 = vld [vmem:[%s2587_s15 + $0x28] sm:$0xf]  ;;  %v2723_v30 = vld [vmem:[%s2587_s15 + $0x30] sm:$0xf]  ;;  %v579_v37 = vshll.u32 %v2092_v27, 16 }
  0x29   : > { %v2013_v28 = vld [vmem:[%s2587_s15 + $0xa8] sm:$0xf]  ;;  %v2720_v29 = vcombine.low %v2716_v26, %v2054_v14  ;;  %v2050_v31 = vld [vmem:[%s2587_s15 + $0xc] sm:$0x1]  ;;  %v2727_v33 = vcombine.low %v2723_v30, %v2055_v23  ;;  %v406_v34 = vor.u32 %v405_v17, %v401_v16  ;;  %v2733_v38 = vld [vmem:[%s2587_s15 + $0x20] sm:$0xf]  ;;  %v2085_v14 = vcombine.low %v2651_v48, %v2651_v48 }
  0x2a   : > { %618 = vrot.lane.b32.xlu0 %v568_v45, %s2488_s14  ;;  %v2093_v32 = vcombine.low %v2013_v28, %v2029_v18  ;;  %v413_v35 = vor.u32 %v412_v25, %v408_v24  ;;  %v2114_v36 = vcombine.low %v2637_v42, %v2050_v31  ;;  %v250_v39 = vld [vmem:[%s2587_s15 + $0x24] sm:$0x1]  ;;  %v755_v41 = vshll.u32 %v2670_v57, 16  ;;  %v2738_v44 = vld [vmem:[%s2587_s15 + $0x28] sm:$0xf] }
  0x2b   : > { %1063 = vmatpush1.bf16.msra.mxu0 %v2398_v59  ;;  %v251_v45 = vld [vmem:[%s2587_s15 + $0x2c] sm:$0x1]  ;;  %v2051_v49 = vld [vmem:[%s2587_s15 + $0x14] sm:$0x1]  ;;  %v2077_v42 = vcombine.low %v2013_v28, %v2013_v28  ;;  %v577_v53 = vshrl.u32 %v2092_v27, 16  ;;  %v762_v54 = vshll.u32 %v2683_v62, 16  ;;  %v2746_v55 = vcombine.low %v2733_v38, %v250_v39 }
  0x2c   : > { %620 = vrot.lane.b32.xlu1 %v575_v50, %s2488_s14  ;;  %1064 = vmatprep.subr.bf16.mxu0 %v2483_v1  ;;  %v586_v40 = vshll.u32 %v2093_v32, 16  ;;  %v2076_v50 = vcombine.low %v2012_v11, %v2012_v11  ;;  %v2749_v59 = vld [vmem:[%s2587_s15 + $0x108] sm:$0xf]  ;;  %v584_v61 = vshrl.u32 %v2093_v32, 16  ;;  %v581_v4 = vrot.slane %v579_v37, 1 }
  0x2d   : > { %v753_v6 = vshrl.u32 %v2670_v57, 16  ;;  %v2762_v8 = vld [vmem:[%s2587_s15 + $0x38] sm:$0xf]  ;;  %v2084_v11 = vcombine.low %v2648_v47, %v2648_v47  ;;  %v2774_v17 = vld [vmem:[%s2587_s15 + $0x40] sm:$0xf]  ;;  %v760_v57 = vshrl.u32 %v2683_v62, 16 }
  0x2e   : > { %658 = vrot.lane.b32.xlu0 %v2098_v60, %s2489_s26  ;;  %v2752_v60 = vld [vmem:[%s2587_s15 + $0x110] sm:$0xf]  ;;  %v2057_v18 = vld [vmem:[%s2587_s15 + $0x44] sm:$0x1]  ;;  %v764_v23 = vrot.slane %v762_v54, 1  ;;  %v739_v27 = vshrl.u32 %v2114_v36, 16  ;;  %v2101_v54 = vcombine.low %v2673_v58, %v2673_v58 }
  0x2f   : > { %1065 = vmatpush1.bf16.msra.mxu0 %v2399_v2  ;;  %v2167_v0 = vcombine.low %v2749_v59, %v2752_v60  ;;  %v2056_v2 = vld [vmem:[%s2587_s15 + $0x3c] sm:$0x1]  ;;  %v2781_v24 = vcombine.low %v2774_v17, %v2057_v18  ;;  %v415_v31 = vshrl.u32 %v2746_v55, 16  ;;  %v776_v18 = vshll.u32 %v2727_v33, 16 }
  0x30   : > { %660 = vrot.lane.b32.xlu1 %v2099_v63, %s2489_s26  ;;  %v2755_v63 = vcombine.low %v2738_v44, %v251_v45  ;;  %v2771_v16 = vcombine.low %v2762_v8, %v2056_v2  ;;  %v2357_v2 = vld [vmem:[%s2587_s15 + $0x68] ss:$0 sps:$4 sm:$0xff]  }
  0x32   : > { %698 = vrot.lane.b32.xlu0 %v2338_v3, %s2490_s30  ;;  %v741_v3 = vshll.u32 %v2114_v36, 16  ;;  %v424_v25 = vshll.u32 %v2755_v63, 16  ;;  %v2790_v36 = vor.u32 %v764_v23, %v760_v57 }
  0x34   : > { %700 = vrot.lane.b32.xlu1 %v2339_v5, %s2490_s30  ;;  %v588_v5 = vrot.slane %v586_v40, 1  ;;  %v743_v28 = vrot.slane %v741_v3, 1  ;;  %v422_v40 = vshrl.u32 %v2755_v63, 16  ;;  %v2356_v63 = vld [vmem:[%s2587_s15 + $0x68] ss:$0 sps:$4 sm:$0xff]  }
  0x35   : > { %v2358_v3 = vld [vmem:[%s2587_s15 + $0x70] ss:$0 sps:$4 sm:$0xff]  }
  0x36   : > { %334 = vrot.lane.b32.xlu0 %v2340_v7, %s2485_s25  ;;  %v757_v7 = vrot.slane %v755_v41, 1  ;;  %v589_v37 = vor.u32 %v588_v5, %v584_v61  ;;  %v426_v41 = vrot.slane %v424_v25, 1  ;;  %v744_v45 = vor.u32 %v743_v28, %v739_v27  ;;  %v2014_v5 = vld [vmem:[%s2587_s15 + $0xb0] sm:$0xf] }
  0x37   : > { %v2078_v57 = vcombine.low %v2014_v5, %v2014_v5  ;;  %v767_v27 = vshrl.u32 %v2720_v29, 16 }
  0x38   : > { %336 = vrot.lane.b32.xlu1 %v2341_v10, %s2485_s25  ;;  %v2115_v10 = vcombine.low %v2645_v46, %v2051_v49  ;;  %v417_v46 = vshll.u32 %v2746_v55, 16  ;;  %v2785_v32 = vor.u32 %v757_v7, %v753_v6  ;;  %v2355_v55 = vld [vmem:[%s2587_s15 + $0x60] ss:$0 sps:$4 sm:$0xff]   ;;  %v2015_v7 = vld [vmem:[%s2587_s15 + $0xb8] sm:$0xf] }
  0x3a   : > { %446 = vrot.lane.b32.xlu0 %v406_v34, %s2487_s9  ;;  %v582_v34 = vor.u32 %v581_v4, %v577_v53  ;;  %v748_v62 = vshll.u32 %v2115_v10, 16  ;;  %v419_v39 = vrot.slane %v417_v46, 1  ;;  %v2031_v4 = vld [vmem:[%s2587_s15 + $0xbc] sm:$0x1]  ;;  %v2079_v46 = vcombine.low %v2015_v7, %v2015_v7 }
  0x3c   : > { %448 = vrot.lane.b32.xlu1 %v413_v35, %s2487_s9  ;;  %v746_v35 = vshrl.u32 %v2115_v10, 16  ;;  %v750_v49 = vrot.slane %v748_v62, 1  ;;  %v420_v58 = vor.u32 %v419_v39, %v415_v31  ;;  %v427_v10 = vor.u32 %v426_v41, %v422_v40 }
  0x3d   : > { %v774_v31 = vshrl.u32 %v2727_v33, 16 }
  0x3e   : > { %486 = vrot.lane.b32.xlu0 %v2076_v50, %s2484_s23  ;;  %v2126_v50 = vcombine.low %v2785_v32, %v2790_v36  ;;  %v751_v53 = vor.u32 %v750_v49, %v746_v35  ;;  %v2086_v35 = vcombine.low %v2703_v12, %v2703_v12 }
  0x40   : > { %488 = vrot.lane.b32.xlu1 %v2077_v42, %s2484_s23  ;;  %v2100_v42 = vcombine.low %v2667_v56, %v2667_v56  ;;  %v2124_v61 = vcombine.low %v744_v45, %v751_v53  ;;  %v2030_v56 = vld [vmem:[%s2587_s15 + $0xb4] sm:$0x1]  ;;  %v2836_v53 = vld [vmem:[%s2587_s15 + $0x30] sm:$0xf] }
  0x41   : > { %v2094_v6 = vcombine.low %v2014_v5, %v2030_v56 }
  0x42   : > { %526 = vrot.lane.b32.xlu0 %v2084_v11, %s2486_s6  ;;  %2140 = vmatprep.mubr.msk.bf16.mxu0 %vm794_vm0, %v2124_v61  ;;  %v2095_v11 = vcombine.low %v2015_v7, %v2031_v4  ;;  %v253_v61 = vld [vmem:[%s2587_s15 + $0x3c] sm:$0x1]  ;;  %v2372_v4 = vld [vmem:[%s2587_s15 + $0x70] ss:$0 sps:$4 sm:$0xff]  }
  0x43   : > { %v593_v23 = vshll.u32 %v2094_v6, 16  ;;  %v591_v62 = vshrl.u32 %v2094_v6, 16  ;;  %v2374_v6 = vld [vmem:[%s2587_s15 + $0x78] ss:$0 sps:$4 sm:$0xff]  }
  0x44   : > { %528 = vrot.lane.b32.xlu1 %v2085_v14, %s2486_s6  ;;  %v769_v14 = vshll.u32 %v2720_v29, 16  ;;  %v600_v25 = vshll.u32 %v2095_v11, 16  ;;  %v2087_v29 = vcombine.low %v2706_v13, %v2706_v13  ;;  %v598_v39 = vshrl.u32 %v2095_v11, 16 }
  0x46   : > { %622 = vrot.lane.b32.xlu0 %v582_v34, %s2488_s14  ;;  %v771_v28 = vrot.slane %v769_v14, 1  ;;  %v778_v34 = vrot.slane %v776_v18, 1  ;;  %v602_v40 = vrot.slane %v600_v25, 1  ;;  %v2032_v18 = vld [vmem:[%s2587_s15 + $0xc4] sm:$0x1] }
  0x48   : > { %624 = vrot.lane.b32.xlu1 %v589_v37, %s2488_s14  ;;  %v595_v37 = vrot.slane %v593_v23, 1  ;;  %v2827_v33 = vor.u32 %v771_v28, %v767_v27  ;;  %v2829_v41 = vor.u32 %v778_v34, %v774_v31  ;;  %v2016_v23 = vld [vmem:[%s2587_s15 + $0xc0] sm:$0xf]  ;;  %v2017_v27 = vld [vmem:[%s2587_s15 + $0xc8] sm:$0xf]  ;;  %v783_v34 = vshll.u32 %v2771_v16, 16 }
  0x49   : > { %v2096_v25 = vcombine.low %v2016_v23, %v2032_v18 }
  0x4a   : > { %662 = vrot.lane.b32.xlu0 %v2100_v42, %s2489_s26  ;;  %v596_v45 = vor.u32 %v595_v37, %v591_v62  ;;  %v2128_v49 = vcombine.low %v2827_v33, %v2829_v41  ;;  %v603_v42 = vor.u32 %v602_v40, %v598_v39  ;;  %v2080_v62 = vcombine.low %v2016_v23, %v2016_v23 }
  0x4b   : > { %v607_v37 = vshll.u32 %v2096_v25, 16  ;;  %v781_v40 = vshrl.u32 %v2771_v16, 16 }
  0x4c   : > { %664 = vrot.lane.b32.xlu1 %v2101_v54, %s2489_s26  ;;  %v252_v54 = vld [vmem:[%s2587_s15 + $0x34] sm:$0x1] }
  0x4e   : > { %702 = vrot.lane.b32.xlu0 %v2355_v55, %s2490_s30  ;;  %v2840_v55 = vld [vmem:[%s2587_s15 + $0x38] sm:$0xf] }
  0x4f   : > { %v2073_v56 = vcombine.low %v2840_v55, %v253_v61  ;;  %v2088_v61 = vcombine.low %v2749_v59, %v2749_v59 }
  0x50   : > { %704 = vrot.lane.b32.xlu1 %v2356_v63, %s2490_s30  ;;  %v2102_v63 = vcombine.low %v2716_v26, %v2716_v26  ;;  %v2373_v26 = vld [vmem:[%s2587_s15 + $0x78] ss:$0 sps:$4 sm:$0xff]  }
  0x51   : > { %v436_v11 = vshrl.u32 %v2073_v56, 16 }
  0x52   : > { %338 = vrot.lane.b32.xlu0 %v2357_v2, %s2485_s25  ;;  %v2072_v2 = vcombine.low %v2836_v53, %v252_v54 }
  0x54   : > { %340 = vrot.lane.b32.xlu1 %v2358_v3, %s2485_s25  ;;  %v2103_v3 = vcombine.low %v2723_v30, %v2723_v30  ;;  %v431_v5 = vshll.u32 %v2072_v2, 16  ;;  %v429_v7 = vshrl.u32 %v2072_v2, 16  ;;  %v2375_v30 = vld [vmem:[%s2587_s15 + $0x80] ss:$0 sps:$4 sm:$0xff]   ;;  %v609_v2 = vrot.slane %v607_v37, 1 }
  0x56   : > { %450 = vrot.lane.b32.xlu0 %v420_v58, %s2487_s9  ;;  %v438_v58 = vshll.u32 %v2073_v56, 16 }
  0x58   : > { %452 = vrot.lane.b32.xlu1 %v427_v10, %s2487_s9  ;;  %v433_v10 = vrot.slane %v431_v5, 1  ;;  %v440_v14 = vrot.slane %v438_v58, 1 }
  0x5a   : > { %490 = vrot.lane.b32.xlu0 %v2078_v57, %s2484_s23  ;;  %v2033_v57 = vld [vmem:[%s2587_s15 + $0xcc] sm:$0x1]  ;;  %v441_v28 = vor.u32 %v440_v14, %v436_v11 }
  0x5b   : > { %v2097_v31 = vcombine.low %v2017_v27, %v2033_v57 }
  0x5c   : > { %492 = vrot.lane.b32.xlu1 %v2079_v46, %s2484_s23  ;;  %v434_v46 = vor.u32 %v433_v10, %v429_v7  ;;  %v2105_v7 = vcombine.low %v2774_v17, %v2774_v17  ;;  %v2390_v10 = vld [vmem:[%s2587_s15 + $0x80] ss:$0 sps:$4 sm:$0xff]  }
  0x5d   : > { %v614_v39 = vshll.u32 %v2097_v31, 16  ;;  %v612_v56 = vshrl.u32 %v2097_v31, 16 }
  0x5e   : > { %530 = vrot.lane.b32.xlu0 %v2086_v35, %s2486_s6  ;;  %v790_v35 = vshll.u32 %v2781_v24, 16 }
  0x5f   : > { %v616_v16 = vrot.slane %v614_v39, 1 }
  0x60   : > { %532 = vrot.lane.b32.xlu1 %v2087_v29, %s2486_s6  ;;  %v2081_v29 = vcombine.low %v2017_v27, %v2017_v27  ;;  %v792_v54 = vrot.slane %v790_v35, 1 }
  0x61   : > { %v617_v58 = vor.u32 %v616_v16, %v612_v56 }
  0x62   : > { %626 = vrot.lane.b32.xlu0 %v596_v45, %s2488_s14  ;;  %v785_v45 = vrot.slane %v783_v34, 1 }
  0x64   : > { %628 = vrot.lane.b32.xlu1 %v603_v42, %s2488_s14  ;;  %v788_v42 = vshrl.u32 %v2781_v24, 16 }
  0x66   : > { %666 = vrot.lane.b32.xlu0 %v2102_v63, %s2489_s26  ;;  %v605_v63 = vshrl.u32 %v2096_v25, 16  ;;  %v2879_v24 = vor.u32 %v792_v54, %v788_v42 }
  0x68   : > { %668 = vrot.lane.b32.xlu1 %v2103_v3, %s2489_s26  ;;  %v2089_v3 = vcombine.low %v2752_v60, %v2752_v60  ;;  %v610_v5 = vor.u32 %v609_v2, %v605_v63 }
  0x6a   : > { %706 = vrot.lane.b32.xlu0 %v2372_v4, %s2490_s30  ;;  %v2877_v4 = vor.u32 %v785_v45, %v781_v40 }
  0x6c   : > { %708 = vrot.lane.b32.xlu1 %v2373_v26, %s2490_s30  ;;  %v2130_v26 = vcombine.low %v2877_v4, %v2879_v24 }
  0x6e   : > { %342 = vrot.lane.b32.xlu0 %v2374_v6, %s2485_s25  ;;  %v2104_v6 = vcombine.low %v2762_v8, %v2762_v8 }
  0x70   : > { %344 = vrot.lane.b32.xlu1 %v2375_v30, %s2485_s25  ;;  %v2391_v30 = vld [vmem:[%s2587_s15 + $0x88] ss:$0 sps:$4 sm:$0xff]  }
  0x72   : > { %454 = vrot.lane.b32.xlu0 %v434_v46, %s2487_s9 }
  0x74   : > { %456 = vrot.lane.b32.xlu1 %v441_v28, %s2487_s9 }
  0x76   : > { %494 = vrot.lane.b32.xlu0 %v2080_v62, %s2484_s23 }
  0x78   : > { %496 = vrot.lane.b32.xlu1 %v2081_v29, %s2484_s23 }
  0x7a   : > { %534 = vrot.lane.b32.xlu0 %v2088_v61, %s2486_s6 }
  0x7c   : > { %536 = vrot.lane.b32.xlu1 %v2089_v3, %s2486_s6 }
  0x7e   : > { %630 = vrot.lane.b32.xlu0 %v610_v5, %s2488_s14 }
  0x80   : > { %632 = vrot.lane.b32.xlu1 %v617_v58, %s2488_s14  ;;  %s2491_s14 = smov [#allocation2]  }
  0x81   : > { %s2423_s16 = sshll.u32 %s2491_s14, 4  ;;  %s2424_s16 = int_to_ptr.vmem [resolvable:$false] %s2423_s16 }
  0x82   : > { %670 = vrot.lane.b32.xlu0 %v2104_v6, %s2489_s26  ;;  %s2425_s17 = scalar_lea.vmem %s2424_s16, 2048 }
  0x84   : > { %672 = vrot.lane.b32.xlu1 %v2105_v7, %s2489_s26 }
  0x86   : > { %710 = vrot.lane.b32.xlu0 %v2390_v10, %s2490_s30 }
  0x88   : > { %712 = vrot.lane.b32.xlu1 %v2391_v30, %s2490_s30 }
  0x8c   : > { %v331_v14 = vpop.permute.xlu0 %330 }
  0x8d   : > { %v797_v27 = vsel %vm794_vm0, %v2607_v15, %v331_v14 }
  0x8e   : > { %v485_v11 = vpop.permute.xlu1 %484 }
  0x90   : > { %v333_v57 = vpop.permute.xlu0 %332 }
  0x91   : > { %v800_v17 = vsel %vm794_vm0, %v2615_v20, %v333_v57 }
  0x92   : > { %v525_v18 = vpop.permute.xlu1 %524 }
  0x94   : > { %v483_v8 = vpop.permute.xlu0 %482 }
  0x96   : > { %v443_v23 = vpop.permute.xlu1 %442 }
  0x97   : > { %v821_v31 = vsel %vm819_vm1, %v797_v27, %v443_v23 }
  0x98   : > { %v523_v46 = vpop.permute.xlu0 %522  ;;  %v838_v37 = vsel %vm836_vm2, %v821_v31, %v483_v8 }
  0x99   : > { %v855_v15 = vsel %vm853_vm3, %v838_v37, %v523_v46 }
  0x9a   : > { %v445_v25 = vpop.permute.xlu1 %444 }
  0x9b   : > { %v823_v28 = vsel %vm819_vm1, %v800_v17, %v445_v25 }
  0x9c   : > { %v619_v34 = vpop.permute.xlu0 %618  ;;  %v840_v62 = vsel %vm836_vm2, %v823_v28, %v485_v11 }
  0x9d   : > { %v857_v39 = vsel %vm853_vm3, %v840_v62, %v525_v18  ;;  %v872_v40 = vsel %vm870_vm4, %v855_v15, %v619_v34 }
  0x9e   : > { %v621_v35 = vpop.permute.xlu1 %620 }
  0x9f   : > { %v874_v45 = vsel %vm870_vm4, %v857_v39, %v621_v35 }
  0xa0   : > { %v659_v29 = vpop.permute.xlu0 %658 }
  0xa1   : > { %v889_v42 = vsel %vm887_vm5, %v872_v40, %v659_v29 }
  0xa2   : > { %v661_v20 = vpop.permute.xlu1 %660 }
  0xa3   : > { %v891_v61 = vsel %vm887_vm5, %v874_v45, %v661_v20 }
  0xa4   : > { %v699_v54 = vpop.permute.xlu0 %698 }
  0xa5   : > { %v906_v63 = vsel %vm904_vm6, %v889_v42, %v699_v54 }
  0xa6   : > { %v701_v2 = vpop.permute.xlu1 %700 }
  0xa7   : > { %v908_v3 = vsel %vm904_vm6, %v891_v61, %v701_v2 }
  0xa8   : > { %v2123_v56 = vcombine.low %v906_v63, %v908_v3  ;;  %v335_v16 = vpop.permute.xlu0 %334 }
  0xa9   : > { %v803_v57 = vsel %vm794_vm0, %v2640_v43, %v335_v16 }
  0xaa   : > { %1081 = vmatmul.mubr.bf16.vlgmr.msra.gmra.mrb[0].mxu0 %v2123_v56  ;;  %v337_v5 = vpop.permute.xlu1 %336 }
  0xab   : > { %2141 = vmatprep.mubr.msk.bf16.mxu0 %vm794_vm0, %v2126_v50  ;;  %v806_v8 = vsel %vm794_vm0, %v2657_v51, %v337_v5 }
  0xac   : > { %v447_v58 = vpop.permute.xlu0 %446 }
  0xad   : > { %v825_v23 = vsel %vm819_vm1, %v803_v57, %v447_v58 }
  0xae   : > { %v449_v6 = vpop.permute.xlu1 %448 }
  0xaf   : > { %v827_v32 = vsel %vm819_vm1, %v806_v8, %v449_v6 }
  0xb0   : > { %v487_v7 = vpop.permute.xlu0 %486 }
  0xb1   : > { %v842_v36 = vsel %vm836_vm2, %v825_v23, %v487_v7 }
  0xb2   : > { %v489_v10 = vpop.permute.xlu1 %488 }
  0xb3   : > { %v844_v25 = vsel %vm836_vm2, %v827_v32, %v489_v10 }
  0xb4   : > { %v527_v30 = vpop.permute.xlu0 %526 }
  0xb5   : > { %v859_v17 = vsel %vm853_vm3, %v842_v36, %v527_v30 }
  0xb6   : > { %v529_v11 = vpop.permute.xlu1 %528 }
  0xb7   : > { %v861_v27 = vsel %vm853_vm3, %v844_v25, %v529_v11 }
  0xb8   : > { %v623_v14 = vpop.permute.xlu0 %622 }
  0xb9   : > { %v876_v28 = vsel %vm870_vm4, %v859_v17, %v623_v14 }
  0xba   : > { %v625_v18 = vpop.permute.xlu1 %624 }
  0xbb   : > { %v878_v43 = vsel %vm870_vm4, %v861_v27, %v625_v18 }
  0xbc   : > { %v663_v46 = vpop.permute.xlu0 %662 }
  0xbd   : > { %v893_v51 = vsel %vm887_vm5, %v876_v28, %v663_v46 }
  0xbe   : > { %v665_v50 = vpop.permute.xlu1 %664 }
  0xbf   : > { %v895_v34 = vsel %vm887_vm5, %v878_v43, %v665_v50 }
  0xc0   : > { %v703_v31 = vpop.permute.xlu0 %702 }
  0xc1   : > { %v910_v35 = vsel %vm904_vm6, %v893_v51, %v703_v31 }
  0xc2   : > { %v705_v62 = vpop.permute.xlu1 %704 }
  0xc3   : > { %v912_v37 = vsel %vm904_vm6, %v895_v34, %v705_v62 }
  0xc4   : > { %v2125_v29 = vcombine.low %v910_v35, %v912_v37  ;;  %v339_v39 = vpop.permute.xlu0 %338 }
  0xc5   : > { %v809_v3 = vsel %vm794_vm0, %v2733_v38, %v339_v39 }
  0xc6   : > { %1089 = vmatmul.mubr.bf16.gmra.mrb[4].mxu0 %v2125_v29  ;;  %v341_v20 = vpop.permute.xlu1 %340 }
  0xc7   : > { %2142 = vmatprep.mubr.msk.bf16.mxu0 %vm794_vm0, %v2128_v49  ;;  %v812_v56 = vsel %vm794_vm0, %v2738_v44, %v341_v20 }
  0xc8   : > { %v451_v15 = vpop.permute.xlu0 %450 }
  0xc9   : > { %v829_v16 = vsel %vm819_vm1, %v809_v3, %v451_v15 }
  0xca   : > { %v453_v40 = vpop.permute.xlu1 %452 }
  0xcb   : > { %v831_v33 = vsel %vm819_vm1, %v812_v56, %v453_v40 }
  0xcc   : > { %v491_v45 = vpop.permute.xlu0 %490 }
  0xcd   : > { %v846_v41 = vsel %vm836_vm2, %v829_v16, %v491_v45 }
  0xce   : > { %v493_v42 = vpop.permute.xlu1 %492 }
  0xcf   : > { %v848_v58 = vsel %vm836_vm2, %v831_v33, %v493_v42  ;;  %v1148_v42 = vrot.slane %v2483_v1, 7 }
  0xd0   : > { %v531_v54 = vpop.permute.xlu0 %530 }
  0xd1   : > { %v863_v6 = vsel %vm853_vm3, %v846_v41, %v531_v54 }
  0xd2   : > { %v533_v61 = vpop.permute.xlu1 %532 }
  0xd3   : > { %v865_v7 = vsel %vm853_vm3, %v848_v58, %v533_v61 }
  0xd4   : > { %v627_v63 = vpop.permute.xlu0 %626 }
  0xd5   : > { %v880_v10 = vsel %vm870_vm4, %v863_v6, %v627_v63 }
  0xd6   : > { %v629_v2 = vpop.permute.xlu1 %628 }
  0xd7   : > { %v882_v38 = vsel %vm870_vm4, %v865_v7, %v629_v2  ;;  %v1220_v2 = vsel %vm2974_vm9, 0, %v1148_v42 }
  0xd8   : > { %v667_v5 = vpop.permute.xlu0 %666  ;;  %v2986_v56 = vsel %vm2980_vm12, %v1220_v2, 0  ;;  %v2407_v2 = vld [vmem:[%s3469_s3 + $0x18] sm:$0xff]  }
  0xd9   : > { %v897_v44 = vsel %vm887_vm5, %v880_v10, %v667_v5  ;;  %v1244_v1 = vshll.u32 %v2986_v56, 16  ;;  %1400 = vrot.lane.b32.xlu1 %v2986_v56, %s2486_s6  ;;  %v1242_v16 = vshrl.u32 %v2986_v56, 16  ;;  %v1321_v41 = vrot.slane %v2986_v56, 1 }
  0xda   : > { %v669_v49 = vpop.permute.xlu1 %668 }
  0xdb   : > { %v899_v11 = vsel %vm887_vm5, %v882_v38, %v669_v49  ;;  %v1246_v5 = vrot.slane %v1244_v1, 1  ;;  %v3003_v49 = vld [vmem:[%s3468_s2] ss:$0 sm:$0xff] }
  0xdc   : > { %v707_v30 = vpop.permute.xlu0 %706 }
  0xdd   : > { %v914_v14 = vsel %vm904_vm6, %v897_v44, %v707_v30  ;;  %v2992_v33 = vor.u32 %v1246_v5, %v1242_v16 }
  0xde   : > { %v709_v18 = vpop.permute.xlu1 %708 }
  0xdf   : > { %v916_v57 = vsel %vm904_vm6, %v899_v11, %v709_v18  ;;  %1297 = vrot.lane.b32.xlu0 %v2992_v33, %s2487_s9 }
  0xe0   : > { %v2127_v8 = vcombine.low %v914_v14, %v916_v57  ;;  %v343_v23 = vpop.permute.xlu0 %342 }
  0xe1   : > { %v815_v51 = vsel %vm794_vm0, %v2836_v53, %v343_v23 }
  0xe2   : > { %1097 = vmatmul.mubr.bf16.gmra.mrb[8].mxu0 %v2127_v8  ;;  %v345_v46 = vpop.permute.xlu1 %344 }
  0xe3   : > { %2143 = vmatprep.mubr.msk.bf16.mxu0 %vm794_vm0, %v2130_v26  ;;  %v818_v31 = vsel %vm794_vm0, %v2840_v55, %v345_v46  ;;  %1329 = vrot.lane.b32.xlu0 %v1321_v41, %s2486_s6 }
  0xe4   : > { %v455_v32 = vpop.permute.xlu0 %454 }
  0xe5   : > { %v833_v34 = vsel %vm819_vm1, %v815_v51, %v455_v32  ;;  %v2400_v51 = vld [vmem:[%s3469_s3 + $0x40] sm:$0xff]  }
  0xe6   : > { %v457_v36 = vpop.permute.xlu1 %456  ;;  %2206 = vmatprep.subr.bf16.mxu1 %v2400_v51 }
  0xe7   : > { %v835_v4 = vsel %vm819_vm1, %v818_v31, %v457_v36  ;;  %v2401_v31 = vld [vmem:[%s3469_s3] sm:$0xff]  }
  0xe8   : > { %v495_v50 = vpop.permute.xlu0 %494  ;;  %2207 = vmatpush3.bf16.msra.mxu1 %v2401_v31  ;;  %v2414_v31 = vld [vmem:[%s3469_s3 + $0x78] sm:$0xff]  }
  0xe9   : > { %v850_v26 = vsel %vm836_vm2, %v833_v34, %v495_v50 }
  0xea   : > { %v497_v25 = vpop.permute.xlu1 %496 }
  0xeb   : > { %v852_v35 = vsel %vm836_vm2, %v835_v4, %v497_v25 }
  0xec   : > { %v535_v17 = vpop.permute.xlu0 %534 }
  0xed   : > { %v867_v37 = vsel %vm853_vm3, %v850_v26, %v535_v17 }
  0xee   : > { %v537_v27 = vpop.permute.xlu1 %536 }
  0xef   : > { %v869_v29 = vsel %vm853_vm3, %v852_v35, %v537_v27  ;;  %v2403_v35 = vld [vmem:[%s3469_s3 + $0x8] sm:$0xff]  }
  0xf0   : > { %v631_v28 = vpop.permute.xlu0 %630 }
  0xf1   : > { %v884_v39 = vsel %vm870_vm4, %v867_v37, %v631_v28 }
  0xf2   : > { %v633_v43 = vpop.permute.xlu1 %632 }
  0xf3   : > { %v886_v53 = vsel %vm870_vm4, %v869_v29, %v633_v43 }
  0xf4   : > { %v671_v24 = vpop.permute.xlu0 %670 }
  0xf5   : > { %v901_v55 = vsel %vm887_vm5, %v884_v39, %v671_v24  ;;  %v2402_v24 = vld [vmem:[%s3469_s3 + $0x48] sm:$0xff]   ;;  %v2405_v39 = vld [vmem:[%s3469_s3 + $0x10] sm:$0xff]  }
  0xf6   : > { %v673_v62 = vpop.permute.xlu1 %672  ;;  %2208 = vmatprep.subr.bf16.mxu1 %v2402_v24 }
  0xf7   : > { %v903_v20 = vsel %vm887_vm5, %v886_v53, %v673_v62  ;;  %v2404_v62 = vld [vmem:[%s3469_s3 + $0x50] sm:$0xff]   ;;  %2209 = vmatpush3.bf16.msra.mxu1 %v2403_v35 }
  0xf8   : > { %v711_v15 = vpop.permute.xlu0 %710  ;;  %2210 = vmatprep.subr.bf16.mxu1 %v2404_v62 }
  0xf9   : > { %v918_v40 = vsel %vm904_vm6, %v901_v55, %v711_v15 }
  0xfa   : > { %v713_v45 = vpop.permute.xlu1 %712 }
  0xfb   : > { %v920_v54 = vsel %vm904_vm6, %v903_v20, %v713_v45  ;;  %2211 = vmatpush3.bf16.msra.mxu1 %v2405_v39  ;;  %v2406_v45 = vld [vmem:[%s3469_s3 + $0x58] sm:$0xff]  }
  0xfc   : > { %v2129_v63 = vcombine.low %v918_v40, %v920_v54  ;;  %2212 = vmatprep.subr.bf16.mxu1 %v2406_v45 }
  0xfe   : > { %1105 = vmatmul.mubr.bf16.gmra.mrb[12].mxu0 %v2129_v63 }
  0xff   : > { %2213 = vmatpush3.bf16.msra.mxu1 %v2407_v2 }
 0x14b   : > { %v3290_v9 = vpop.permute.xlu1 %1400 }
 0x17d   : > { %v1082_v58 = vpop.f32.mrb[0].mxu0 }
 0x17e   : > { %v1083_v6 = vadd.f32 %v3003_v49, %v1082_v58  ;;  %v1084_v7 = vpop.f32.mrb[1].mxu0 }
 0x17f   : > { %v1085_v10 = vpop.f32.mrb[2].mxu0 }
 0x180   : > { %v1113_v38 = vmax.f32 %v1083_v6, 0.0  ;;  %v1086_v44 = vadd.f32 %v3003_v49, %v1085_v10  ;;  %v1087_v30 = vpop.f32.mrb[3].mxu0  ;;  %v2408_v6 = vld [vmem:[%s3469_s3 + $0x60] sm:$0xff]  }
 0x181   : > { %2214 = vmatprep.subr.bf16.mxu1 %v2408_v6 }
 0x182   : > { %v2197_v11 = vpack.c.bf16 %v1113_v38, %v1113_v38  ;;  %v1114_v14 = vmax.f32 %v1086_v44, 0.0  ;;  %v2409_v38 = vld [vmem:[%s3469_s3 + $0x20] sm:$0xff]  }
 0x183   : > { %2215 = vmatpush3.bf16.msra.mxu1 %v2409_v38 }
 0x184   : > { %v1153_v18 = vshrl.u32 %v2197_v11, 16  ;;  %v2198_v57 = vpack.c.bf16 %v1114_v14, %v1114_v14  ;;  %v1156_v23 = vshll.u32 %v2197_v11, 16  ;;  %v2410_v11 = vld [vmem:[%s3469_s3 + $0x68] sm:$0xff]  }
 0x185   : > { %2216 = vmatprep.subr.bf16.mxu1 %v2410_v11 }
 0x186   : > { %v1155_v8 = vrot.slane %v1153_v18, 7  ;;  %v1160_v46 = vshrl.u32 %v2198_v57, 16  ;;  %v1163_v50 = vshll.u32 %v2198_v57, 16 }
 0x188   : > { %v1158_v32 = vor.u32 %v1156_v23, %v1155_v8  ;;  %v1162_v36 = vrot.slane %v1160_v46, 7  ;;  %v2411_v8 = vld [vmem:[%s3469_s3 + $0x28] sm:$0xff]  }
 0x189   : > { %2217 = vmatpush3.bf16.msra.mxu1 %v2411_v8 }
 0x18a   : > { %v1165_v25 = vor.u32 %v1163_v50, %v1162_v36  ;;  %v1221_v17 = vsel %vm2974_vm9, 0, %v1158_v32  ;;  %v2412_v36 = vld [vmem:[%s3469_s3 + $0x70] sm:$0xff]  }
 0x18b   : > { %v3011_v27 = vsel %vm2980_vm12, %v1221_v17, 0  ;;  %v2413_v17 = vld [vmem:[%s3469_s3 + $0x30] sm:$0xff]   ;;  %2218 = vmatprep.subr.bf16.mxu1 %v2412_v36 }
 0x18c   : > { %v1222_v28 = vsel %vm2974_vm9, 0, %v1165_v25  ;;  %1346 = vrot.lane.b32.xlu0 %v3011_v27, %s2489_s26  ;;  %v1322_v43 = vrot.slane %v3011_v27, 1  ;;  %v1251_v4 = vshll.u32 %v3011_v27, 16  ;;  %v1249_v53 = vshrl.u32 %v3011_v27, 16 }
 0x18d   : > { %v3027_v34 = vsel %vm2980_vm12, %v1222_v28, 0  ;;  %2219 = vmatpush3.bf16.msra.mxu1 %v2413_v17 }
 0x18e   : > { %1331 = vrot.lane.b32.xlu1 %v1322_v43, %s2486_s6  ;;  %v1258_v26 = vshll.u32 %v3027_v34, 16  ;;  %v3046_v37 = vrot.slane %v3027_v34, 1  ;;  %v1253_v29 = vrot.slane %v1251_v4, 1  ;;  %v1256_v15 = vshrl.u32 %v3027_v34, 16  ;;  %v2415_v4 = vld [vmem:[%s3469_s3 + $0x38] sm:$0xff]   ;;  %2220 = vmatprep.subr.bf16.mxu1 %v2414_v31 }
 0x190   : > { %1370 = vrot.lane.b32.xlu0 %v1322_v43, %s2487_s9  ;;  %v1260_v55 = vrot.slane %v1258_v26, 1  ;;  %v3056_v20 = vor.u32 %v1253_v29, %v1249_v53 }
 0x191   : > { %2221 = vmatpush3.bf16.msra.mxu1 %v2415_v4 }
 0x192   : > { %1348 = vrot.lane.b32.xlu1 %v3027_v34, %s2489_s26  ;;  %v3065_v63 = vor.u32 %v1260_v55, %v1256_v15 }
 0x194   : > { %1386 = vrot.lane.b32.xlu0 %v3027_v34, %s2486_s6 }
 0x196   : > { %1372 = vrot.lane.b32.xlu1 %v3046_v37, %s2487_s9 }
 0x198   : > { %1333 = vrot.lane.b32.xlu0 %v3046_v37, %s2486_s6 }
 0x199   : > { %v1090_v40 = vpop.f32.mrb[4].mxu0 }
 0x19a   : > { %v1091_v42 = vadd.f32 %v3003_v49, %v1090_v40  ;;  %1299 = vrot.lane.b32.xlu1 %v3056_v20, %s2487_s9  ;;  %v1092_v54 = vpop.f32.mrb[5].mxu0 }
 0x19b   : > { %v1093_v1 = vpop.f32.mrb[6].mxu0 }
 0x19c   : > { %v1115_v16 = vmax.f32 %v1091_v42, 0.0  ;;  %v1094_v5 = vadd.f32 %v3003_v49, %v1093_v1  ;;  %1402 = vrot.lane.b32.xlu0 %v3065_v63, %s2489_s26  ;;  %v1095_v58 = vpop.f32.mrb[7].mxu0 }
 0x19e   : > { %v2199_v7 = vpack.c.bf16 %v1115_v16, %v1115_v16  ;;  %v1116_v10 = vmax.f32 %v1094_v5, 0.0 }
 0x1a0   : > { %v1167_v44 = vshrl.u32 %v2199_v7, 16  ;;  %v2200_v30 = vpack.c.bf16 %v1116_v10, %v1116_v10  ;;  %1301 = vrot.lane.b32.xlu0 %v3065_v63, %s2487_s9  ;;  %v1170_v18 = vshll.u32 %v2199_v7, 16 }
 0x1a2   : > { %v1169_v14 = vrot.slane %v1167_v44, 7  ;;  %v1174_v57 = vshrl.u32 %v2200_v30, 16  ;;  %v1177_v32 = vshll.u32 %v2200_v30, 16 }
 0x1a4   : > { %v1172_v23 = vor.u32 %v1170_v18, %v1169_v14  ;;  %v1176_v46 = vrot.slane %v1174_v57, 7 }
 0x1a6   : > { %v1223_v50 = vsel %vm2974_vm9, 0, %v1172_v23  ;;  %v1179_v25 = vor.u32 %v1177_v32, %v1176_v46 }
 0x1a7   : > { %v3097_v28 = vsel %vm2980_vm12, %v1223_v50, 0 }
 0x1a8   : > { %v1224_v43 = vsel %vm2974_vm9, 0, %v1179_v25  ;;  %1350 = vrot.lane.b32.xlu0 %v3097_v28, %s2489_s26  ;;  %1388 = vrot.lane.b32.xlu1 %v3097_v28, %s2486_s6  ;;  %v3106_v51 = vrot.slane %v3097_v28, 1  ;;  %v1265_v62 = vshll.u32 %v3097_v28, 16  ;;  %v1263_v15 = vshrl.u32 %v3097_v28, 16 }
 0x1a9   : > { %v3116_v24 = vsel %vm2980_vm12, %v1224_v43, 0 }
 0x1aa   : > { %v2154_v26 = vcombine.low %v3046_v37, %v3106_v51  ;;  %v1272_v35 = vshll.u32 %v3116_v24, 16  ;;  %v3131_v29 = vrot.slane %v3116_v24, 1  ;;  %v1267_v53 = vrot.slane %v1265_v62, 1 }
 0x1ab   : > { %v1270_v55 = vshrl.u32 %v3116_v24, 16 }
 0x1ac   : > { %1335 = vrot.lane.b32.xlu1 %v3106_v51, %s2486_s6  ;;  %1374 = vrot.lane.b32.xlu0 %v3106_v51, %s2487_s9  ;;  %v1274_v39 = vrot.slane %v1272_v35, 1  ;;  %v3142_v2 = vor.u32 %v1267_v53, %v1263_v15 }
 0x1ae   : > { %v3140_v54 = vor.u32 %v1274_v39, %v1270_v55 }
 0x1b0   : > { %1352 = vrot.lane.b32.xlu1 %v3116_v24, %s2489_s26  ;;  %1390 = vrot.lane.b32.xlu0 %v3116_v24, %s2486_s6 }
 0x1b4   : > { %1376 = vrot.lane.b32.xlu1 %v3131_v29, %s2487_s9  ;;  %1337 = vrot.lane.b32.xlu0 %v3131_v29, %s2486_s6 }
 0x1b5   : > { %v1098_v40 = vpop.f32.mrb[8].mxu0 }
 0x1b6   : > { %v1099_v45 = vadd.f32 %v3003_v49, %v1098_v40  ;;  %v1100_v42 = vpop.f32.mrb[9].mxu0 }
 0x1b7   : > { %v1101_v1 = vpop.f32.mrb[10].mxu0 }
 0x1b8   : > { %v1117_v16 = vmax.f32 %v1099_v45, 0.0  ;;  %v1102_v5 = vadd.f32 %v3003_v49, %v1101_v1  ;;  %1406 = vrot.lane.b32.xlu0 %v3140_v54, %s2489_s26  ;;  %1404 = vrot.lane.b32.xlu1 %v3142_v2, %s2489_s26  ;;  %v1103_v58 = vpop.f32.mrb[11].mxu0 }
 0x1b9   : > { %v3206_v58 = vld [vmem:[%s3469_s3 + $0x80] sm:$0xff]  }
 0x1ba   : > { %v2201_v6 = vpack.c.bf16 %v1117_v16, %v1117_v16  ;;  %v1118_v7 = vmax.f32 %v1102_v5, 0.0  ;;  %2253 = vmatprep.subr.bf16.mxu0 %v3206_v58  ;;  %2267 = vmatprep.subr.bf16.mxu1 %v3206_v58 }
 0x1bb   : > { %2254 = vmatpush3.bf16.msra.mxu0 %v3206_v58 }
 0x1bc   : > { %v1181_v10 = vshrl.u32 %v2201_v6, 16  ;;  %v2202_v38 = vpack.c.bf16 %v1118_v7, %v1118_v7  ;;  %1305 = vrot.lane.b32.xlu0 %v3140_v54, %s2487_s9  ;;  %1303 = vrot.lane.b32.xlu1 %v3142_v2, %s2487_s9  ;;  %v1184_v30 = vshll.u32 %v2201_v6, 16 }
 0x1be   : > { %v1183_v44 = vrot.slane %v1181_v10, 7  ;;  %v1188_v11 = vshrl.u32 %v2202_v38, 16  ;;  %v1191_v57 = vshll.u32 %v2202_v38, 16 }
 0x1c0   : > { %v1186_v14 = vor.u32 %v1184_v30, %v1183_v44  ;;  %v1190_v18 = vrot.slane %v1188_v11, 7 }
 0x1c2   : > { %v1225_v8 = vsel %vm2974_vm9, 0, %v1186_v14  ;;  %v1193_v23 = vor.u32 %v1191_v57, %v1190_v18 }
 0x1c3   : > { %v3157_v46 = vsel %vm2980_vm12, %v1225_v8, 0 }
 0x1c4   : > { %v1226_v32 = vsel %vm2974_vm9, 0, %v1193_v23  ;;  %1354 = vrot.lane.b32.xlu0 %v3157_v46, %s2489_s26  ;;  %1392 = vrot.lane.b32.xlu1 %v3157_v46, %s2486_s6  ;;  %v3166_v36 = vrot.slane %v3157_v46, 1  ;;  %v1279_v43 = vshll.u32 %v3157_v46, 16  ;;  %v1277_v39 = vshrl.u32 %v3157_v46, 16 }
 0x1c5   : > { %v3170_v50 = vsel %vm2980_vm12, %v1226_v32, 0 }
 0x1c6   : > { %v2157_v25 = vcombine.low %v3131_v29, %v3166_v36  ;;  %v1286_v17 = vshll.u32 %v3170_v50, 16  ;;  %v3185_v31 = vrot.slane %v3170_v50, 1  ;;  %v1281_v35 = vrot.slane %v1279_v43, 1  ;;  %v3231_v43 = vld [vmem:[%s3469_s3 + $0x88] sm:$0xff]  }
 0x1c7   : > { %v1284_v62 = vshrl.u32 %v3170_v50, 16  ;;  %2255 = vmatprep.subr.bf16.mxu0 %v3231_v43 }
 0x1c8   : > { %1339 = vrot.lane.b32.xlu1 %v3166_v36, %s2486_s6  ;;  %1378 = vrot.lane.b32.xlu0 %v3166_v36, %s2487_s9  ;;  %v1288_v4 = vrot.slane %v1286_v17, 1  ;;  %v3196_v45 = vor.u32 %v1281_v35, %v1277_v39  ;;  %v3250_v39 = vld [vmem:[%s3469_s3 + $0x90] sm:$0xff]  }
 0x1c9   : > { %2256 = vmatpush3.bf16.msra.mxu0 %v3231_v43 }
 0x1ca   : > { %v3194_v40 = vor.u32 %v1288_v4, %v1284_v62  ;;  %2257 = vmatprep.subr.bf16.mxu0 %v3250_v39 }
 0x1cc   : > { %1356 = vrot.lane.b32.xlu1 %v3170_v50, %s2489_s26  ;;  %1394 = vrot.lane.b32.xlu0 %v3170_v50, %s2486_s6 }
 0x1cd   : > { %2258 = vmatpush3.bf16.msra.mxu0 %v3250_v39 }
 0x1d0   : > { %1380 = vrot.lane.b32.xlu1 %v3185_v31, %s2487_s9  ;;  %1341 = vrot.lane.b32.xlu0 %v3185_v31, %s2486_s6 }
 0x1d1   : > { %v1106_v53 = vpop.f32.mrb[12].mxu0 }
 0x1d2   : > { %v1107_v55 = vadd.f32 %v3003_v49, %v1106_v53  ;;  %v1108_v15 = vpop.f32.mrb[13].mxu0 }
 0x1d3   : > { %v1109_v42 = vpop.f32.mrb[14].mxu0 }
 0x1d4   : > { %v1119_v1 = vmax.f32 %v1107_v55, 0.0  ;;  %v1110_v16 = vadd.f32 %v3003_v49, %v1109_v42  ;;  %1410 = vrot.lane.b32.xlu0 %v3194_v40, %s2489_s26  ;;  %1408 = vrot.lane.b32.xlu1 %v3196_v45, %s2489_s26  ;;  %v1111_v5 = vpop.f32.mrb[15].mxu0 }
 0x1d5   : > { %v1298_v5 = vpop.permute.xlu0 %1297 }
 0x1d6   : > { %v2203_v6 = vpack.c.bf16 %v1119_v1, %v1119_v1  ;;  %v1120_v7 = vmax.f32 %v1110_v16, 0.0  ;;  %v1419_v59 = vsel %vm819_vm1, %v2986_v56, %v1298_v5 }
 0x1d8   : > { %v1195_v10 = vshrl.u32 %v2203_v6, 16  ;;  %v2204_v49 = vpack.c.bf16 %v1120_v7, %v1120_v7  ;;  %1309 = vrot.lane.b32.xlu0 %v3194_v40, %s2487_s9  ;;  %1307 = vrot.lane.b32.xlu1 %v3196_v45, %s2487_s9  ;;  %v1198_v44 = vshll.u32 %v2203_v6, 16 }
 0x1d9   : > { %v1330_v6 = vpop.permute.xlu0 %1329 }
 0x1da   : > { %v1197_v38 = vrot.slane %v1195_v10, 7  ;;  %v1202_v30 = vshrl.u32 %v2204_v49, 16  ;;  %v1205_v18 = vshll.u32 %v2204_v49, 16 }
 0x1dc   : > { %v1200_v11 = vor.u32 %v1198_v44, %v1197_v38  ;;  %v1204_v14 = vrot.slane %v1202_v30, 7 }
 0x1de   : > { %v1227_v57 = vsel %vm2974_vm9, 0, %v1200_v11  ;;  %v1207_v8 = vor.u32 %v1205_v18, %v1204_v14 }
 0x1df   : > { %v3219_v23 = vsel %vm2980_vm12, %v1227_v57, 0  ;;  %v1435_v57 = vsel %vm853_vm3, %v1419_v59, %v1330_v6 }
 0x1e0   : > { %1396 = vrot.lane.b32.xlu1 %v3219_v23, %s2486_s6  ;;  %v3224_v32 = vrot.slane %v3219_v23, 1  ;;  %v1228_v17 = vsel %vm2974_vm9, 0, %v1207_v8  ;;  %v1293_v62 = vshll.u32 %v3219_v23, 16  ;;  %v1291_v1 = vshrl.u32 %v3219_v23, 16 }
 0x1e1   : > { %v3235_v4 = vsel %vm2980_vm12, %v1228_v17, 0 }
 0x1e2   : > { %1382 = vrot.lane.b32.xlu0 %v3224_v32, %s2487_s9  ;;  %v1365_v35 = vshll.u32 %v3235_v4, 16  ;;  %v2160_v61 = vcombine.low %v3185_v31, %v3224_v32  ;;  %v1369_v53 = vrot.slane %v3235_v4, 1  ;;  %v1363_v55 = vshrl.u32 %v3235_v4, 16 }
 0x1e3   : > { %v1295_v15 = vrot.slane %v1293_v62, 1 }
 0x1e4   : > { %1343 = vrot.lane.b32.xlu1 %v3224_v32, %s2486_s6  ;;  %v1367_v3 = vrot.slane %v1365_v35, 1 }
 0x1e5   : > { %v3266_v16 = vor.u32 %v1295_v15, %v1291_v1 }
 0x1e6   : > { %1398 = vrot.lane.b32.xlu0 %v3235_v4, %s2486_s6  ;;  %v3260_v42 = vor.u32 %v1367_v3, %v1363_v55  ;;  %s218_s6 = sand.u32 1, %s2473_s19  }
 0x1e7   : > { %s1999_s23 = sshll.u32 %s218_s6, 6  ;;  %s3425_s22 = scalar_lea.sflag [#allocation3], %s218_s6 }
 0x1e8   : > { %1384 = vrot.lane.b32.xlu1 %v1369_v53, %s2487_s9  ;;  %s3396_s25 = scalar_lea.vmem [#allocation2], %s1999_s23 }
 0x1e9   : > { %s1933_s8 = sshll.u32 %s3396_s25, 4  ;;  %s3415_s8 = int_to_ptr.vmem [resolvable:$true] %s1933_s8 }
 0x1ea   : > { %1414 = vrot.lane.b32.xlu0 %v3260_v42, %s2489_s26  ;;  %s2419_s13 = scalar_lea.vmem %s3415_s8, 1024  ;;  %p2426_p0 = scmp.lt.s32.totalorder %s3415_s8, %s2424_s16 }
 0x1eb   : > { %p2420_p11 = scmp.ne.s32.totalorder %s3415_s8, %s2419_s13  ;;  %p2427_p1 = scmp.lt.s32.totalorder %s2425_s17, %s2419_s13 }
 0x1ec   : > { %1412 = vrot.lane.b32.xlu1 %v3266_v16, %s2489_s26 }
 0x1ed   : > { %p2421_p12 = pnand %p2420_p11, %p2562_p5  ;;  %p2428_p2 = por %p2427_p1, %p2426_p0 }
 0x1ee   : > { %1358 = vrot.lane.b32.xlu0 %v3219_v23, %s2489_s26 }
 0x1ef   : > { %p2422_p13 = pneg %p2421_p12 }
 0x1f0   : > { %1416 = vrot.lane.b32.xlu1 %v2992_v33, %s2489_s26 }
 0x1f1   : > { %p2429_p3 = pnand %p2428_p2, %p2422_p13 }
 0x1f2   : > { %1586 = vrot.lane.b32.xlu0 %v2164_v22, %s2487_s9 }
 0x1f4   : > { %1311 = vrot.lane.b32.xlu1 %v3266_v16, %s2487_s9 }
 0x1f6   : > { %1588 = vrot.lane.b32.xlu0 %v2165_v52, %s2487_s9 }
 0x1f8   : > { %1360 = vrot.lane.b32.xlu1 %v3235_v4, %s2489_s26 }
 0x1fc   : > { %1590 = vrot.lane.b32.xlu1 %v2166_v21, %s2487_s9 }
 0x1fe   : > { %v1347_v19 = vpop.permute.xlu0 %1346 }
 0x1ff   : > { %v1451_v1 = vsel %vm887_vm5, %v1435_v57, %v1347_v19 }
 0x200   : > { %1592 = vrot.lane.b32.xlu1 %v2167_v0, %s2487_s9  ;;  %v1332_v47 = vpop.permute.xlu1 %1331 }
 0x202   : > { %v1371_v22 = vpop.permute.xlu0 %1370 }
 0x203   : > { %v1468_v8 = vsel %vm819_vm1, %v3056_v20, %v1371_v22 }
 0x204   : > { %v1349_v52 = vpop.permute.xlu1 %1348 }
 0x206   : > { %v1387_v48 = vpop.permute.xlu0 %1386 }
 0x207   : > { %v1491_v35 = vsel %vm853_vm3, %v1468_v8, %v1387_v48 }
 0x208   : > { %v1373_v7 = vpop.permute.xlu1 %1372 }
 0x209   : > { %v1471_v17 = vsel %vm819_vm1, %v3065_v63, %v1373_v7 }
 0x20a   : > { %v1334_v33 = vpop.permute.xlu0 %1333 }
 0x20c   : > { %v1300_v49 = vpop.permute.xlu1 %1299 }
 0x20d   : > { %v1421_v14 = vsel %vm819_vm1, %v3011_v27, %v1300_v49 }
 0x20e   : > { %v1403_v10 = vpop.permute.xlu0 %1402  ;;  %v1437_v18 = vsel %vm853_vm3, %v1421_v14, %v1332_v47 }
 0x20f   : > { %v1453_v3 = vsel %vm887_vm5, %v1437_v18, %v1349_v52  ;;  %v1507_v55 = vsel %vm887_vm5, %v1491_v35, %v1403_v10 }
 0x210   : > { %v2152_v47 = vcombine.low %v1451_v1, %v1453_v3 }
 0x212   : > { %v1302_v38 = vpop.permute.xlu0 %1301 }
 0x213   : > { %v1423_v14 = vsel %vm819_vm1, %v3027_v34, %v1302_v38 }
 0x21a   : > { %v1351_v44 = vpop.permute.xlu0 %1350  ;;  %v1389_v12 = vpop.permute.xlu1 %1388 }
 0x21b   : > { %v1493_v27 = vsel %vm853_vm3, %v1471_v17, %v1389_v12  ;;  %v1439_v17 = vsel %vm853_vm3, %v1423_v14, %v1334_v33 }
 0x21c   : > { %v1455_v38 = vsel %vm887_vm5, %v1439_v17, %v1351_v44 }
 0x21e   : > { %v1375_v13 = vpop.permute.xlu0 %1374  ;;  %v1336_v21 = vpop.permute.xlu1 %1335 }
 0x21f   : > { %v1474_v59 = vsel %vm819_vm1, %v3142_v2, %v1375_v13 }
 0x222   : > { %v1391_v30 = vpop.permute.xlu0 %1390  ;;  %v1353_v11 = vpop.permute.xlu1 %1352 }
 0x223   : > { %v1495_v18 = vsel %vm853_vm3, %v1474_v59, %v1391_v30 }
 0x226   : > { %v3300_v60 = vpop.permute.xlu0 %1337  ;;  %v1377_v0 = vpop.permute.xlu1 %1376 }
 0x22a   : > { %v1405_v62 = vpop.permute.xlu1 %1404  ;;  %v1407_v5 = vpop.permute.xlu0 %1406 }
 0x22b   : > { %v1509_v15 = vsel %vm887_vm5, %v1493_v27, %v1405_v62 }
 0x22c   : > { %v2153_v6 = vcombine.low %v1507_v55, %v1509_v15 }
 0x22e   : > { %1805 = vmatprep.mubr.bf16.mxu1 %v2153_v6  ;;  %v1306_v20 = vpop.permute.xlu0 %1305  ;;  %v1304_v63 = vpop.permute.xlu1 %1303 }
 0x22f   : > { %1806 = vmatmul.mubr.bf16.vlgmr.msra.gmra.mrb[0].mxu1 %v2152_v47  ;;  %v1425_v49 = vsel %vm819_vm1, %v3097_v28, %v1304_v63  ;;  %v1427_v44 = vsel %vm819_vm1, %v3116_v24, %v1306_v20 }
 0x230   : > { %2270 = vmatpush3.bf16.msra.mxu1 %v3206_v58  ;;  %v1441_v12 = vsel %vm853_vm3, %v1425_v49, %v1336_v21  ;;  %v1511_v21 = vsel %vm887_vm5, %v1495_v18, %v1407_v5 }
 0x231   : > { %2268 = vmatprep.subr.bf16.mxu1 %v3231_v43  ;;  %v1457_v28 = vsel %vm887_vm5, %v1441_v12, %v1353_v11 }
 0x232   : > { %v2155_v2 = vcombine.low %v1455_v38, %v1457_v28 }
 0x234   : > { %2271 = vmatpush3.bf16.msra.mxu1 %v3231_v43 }
 0x235   : > { %2269 = vmatprep.subr.bf16.mxu1 %v3250_v39 }
 0x236   : > { %v1355_v22 = vpop.permute.xlu0 %1354  ;;  %v1393_v48 = vpop.permute.xlu1 %1392 }
 0x238   : > { %2272 = vmatpush3.bf16.msra.mxu1 %v3250_v39  ;;  %v1477_v39 = vsel %vm819_vm1, %v3140_v54, %v1377_v0 }
 0x239   : > { %v1497_v57 = vsel %vm853_vm3, %v1477_v39, %v1393_v48  ;;  %v1443_v48 = vsel %vm853_vm3, %v1427_v44, %v3300_v60 }
 0x23a   : > { %v1379_v19 = vpop.permute.xlu0 %1378  ;;  %v1340_v52 = vpop.permute.xlu1 %1339  ;;  %v1459_v20 = vsel %vm887_vm5, %v1443_v48, %v1355_v22 }
 0x23b   : > { %v1480_v1 = vsel %vm819_vm1, %v3196_v45, %v1379_v19 }
 0x23e   : > { %v1395_v7 = vpop.permute.xlu0 %1394  ;;  %v1357_v10 = vpop.permute.xlu1 %1356 }
 0x23f   : > { %v1499_v6 = vsel %vm853_vm3, %v1480_v1, %v1395_v7 }
 0x242   : > { %v1381_v58 = vpop.permute.xlu1 %1380  ;;  %v1342_v43 = vpop.permute.xlu0 %1341 }
 0x243   : > { %v1483_v5 = vsel %vm819_vm1, %v3194_v40, %v1381_v58 }
 0x246   : > { %v1409_v8 = vpop.permute.xlu1 %1408  ;;  %v1411_v13 = vpop.permute.xlu0 %1410 }
 0x247   : > { %v1513_v34 = vsel %vm887_vm5, %v1497_v57, %v1409_v8 }
 0x248   : > { %v2156_v35 = vcombine.low %v1511_v21, %v1513_v34 }
 0x24a   : > { %1813 = vmatprep.mubr.bf16.mxu1 %v2156_v35  ;;  %v1308_v54 = vpop.permute.xlu1 %1307  ;;  %v1310_v30 = vpop.permute.xlu0 %1309 }
 0x24b   : > { %1814 = vmatmul.mubr.bf16.gmra.mrb[4].mxu1 %v2155_v2  ;;  %v1429_v11 = vsel %vm819_vm1, %v3157_v46, %v1308_v54 }
 0x24c   : > { %v1445_v55 = vsel %vm853_vm3, %v1429_v11, %v1340_v52  ;;  %v1515_v52 = vsel %vm887_vm5, %v1499_v6, %v1411_v13 }
 0x24d   : > { %v1461_v46 = vsel %vm887_vm5, %v1445_v55, %v1357_v10 }
 0x24e   : > { %v2158_v49 = vcombine.low %v1459_v20, %v1461_v46 }
 0x252   : > { %v1397_v0 = vpop.permute.xlu1 %1396 }
 0x253   : > { %v1501_v47 = vsel %vm853_vm3, %v1483_v5, %v1397_v0 }
 0x254   : > { %v1383_v27 = vpop.permute.xlu0 %1382 }
 0x255   : > { %v1486_v7 = vsel %vm819_vm1, %v3266_v16, %v1383_v27 }
 0x256   : > { %v1344_v62 = vpop.permute.xlu1 %1343 }
 0x258   : > { %v1399_v33 = vpop.permute.xlu0 %1398 }
 0x259   : > { %v1503_v10 = vsel %vm853_vm3, %v1486_v7, %v1399_v33 }
 0x25a   : > { %v1385_v3 = vpop.permute.xlu1 %1384 }
 0x25b   : > { %v1489_v24 = vsel %vm819_vm1, %v3260_v42, %v1385_v3 }
 0x25c   : > { %v1415_v15 = vpop.permute.xlu0 %1414  ;;  %v1505_v60 = vsel %vm853_vm3, %v1489_v24, %v3290_v9  ;;  %v1431_v9 = vsel %vm819_vm1, %v3170_v50, %v1310_v30 }
 0x25d   : > { %v1519_v12 = vsel %vm887_vm5, %v1503_v10, %v1415_v15  ;;  %v1447_v37 = vsel %vm853_vm3, %v1431_v9, %v1342_v43 }
 0x25e   : > { %v1413_v63 = vpop.permute.xlu1 %1412 }
 0x25f   : > { %v1517_v45 = vsel %vm887_vm5, %v1501_v47, %v1413_v63 }
 0x260   : > { %v2159_v40 = vcombine.low %v1515_v52, %v1517_v45  ;;  %v1359_v19 = vpop.permute.xlu0 %1358 }
 0x261   : > { %v1463_v8 = vsel %vm887_vm5, %v1447_v37, %v1359_v19 }
 0x262   : > { %1821 = vmatprep.mubr.bf16.mxu1 %v2159_v40  ;;  %v1417_v58 = vpop.permute.xlu1 %1416 }
 0x263   : > { %v1521_v42 = vsel %vm887_vm5, %v1505_v60, %v1417_v58  ;;  %1822 = vmatmul.mubr.bf16.gmra.mrb[8].mxu1 %v2158_v49 }
 0x264   : > { %v2162_v14 = vcombine.low %v1519_v12, %v1521_v42  ;;  %v1587_v22 = vpop.permute.xlu0 %1586 }
 0x265   : > { %v1596_v16 = vsel %vm819_vm1, %v2154_v26, %v1587_v22 }
 0x266   : > { %1829 = vmatprep.mubr.bf16.mxu1 %v2162_v14  ;;  %2259 = vmatprep.mubr.msk.bf16.mxu0 %vm836_vm2, %v1596_v16  ;;  %v1312_v59 = vpop.permute.xlu1 %1311 }
 0x267   : > { %v1433_v39 = vsel %vm819_vm1, %v3219_v23, %v1312_v59 }
 0x268   : > { %v1589_v18 = vpop.permute.xlu0 %1588  ;;  %v1449_v51 = vsel %vm853_vm3, %v1433_v39, %v1344_v62  ;;  %v2168_v62 = vld [vmem:[%s3470_s4] ss:$0 sm:$0xff] }
 0x269   : > { %v1599_v57 = vsel %vm819_vm1, %v2157_v25, %v1589_v18  ;;  %v2163_v25 = vcombine.low %v1369_v53, %v1321_v41 }
 0x26a   : > { %2260 = vmatmul.mubr.msk.bf16.vlgmr.msra.gmra.mrb[16].mxu0 %vm836_vm2, %v1599_v57  ;;  %v1361_v26 = vpop.permute.xlu1 %1360 }
 0x26b   : > { %v1465_v50 = vsel %vm887_vm5, %v1449_v51, %v1361_v26 }
 0x26c   : > { %v2161_v28 = vcombine.low %v1463_v8, %v1465_v50 }
 0x26e   : > { %1830 = vmatmul.mubr.bf16.gmra.mrb[12].mxu1 %v2161_v28  ;;  %v1591_v23 = vpop.permute.xlu1 %1590 }
 0x26f   : > { %v1602_v29 = vsel %vm819_vm1, %v2160_v61, %v1591_v23 }
 0x270   : > { %2263 = vmatprep.mubr.msk.bf16.mxu1 %vm836_vm2, %v1602_v29 }
 0x272   : > { %v1593_v36 = vpop.permute.xlu1 %1592 }
 0x273   : > { %v1605_v43 = vsel %vm819_vm1, %v2163_v25, %v1593_v36 }
 0x276   : > { %2264 = vmatmul.mubr.msk.bf16.vlgmr.msra.gmra.mrb[16].mxu1 %vm836_vm2, %v1605_v43 }
 0x302   : > { %v2222_v17 = vpop.f32.mrb[0].mxu1 }
 0x303   : > { %v2223_v21 = vpop.f32.mrb[1].mxu1 }
 0x304   : > { %v2224_v34 = vadd.f32 %v2223_v21, %v2222_v17  ;;  %v2225_v38 = vpop.f32.mrb[2].mxu1 }
 0x305   : > { %v2226_v31 = vpop.f32.mrb[3].mxu1 }
 0x306   : > { %v2227_v32 = vadd.f32 %v2226_v31, %v2225_v38  ;;  %v1808_v3 = vadd.f32 %v2224_v34, %v2168_v62 }
 0x308   : > { %v1811_v6 = vadd.f32 %v2227_v32, %v2168_v62 }
 0x31e   : > { %v2228_v61 = vpop.f32.mrb[4].mxu1 }
 0x31f   : > { %v2229_v35 = vpop.f32.mrb[5].mxu1 }
 0x320   : > { %v2230_v2 = vadd.f32 %v2229_v35, %v2228_v61  ;;  %v2231_v13 = vpop.f32.mrb[6].mxu1 }
 0x321   : > { %v2232_v56 = vpop.f32.mrb[7].mxu1 }
 0x322   : > { %v2233_v54 = vadd.f32 %v2232_v56, %v2231_v13  ;;  %v1816_v11 = vadd.f32 %v2230_v2, %v2168_v62 }
 0x324   : > { %v1819_v15 = vadd.f32 %v2233_v54, %v2168_v62 }
 0x336   : > { %v2234_v4 = vpop.f32.mrb[8].mxu1 }
 0x337   : > { %v2235_v41 = vpop.f32.mrb[9].mxu1 }
 0x338   : > { %v2236_v53 = vadd.f32 %v2235_v41, %v2234_v4  ;;  %v2237_v30 = vpop.f32.mrb[10].mxu1 }
 0x339   : > { %v2238_v0 = vpop.f32.mrb[11].mxu1 }
 0x33a   : > { %v2239_v27 = vadd.f32 %v2238_v0, %v2237_v30  ;;  %v1824_v12 = vadd.f32 %v2236_v53, %v2168_v62 }
 0x33c   : > { %v1827_v9 = vadd.f32 %v2239_v27, %v2168_v62 }
 0x33d   : > { %v2261_v33 = vpop.f32.mrb[16].mxu0 }
 0x33e   : > { %v1881_v55 = vadd.f32 %v2261_v33, %v1816_v11  ;;  %v1872_v44 = vpop.f32.mrb[17].mxu0 }
 0x33f   : > { %v1873_v1 = vadd.f32 %v1872_v44, %v1808_v3  ;;  %v2262_v5 = vpop.f32.mrb[18].mxu0 }
 0x340   : > { %v1905_v47 = vmax.f32 %v1881_v55, 0.0  ;;  %v1884_v63 = vadd.f32 %v2262_v5, %v1819_v15  ;;  %v1875_v46 = vpop.f32.mrb[19].mxu0 }
 0x341   : > { %v1903_v48 = vmax.f32 %v1873_v1, 0.0  ;;  %v1876_v52 = vadd.f32 %v1875_v46, %v1811_v6  ;;  %v2240_v24 = vpop.f32.mrb[12].mxu1 }
 0x342   : > { %1913 = vst.msk [vmem:[%s3396_s25 + $0x10] sm:$0xff] %vm819_vm1, %v1905_v47  ;;  %v1906_v45 = vmax.f32 %v1884_v63, 0.0  ;;  %v2241_v20 = vpop.f32.mrb[13].mxu1 }
 0x343   : > { %1911 = vst.msk [vmem:[%s3396_s25] sm:$0xff] %vm819_vm1, %v1903_v48  ;;  %v1904_v40 = vmax.f32 %v1876_v52, 0.0  ;;  %v2242_v19 = vadd.f32 %v2241_v20, %v2240_v24  ;;  %v2243_v7 = vpop.f32.mrb[14].mxu1 }
 0x344   : > { %1914 = vst.msk [vmem:[%s3396_s25 + $0x18] sm:$0xff] %vm819_vm1, %v1906_v45  ;;  %v2244_v49 = vpop.f32.mrb[15].mxu1 }
 0x345   : > { %1912 = vst.msk [vmem:[%s3396_s25 + $0x8] sm:$0xff] %vm819_vm1, %v1904_v40  ;;  %v2245_v10 = vadd.f32 %v2244_v49, %v2243_v7  ;;  %v1832_v60 = vadd.f32 %v2242_v19, %v2168_v62 }
 0x347   : > { %v1835_v22 = vadd.f32 %v2245_v10, %v2168_v62 }
 0x349   : > { %v2265_v58 = vpop.f32.mrb[16].mxu1 }
 0x34a   : > { %v1897_v42 = vadd.f32 %v2265_v58, %v1832_v60  ;;  %v1888_v14 = vpop.f32.mrb[17].mxu1 }
 0x34b   : > { %v1889_v16 = vadd.f32 %v1888_v14, %v1824_v12  ;;  %v2266_v59 = vpop.f32.mrb[18].mxu1 }
 0x34c   : > { %v1909_v39 = vmax.f32 %v1897_v42, 0.0  ;;  %v1900_v18 = vadd.f32 %v2266_v59, %v1835_v22  ;;  %v1891_v57 = vpop.f32.mrb[19].mxu1 }
 0x34d   : > { %v1907_v37 = vmax.f32 %v1889_v16, 0.0  ;;  %v1892_v51 = vadd.f32 %v1891_v57, %v1827_v9 }
 0x34e   : > { %1917 = vst.msk [vmem:[%s3396_s25 + $0x30] sm:$0xff] %vm819_vm1, %v1909_v39  ;;  %v1910_v26 = vmax.f32 %v1900_v18, 0.0 }
 0x34f   : > { %1915 = vst.msk [vmem:[%s3396_s25 + $0x20] sm:$0xff] %vm819_vm1, %v1907_v37  ;;  %v1908_v8 = vmax.f32 %v1892_v51, 0.0 }
 0x350   : > { %1918 = vst.msk [vmem:[%s3396_s25 + $0x38] sm:$0xff] %vm819_vm1, %v1910_v26 }
 0x351   : > { %1916 = vst.msk [vmem:[%s3396_s25 + $0x28] sm:$0xff] %vm819_vm1, %v1908_v8 }
 0x352   : > { %2432 = shalt.err (!%p2429_p3)
}
 0x353   : > { %s2433_s30 = scalar_lea.hbm %s3413_s12, 1024  ;;  %s2437_s9 = scalar_lea.hbm %s3471_s5, 2048 }
 0x354   : > { %p2434_p4 = scmp.ne.s32.totalorder %s3413_s12, %s2433_s30  ;;  %p2438_p9 = scmp.lt.u32.totalorder %s3413_s12, %s3471_s5 }
 0x355   : > { %p2439_p10 = scmp.lt.u32.totalorder %s2437_s9, %s2433_s30  ;;  %p2441_p12 = scmp.lt.u32.totalorder %s2433_s30, %s3413_s12 }
 0x356   : > { %p2435_p7 = pnand %p2434_p4, %p2562_p5 }
 0x357   : > { %p2440_p11 = por %p2439_p10, %p2438_p9 }
 0x358   : > { %p2436_p8 = pneg %p2435_p7 }
 0x359   : > { %p2442_p13 = por %p2441_p12, %p2440_p11 }
 0x35b   : > { %p2443_p0 = pnand %p2442_p13, %p2436_p8 }
 0x35d   : > { %2446 = shalt.err (!%p2443_p0)
}
 0x35e   : > { %s2492_s25 = smov 128   ;;  %s2493_s7 = smov 8  }
 0x35f   : > { %2274 = dma.vmem_to_hbm [thread:$0]  (%p2562_p5), %s3415_s8, 1024, %s3413_s12, %s3425_s22, %s2492_s25, %s2492_s25, %s2493_s7  }
 0x360 PF: > { %p2280_p1 = scmp.ge.s32.totalorder %s2481_s21, 2  ;;  %s1948_s10 = sand.u32 1, %s2469_s18  }
 0x361   : > { %s1949_s11 = scalar_lea.sflag [#allocation3], %s1948_s10 }
 0x362   : > { %p2277_p2 = pnand %p2280_p1, %p2566_p6 }
 0x364   : > { %2464 = dma.done.wait (!%p2277_p2), %s1949_s11, 1024  }
 0x365   : > { %2466 = vsyncadd (!%p2277_p2), %s1949_s11, 4294966272  ;;  %p15_p3 = scmp.ge.s32.totalorder %s2549_s24, 4   ;;  %s3478_s18 = smov %s2473_s19 }
 0x366   : > { %s3479_s19 = smov %s2477_s20  ;;  %s3480_s20 = smov %s2560_s27 }
 0x367   : > { %s3481_s21 = smov %s2549_s24  ;;  %17 = sbr.rel (!%p15_p3) target bundleno = 3 (0x3), region = 80 }
 0x36e   :  { %1954 = vsyncpa [#allocation3], 1 }
 0x36f   :  { %1956 = vsyncpa [#allocation3 + $0x1], 1 }

// kernel: fwd.2
= control target key start
LH: loop header
LB: loop body
LE: loop exit
PB: predicated region body
PF: predicated region fallthrough
CT: control target
= control target key end

     0   :  { %s3395_s18 = smov 0   ;;  %s4779_s0 = inlined_call_operand.vmem [shape: bf16[2,16,16,16], index: 0, kind: input, shape index: {}]   ;;  %s4780_s1 = inlined_call_operand.vmem [shape: bf16[144,16], index: 1, kind: input, shape index: {}]   ;;  %s4781_s2 = inlined_call_operand.vmem [shape: f32[1,16], index: 2, kind: input, shape index: {}]   ;;  %s4782_s3 = inlined_call_operand.vmem [shape: bf16[144,16], index: 3, kind: input, shape index: {}]   ;;  %s4783_s4 = inlined_call_operand.vmem [shape: f32[1,16], index: 4, kind: input, shape index: {}]   ;;  %s4784_s5 = inlined_call_operand.vmem [shape: bf16[2,16,16,16], index: 5, kind: output, shape index: {}]  }
   0x1 LB: > { %s3121_s19 = sadd.s32 4294967295, %s3355_s18   ;;  %p3125_p0 = scmp.ge.s32.totalorder %s3355_s18, 1  ;;  %s3355_s18 = sphi %s3395_s18, %s15_s18  }
   0x2   : > { %p187_p1 = scmp.lt.s32.totalorder %s3355_s18, 3 }
   0x4   : > { %p188_p2 = pnand %p3125_p0, %p187_p1 }
   0x5   : > { %vm491_vm0 = vcmask (!%p188_p2), 1040384   ;;  %vm492_vm1 = vsmask.f32 (!%p188_p2), 256  ;;  %v3357_v0 = vmov (!%p188_p2), 0   ;;  %p215_p3 = scmp.lt.s32.totalorder (!%p188_p2), %s3121_s19, 1  ;;  %v3290_v3 = vld [vmem:[%s4780_s1] sm:$0xff] (!%p188_p2)  }
   0x6   : > { %191 = sbr.rel (%p188_p2) target bundleno = 947 (0x3b3), region = 40  ;;  %v341_v1 = vrot.slane (!%p188_p2), %v3357_v0, 7  ;;  %vm3404_vm2 = vmand (!%p188_p2), %vm491_vm0, %vm492_vm1  ;;  %1417 = vmatprep.subr.bf16.mxu0 (!%p188_p2), %v3357_v0  ;;  %2648 = vmatprep.subr.bf16.mxu1 (!%p188_p2), %v3357_v0  ;;  %vm785_vm3 = vcmask (!%p188_p2), 1046528   ;;  %v3291_v6 = vld [vmem:[%s4780_s1 + $0x8] sm:$0xff] (!%p188_p2)   ;;  %v3293_v14 = vld [vmem:[%s4780_s1 + $0x10] sm:$0xff] (!%p188_p2)   ;;  %s3358_s30 = smov (!%p188_p2), 32  }
   0x7   : > { %1418 = vmatpush1.bf16.msra.mxu0 (!%p188_p2), %v3290_v3  ;;  %vm528_vm4 = vsmask.f32 (!%p188_p2), 7424  ;;  %s3359_s6 = smov (!%p188_p2), 16   ;;  %v3294_v26 = vld [vmem:[%s4780_s1 + $0x18] sm:$0xff] (!%p188_p2)   ;;  %v3295_v37 = vld [vmem:[%s4780_s1 + $0x20] sm:$0xff] (!%p188_p2)   ;;  %s3360_s11 = smov (!%p188_p2), 48  }
   0x8   : > { %v3415_v4 = vsel (!%p188_p2), %vm3404_vm2, 0, %v341_v1  ;;  %v511_v5 = vsel (!%p188_p2), %vm3404_vm2, %v341_v1, 0  ;;  %1419 = vmatprep.subr.bf16.mxu0 (!%p188_p2), %v3357_v0  ;;  %v3296_v50 = vld [vmem:[%s4780_s1 + $0x28] sm:$0xff] (!%p188_p2)   ;;  %s3361_s14 = smov (!%p188_p2), 80   ;;  %vm1043_vm5 = vcmask (!%p188_p2), 130048   ;;  %s3362_s15 = smov (!%p188_p2), 96  }
   0x9   : > { %v786_v7 = vrot.slane (!%p188_p2), %v3415_v4, 1  ;;  %v787_v8 = vrot.slane (!%p188_p2), %v511_v5, 1  ;;  %v530_v9 = vshrl.u32 (!%p188_p2), %v3415_v4, 16  ;;  %v532_v10 = vshll.u32 (!%p188_p2), %v3415_v4, 16  ;;  %v3298_v59 = vld [vmem:[%s4780_s1 + $0x30] sm:$0xff] (!%p188_p2)   ;;  %s3363_s22 = smov (!%p188_p2), 112  }
   0xa   : > { %v537_v11 = vshll.u32 (!%p188_p2), %v511_v5, 16  ;;  %s3364_s26 = smov (!%p188_p2), 64   ;;  %vm1076_vm6 = vcmask (!%p188_p2), 261120   ;;  %vm1109_vm7 = vcmask (!%p188_p2), 392192   ;;  %vm1142_vm8 = vcmask (!%p188_p2), 523264  }
   0xb   : > { %v3430_v12 = vsel (!%p188_p2), %vm785_vm3, %v786_v7, %v787_v8  ;;  %v534_v13 = vrot.slane (!%p188_p2), %v532_v10, 1  ;;  %1420 = vmatpush1.bf16.msra.mxu0 (!%p188_p2), %v3291_v6  ;;  %v3299_v6 = vld [vmem:[%s4780_s1 + $0x38] sm:$0xff] (!%p188_p2)   ;;  %vm1175_vm9 = vcmask (!%p188_p2), 654336   ;;  %vm1208_vm10 = vcmask (!%p188_p2), 785408  }
   0xc   : > { %834 = vrot.lane.b32.xlu0 (!%p188_p2), %v3430_v12, %s3358_s30  ;;  %v539_v15 = vrot.slane (!%p188_p2), %v537_v11, 1  ;;  %1421 = vmatprep.subr.bf16.mxu0 (!%p188_p2), %v3357_v0  ;;  %vm1241_vm11 = vcmask (!%p188_p2), 916480   ;;  %vm3033_vm12 = vcmask (!%p188_p2), 125952  }
   0xd   : > { %s4788_s19 = smov (!%p215_p3, %s3121_s19), 1  ;;  %v535_v19 = vor.u32 %v534_v13, %v530_v9  ;;  %v3300_v13 = vld [vmem:[%s4780_s1 + $0x40] sm:$0xff]  }
   0xe   : > { %s3232_s24 = sshll.u32 %s4788_s19, 7 }
   0xf   : > { %s3437_s27 = scalar_lea.vmem %s4779_s0, %s3232_s24  ;;  %v3449_v20 = vsel %vm528_vm4, %v535_v19, %v539_v15  ;;  %1422 = vmatpush1.bf16.msra.mxu0 %v3293_v14 }
  0x10   : > { %v226_v16 = vld [vmem:[%s3437_s27] sm:$0xff]   ;;  %v228_v17 = vld [vmem:[%s3437_s27 + $0x8] sm:$0xff]   ;;  %v230_v18 = vld [vmem:[%s3437_s27 + $0x10] sm:$0xff]   ;;  %721 = vrot.lane.b32.xlu0 %v3449_v20, %s3359_s6  ;;  %1423 = vmatprep.subr.bf16.mxu0 %v3357_v0 }
  0x11   : > { %v346_v21 = vshrl.u32 %v226_v16, 16  ;;  %v349_v22 = vshll.u32 %v226_v16, 16  ;;  %v353_v23 = vshrl.u32 %v228_v17, 16  ;;  %v356_v24 = vshll.u32 %v228_v17, 16  ;;  %v232_v36 = vld [vmem:[%s3437_s27 + $0x18] sm:$0xff]   ;;  %v234_v14 = vld [vmem:[%s3437_s27 + $0x20] sm:$0xff]  }
  0x12   : > { %v360_v25 = vshrl.u32 %v230_v18, 16  ;;  %v363_v35 = vshll.u32 %v230_v18, 16  ;;  %v367_v57 = vshrl.u32 %v232_v36, 16  ;;  %v370_v61 = vshll.u32 %v232_v36, 16 }
  0x13   : > { %v348_v27 = vrot.slane %v346_v21, 7  ;;  %v355_v28 = vrot.slane %v353_v23, 7  ;;  %1424 = vmatpush1.bf16.msra.mxu0 %v3294_v26 }
  0x14   : > { %v362_v34 = vrot.slane %v360_v25, 7  ;;  %1425 = vmatprep.subr.bf16.mxu0 %v3357_v0  ;;  %v369_v3 = vrot.slane %v367_v57, 7 }
  0x15   : > { %v351_v29 = vor.u32 %v349_v22, %v348_v27  ;;  %v358_v30 = vor.u32 %v356_v24, %v355_v28  ;;  %v512_v31 = vsel %vm3404_vm2, %v348_v27, 0  ;;  %v513_v32 = vsel %vm3404_vm2, %v355_v28, 0 }
  0x16   : > { %v790_v33 = vrot.slane %v512_v31, 1  ;;  %v793_v40 = vrot.slane %v513_v32, 1  ;;  %v561_v41 = vshll.u32 %v513_v32, 16  ;;  %v365_v49 = vor.u32 %v363_v35, %v362_v34 }
  0x17   : > { %v3467_v38 = vsel %vm3404_vm2, 0, %v351_v29  ;;  %v3471_v39 = vsel %vm3404_vm2, 0, %v358_v30  ;;  %1426 = vmatpush1.bf16.msra.mxu0 %v3295_v37  ;;  %v549_v56 = vshll.u32 %v512_v31, 16  ;;  %v514_v5 = vsel %vm3404_vm2, %v362_v34, 0  ;;  %v236_v30 = vld [vmem:[%s3437_s27 + $0x28] sm:$0xff]  }
  0x18   : > { %867 = vrot.lane.b32.xlu1 %v3467_v38, %s3360_s11  ;;  %v789_v42 = vrot.slane %v3467_v38, 1  ;;  %v792_v43 = vrot.slane %v3471_v39, 1  ;;  %v554_v44 = vshrl.u32 %v3471_v39, 16  ;;  %v556_v45 = vshll.u32 %v3471_v39, 16  ;;  %1427 = vmatprep.subr.bf16.mxu0 %v3357_v0 }
  0x19   : > { %v544_v46 = vshll.u32 %v3467_v38, 16  ;;  %v563_v53 = vrot.slane %v561_v41, 1  ;;  %v542_v54 = vshrl.u32 %v3467_v38, 16  ;;  %v3497_v58 = vsel %vm3404_vm2, 0, %v365_v49 }
  0x1a   : > { %v791_v47 = vsel %vm785_vm3, %v789_v42, %v790_v33  ;;  %v558_v48 = vrot.slane %v556_v45, 1  ;;  %v3487_v51 = vsel %vm785_vm3, %v792_v43, %v793_v40  ;;  %v551_v63 = vrot.slane %v549_v56, 1 }
  0x1b   : > { %947 = vrot.lane.b32.xlu0 %v791_v47, %s3361_s14  ;;  %3156 = vmatprep.mubr.msk.bf16.mxu0 %vm1043_vm5, %v3487_v51  ;;  %v546_v55 = vrot.slane %v544_v46, 1  ;;  %v568_v1 = vshll.u32 %v3497_v58, 16  ;;  %v566_v7 = vshrl.u32 %v3497_v58, 16  ;;  %v573_v10 = vshll.u32 %v514_v5, 16 }
  0x1c   : > { %979 = vrot.lane.b32.xlu1 %v3471_v39, %s3362_s15  ;;  %v559_v52 = vor.u32 %v558_v48, %v554_v44  ;;  %1428 = vmatpush1.bf16.msra.mxu0 %v3296_v50  ;;  %v372_v11 = vor.u32 %v370_v61, %v369_v3  ;;  %v515_v21 = vsel %vm3404_vm2, %v369_v3, 0  ;;  %v374_v22 = vshrl.u32 %v234_v14, 16  ;;  %v238_v50 = vld [vmem:[%s3437_s27 + $0x30] sm:$0xff]  }
  0x1d   : > { %1429 = vmatprep.subr.bf16.mxu0 %v3357_v0  ;;  %v547_v62 = vor.u32 %v546_v55, %v542_v54  ;;  %v570_v9 = vrot.slane %v568_v1, 1  ;;  %v575_v16 = vrot.slane %v573_v10, 1  ;;  %v795_v23 = vrot.slane %v3497_v58, 1 }
  0x1e   : > { %v564_v60 = vsel %vm528_vm4, %v559_v52, %v563_v53  ;;  %v3528_v17 = vsel %vm3404_vm2, 0, %v372_v11  ;;  %v796_v24 = vrot.slane %v514_v5, 1  ;;  %v585_v27 = vshll.u32 %v515_v21, 16 }
  0x1f   : > { %836 = vrot.lane.b32.xlu0 %v791_v47, %s3358_s30  ;;  %v552_v8 = vsel %vm528_vm4, %v547_v62, %v551_v63  ;;  %v571_v15 = vor.u32 %v570_v9, %v566_v7  ;;  %v580_v18 = vshll.u32 %v3528_v17, 16  ;;  %v578_v25 = vshrl.u32 %v3528_v17, 16 }
  0x20   : > { %869 = vrot.lane.b32.xlu1 %v3471_v39, %s3360_s11  ;;  %1430 = vmatpush1.bf16.msra.mxu0 %v3298_v59  ;;  %v376_v28 = vrot.slane %v374_v22, 7  ;;  %v377_v29 = vshll.u32 %v234_v14, 16  ;;  %v3547_v31 = vsel %vm785_vm3, %v795_v23, %v796_v24  ;;  %v587_v33 = vrot.slane %v585_v27, 1  ;;  %v242_v27 = vld [vmem:[%s3437_s27 + $0x40] sm:$0xff]  }
  0x21   : > { %1431 = vmatprep.subr.bf16.mxu0 %v3357_v0  ;;  %v576_v19 = vsel %vm528_vm4, %v571_v15, %v575_v16  ;;  %v582_v26 = vrot.slane %v580_v18, 1  ;;  %v381_v36 = vshrl.u32 %v236_v30, 16  ;;  %v384_v42 = vshll.u32 %v236_v30, 16 }
  0x22   : > { %v379_v34 = vor.u32 %v377_v29, %v376_v28  ;;  %v516_v43 = vsel %vm3404_vm2, %v376_v28, 0  ;;  %v798_v44 = vrot.slane %v3528_v17, 1  ;;  %v799_v45 = vrot.slane %v515_v21, 1 }
  0x23   : > { %1011 = vrot.lane.b32.xlu0 %v564_v60, %s3363_s22  ;;  %v583_v32 = vor.u32 %v582_v26, %v578_v25  ;;  %v383_v41 = vrot.slane %v381_v36, 7  ;;  %v597_v48 = vshll.u32 %v516_v43, 16  ;;  %v388_v59 = vshrl.u32 %v238_v50, 16 }
  0x24   : > { %949 = vrot.lane.b32.xlu1 %v3487_v51, %s3361_s14  ;;  %1432 = vmatpush1.bf16.msra.mxu0 %v3299_v6  ;;  %v3555_v37 = vsel %vm3404_vm2, 0, %v379_v34  ;;  %v391_v5 = vshll.u32 %v238_v50, 16  ;;  %v240_v6 = vld [vmem:[%s3437_s27 + $0x38] sm:$0xff]   ;;  %v402_v36 = vshrl.u32 %v242_v27, 16 }
  0x25   : > { %1433 = vmatprep.subr.bf16.mxu0 %v3357_v0  ;;  %v588_v35 = vsel %vm528_vm4, %v583_v32, %v587_v33  ;;  %v592_v40 = vshll.u32 %v3555_v37, 16  ;;  %v590_v46 = vshrl.u32 %v3555_v37, 16  ;;  %v386_v49 = vor.u32 %v384_v42, %v383_v41 }
  0x26   : > { %v599_v53 = vrot.slane %v597_v48, 1  ;;  %v517_v57 = vsel %vm3404_vm2, %v383_v41, 0  ;;  %v801_v61 = vrot.slane %v3555_v37, 1  ;;  %v390_v3 = vrot.slane %v388_v59, 7 }
  0x27   : > { %913 = vrot.lane.b32.xlu0 %v564_v60, %s3364_s26  ;;  %v594_v47 = vrot.slane %v592_v40, 1  ;;  %v3577_v54 = vsel %vm3404_vm2, 0, %v386_v49  ;;  %v609_v1 = vshll.u32 %v517_v57, 16  ;;  %v398_v18 = vshll.u32 %v240_v6, 16 }
  0x28   : > { %911 = vrot.lane.b32.xlu1 %v552_v8, %s3364_s26  ;;  %1434 = vmatpush1.bf16.msra.mxu0 %v3300_v13  ;;  %v604_v55 = vshll.u32 %v3577_v54, 16  ;;  %v602_v62 = vshrl.u32 %v3577_v54, 16  ;;  %v393_v10 = vor.u32 %v391_v5, %v390_v3  ;;  %v395_v13 = vshrl.u32 %v240_v6, 16 }
  0x29   : > { %v595_v52 = vor.u32 %v594_v47, %v590_v46  ;;  %v611_v9 = vrot.slane %v609_v1, 1  ;;  %v804_v21 = vrot.slane %v3577_v54, 1  ;;  %v805_v22 = vrot.slane %v517_v57, 1  ;;  %v244_v47 = vld [vmem:[%s3437_s27 + $0x48] sm:$0xff]  }
  0x2a   : > { %v606_v63 = vrot.slane %v604_v55, 1  ;;  %v3605_v14 = vsel %vm3404_vm2, 0, %v393_v10  ;;  %v397_v16 = vrot.slane %v395_v13, 7  ;;  %v405_v46 = vshll.u32 %v242_v27, 16 }
  0x2b   : > { %981 = vrot.lane.b32.xlu0 %v3497_v58, %s3362_s15  ;;  %v600_v56 = vsel %vm528_vm4, %v595_v52, %v599_v53  ;;  %v616_v15 = vshll.u32 %v3605_v14, 16  ;;  %v614_v23 = vshrl.u32 %v3605_v14, 16  ;;  %v3623_v28 = vsel %vm785_vm3, %v804_v21, %v805_v22 }
  0x2c   : > { %723 = vrot.lane.b32.xlu1 %v552_v8, %s3359_s6  ;;  %v607_v8 = vor.u32 %v606_v63, %v602_v62  ;;  %v400_v26 = vor.u32 %v398_v18, %v397_v16  ;;  %v807_v41 = vrot.slane %v3605_v14, 1  ;;  %v409_v55 = vshrl.u32 %v244_v47, 16 }
  0x2d   : > { %v618_v24 = vrot.slane %v616_v15, 1 }
  0x2e   : > { %v612_v11 = vsel %vm528_vm4, %v607_v8, %v611_v9  ;;  %v3627_v32 = vsel %vm3404_vm2, 0, %v400_v26  ;;  %v411_v59 = vrot.slane %v409_v55, 7  ;;  %v246_v8 = vld [vmem:[%s3437_s27 + $0x50] sm:$0xff]  }
  0x2f   : > { %725 = vrot.lane.b32.xlu0 %v564_v60, %s3359_s6  ;;  %v802_v60 = vrot.slane %v516_v43, 1  ;;  %v619_v29 = vor.u32 %v618_v24, %v614_v23  ;;  %v628_v33 = vshll.u32 %v3627_v32, 16  ;;  %v626_v42 = vshrl.u32 %v3627_v32, 16 }
  0x30   : > { %1013 = vrot.lane.b32.xlu1 %v576_v19, %s3363_s22  ;;  %v810_v62 = vrot.slane %v3627_v32, 1  ;;  %v521_v18 = vsel %vm3404_vm2, %v411_v59, 0 }
  0x31   : > { %v3597_v7 = vsel %vm785_vm3, %v801_v61, %v802_v60  ;;  %v630_v43 = vrot.slane %v628_v33, 1  ;;  %v412_v60 = vshll.u32 %v244_v47, 16  ;;  %v657_v26 = vshll.u32 %v521_v18, 16 }
  0x33   : > { %871 = vrot.lane.b32.xlu0 %v3497_v58, %s3360_s11  ;;  %v631_v49 = vor.u32 %v630_v43, %v626_v42  ;;  %v414_v6 = vor.u32 %v412_v60, %v411_v59  ;;  %v817_v60 = vrot.slane %v521_v18, 1 }
  0x34   : > { %838 = vrot.lane.b32.xlu1 %v3487_v51, %s3358_s30  ;;  %v3573_v51 = vsel %vm785_vm3, %v798_v44, %v799_v45  ;;  %v404_v45 = vrot.slane %v402_v36, 7 }
  0x35   : > { %v3677_v13 = vsel %vm3404_vm2, 0, %v414_v6 }
  0x36   : > { %v407_v52 = vor.u32 %v405_v46, %v404_v45  ;;  %v520_v61 = vsel %vm3404_vm2, %v404_v45, 0  ;;  %v652_v15 = vshll.u32 %v3677_v13, 16  ;;  %v650_v24 = vshrl.u32 %v3677_v13, 16 }
  0x37   : > { %951 = vrot.lane.b32.xlu0 %v3547_v31, %s3361_s14  ;;  %v645_v5 = vshll.u32 %v520_v61, 16  ;;  %v814_v22 = vrot.slane %v520_v61, 1  ;;  %v816_v59 = vrot.slane %v3677_v13, 1 }
  0x38   : > { %915 = vrot.lane.b32.xlu1 %v576_v19, %s3364_s26 }
  0x3b   : > { %1015 = vrot.lane.b32.xlu0 %v588_v35, %s3363_s22 }
  0x3c   : > { %983 = vrot.lane.b32.xlu1 %v3528_v17, %s3362_s15 }
  0x3f   : > { %840 = vrot.lane.b32.xlu0 %v3547_v31, %s3358_s30 }
  0x40   : > { %727 = vrot.lane.b32.xlu1 %v576_v19, %s3359_s6  ;;  %v518_v19 = vsel %vm3404_vm2, %v390_v3, 0 }
  0x41   : > { %v621_v25 = vshll.u32 %v518_v19, 16  ;;  %v808_v40 = vrot.slane %v518_v19, 1  ;;  %v416_v19 = vshrl.u32 %v246_v8, 16 }
  0x43   : > { %917 = vrot.lane.b32.xlu0 %v588_v35, %s3364_s26  ;;  %v623_v30 = vrot.slane %v621_v25, 1  ;;  %v3647_v48 = vsel %vm785_vm3, %v807_v41, %v808_v40  ;;  %v654_v25 = vrot.slane %v652_v15, 1  ;;  %v418_v27 = vrot.slane %v416_v19, 7 }
  0x44   : > { %873 = vrot.lane.b32.xlu1 %v3528_v17, %s3360_s11 }
  0x45   : > { %v624_v34 = vsel %vm528_vm4, %v619_v29, %v623_v30  ;;  %v419_v29 = vshll.u32 %v246_v8, 16  ;;  %v248_v30 = vld [vmem:[%s3437_s27 + $0x58] sm:$0xff]   ;;  %v3713_v55 = vsel %vm3404_vm2, %v418_v27, 0  ;;  %v250_v8 = vld [vmem:[%s3437_s27 + $0x60] sm:$0xff]  }
  0x47   : > { %985 = vrot.lane.b32.xlu0 %v3555_v37, %s3362_s15  ;;  %v421_v41 = vor.u32 %v419_v29, %v418_v27 }
  0x48   : > { %953 = vrot.lane.b32.xlu1 %v3573_v51, %s3361_s14 }
  0x49   : > { %v3705_v46 = vsel %vm3404_vm2, 0, %v421_v41  ;;  %v820_v41 = vrot.slane %v3713_v55, 1 }
  0x4b   : > { %729 = vrot.lane.b32.xlu0 %v588_v35, %s3359_s6  ;;  %v519_v35 = vsel %vm3404_vm2, %v397_v16, 0 }
  0x4c   : > { %1017 = vrot.lane.b32.xlu1 %v600_v56, %s3363_s22  ;;  %v633_v44 = vshll.u32 %v519_v35, 16  ;;  %v811_v63 = vrot.slane %v519_v35, 1  ;;  %v659_v35 = vrot.slane %v657_v26, 1 }
  0x4e   : > { %v635_v50 = vrot.slane %v633_v44, 1  ;;  %v3673_v9 = vsel %vm785_vm3, %v810_v62, %v811_v63  ;;  %v423_v44 = vshrl.u32 %v248_v30, 16  ;;  %v662_v62 = vshrl.u32 %v3705_v46, 16 }
  0x4f   : > { %875 = vrot.lane.b32.xlu0 %v3555_v37, %s3360_s11 }
  0x50   : > { %842 = vrot.lane.b32.xlu1 %v3573_v51, %s3358_s30  ;;  %v636_v53 = vsel %vm528_vm4, %v631_v49, %v635_v50  ;;  %v664_v49 = vshll.u32 %v3705_v46, 16  ;;  %v425_v50 = vrot.slane %v423_v44, 7 }
  0x52   : > { %v666_v63 = vrot.slane %v664_v49, 1  ;;  %v3750_v29 = vsel %vm3404_vm2, %v425_v50, 0 }
  0x53   : > { %955 = vrot.lane.b32.xlu0 %v3597_v7, %s3361_s14 }
  0x54   : > { %919 = vrot.lane.b32.xlu1 %v600_v56, %s3364_s26  ;;  %v667_v15 = vor.u32 %v666_v63, %v662_v62 }
  0x57   : > { %1019 = vrot.lane.b32.xlu0 %v612_v11, %s3363_s22 }
  0x58   : > { %987 = vrot.lane.b32.xlu1 %v3577_v54, %s3362_s15 }
  0x5b   : > { %844 = vrot.lane.b32.xlu0 %v3597_v7, %s3358_s30 }
  0x5c   : > { %731 = vrot.lane.b32.xlu1 %v600_v56, %s3359_s6  ;;  %v3655_v56 = vsel %vm3404_vm2, 0, %v407_v52  ;;  %v426_v52 = vshll.u32 %v248_v30, 16 }
  0x5d   : > { %v640_v57 = vshll.u32 %v3655_v56, 16  ;;  %v638_v1 = vshrl.u32 %v3655_v56, 16  ;;  %v813_v23 = vrot.slane %v3655_v56, 1 }
  0x5f   : > { %921 = vrot.lane.b32.xlu0 %v612_v11, %s3364_s26  ;;  %v642_v3 = vrot.slane %v640_v57, 1  ;;  %v3697_v33 = vsel %vm785_vm3, %v813_v23, %v814_v22 }
  0x60   : > { %877 = vrot.lane.b32.xlu1 %v3577_v54, %s3360_s11 }
  0x61   : > { %v643_v10 = vor.u32 %v642_v3, %v638_v1  ;;  %v669_v1 = vshll.u32 %v3713_v55, 16  ;;  %v428_v3 = vor.u32 %v426_v52, %v425_v50  ;;  %v433_v55 = vshll.u32 %v250_v8, 16 }
  0x63   : > { %989 = vrot.lane.b32.xlu0 %v3605_v14, %s3362_s15  ;;  %v3735_v18 = vsel %vm3404_vm2, 0, %v428_v3 }
  0x64   : > { %957 = vrot.lane.b32.xlu1 %v3623_v28, %s3361_s14  ;;  %v674_v44 = vshrl.u32 %v3735_v18, 16 }
  0x67   : > { %733 = vrot.lane.b32.xlu0 %v612_v11, %s3359_s6  ;;  %v647_v11 = vrot.slane %v645_v5, 1 }
  0x68   : > { %1021 = vrot.lane.b32.xlu1 %v624_v34, %s3363_s22 }
  0x69   : > { %v648_v16 = vsel %vm528_vm4, %v643_v10, %v647_v11  ;;  %v3731_v11 = vsel %vm785_vm3, %v816_v59, %v817_v60  ;;  %v252_v59 = vld [vmem:[%s3437_s27 + $0x68] sm:$0xff]  }
  0x6b   : > { %879 = vrot.lane.b32.xlu0 %v3605_v14, %s3360_s11 }
  0x6c   : > { %846 = vrot.lane.b32.xlu1 %v3623_v28, %s3358_s30 }
  0x6f   : > { %959 = vrot.lane.b32.xlu0 %v3647_v48, %s3361_s14 }
  0x70   : > { %923 = vrot.lane.b32.xlu1 %v624_v34, %s3364_s26 }
  0x73   : > { %1023 = vrot.lane.b32.xlu0 %v636_v53, %s3363_s22 }
  0x74   : > { %991 = vrot.lane.b32.xlu1 %v3627_v32, %s3362_s15 }
  0x77   : > { %848 = vrot.lane.b32.xlu0 %v3647_v48, %s3358_s30 }
  0x78   : > { %735 = vrot.lane.b32.xlu1 %v624_v34, %s3359_s6  ;;  %v655_v34 = vor.u32 %v654_v25, %v650_v24  ;;  %v676_v24 = vshll.u32 %v3735_v18, 16 }
  0x7a   : > { %v660_v42 = vsel %vm528_vm4, %v655_v34, %v659_v35  ;;  %v430_v35 = vshrl.u32 %v250_v8, 16 }
  0x7b   : > { %925 = vrot.lane.b32.xlu0 %v636_v53, %s3364_s26 }
  0x7c   : > { %881 = vrot.lane.b32.xlu1 %v3627_v32, %s3360_s11 }
  0x7e   : > { %v835_v21 = vpop.permute.xlu0 %834 }
  0x7f   : > { %993 = vrot.lane.b32.xlu0 %v3655_v56, %s3362_s15 }
  0x80   : > { %961 = vrot.lane.b32.xlu1 %v3673_v9, %s3361_s14 }
  0x82   : > { %v722_v36 = vpop.permute.xlu0 %721 }
  0x83   : > { %737 = vrot.lane.b32.xlu0 %v636_v53, %s3359_s6  ;;  %v1045_v57 = vsel %vm1043_vm5, %v3415_v4, %v722_v36 }
  0x84   : > { %1025 = vrot.lane.b32.xlu1 %v648_v16, %s3363_s22  ;;  %v3724_v6 = vsel %vm1076_vm6, %v1045_v57, %v835_v21  ;;  %v432_v57 = vrot.slane %v430_v35, 7 }
  0x87   : > { %883 = vrot.lane.b32.xlu0 %v3655_v56, %s3360_s11 }
  0x88   : > { %850 = vrot.lane.b32.xlu1 %v3673_v9, %s3358_s30 }
  0x8a   : > { %v868_v40 = vpop.permute.xlu1 %867 }
  0x8b   : > { %963 = vrot.lane.b32.xlu0 %v3697_v33, %s3361_s14  ;;  %v1111_v19 = vsel %vm1109_vm7, %v3724_v6, %v868_v40  ;;  %v819_v40 = vrot.slane %v3705_v46, 1 }
  0x8c   : > { %927 = vrot.lane.b32.xlu1 %v648_v16, %s3364_s26 }
  0x8d   : > { %v948_v43 = vpop.permute.xlu0 %947 }
  0x8e   : > { %v980_v45 = vpop.permute.xlu1 %979 }
  0x8f   : > { %1027 = vrot.lane.b32.xlu0 %v660_v42, %s3363_s22 }
  0x90   : > { %995 = vrot.lane.b32.xlu1 %v3677_v13, %s3362_s15 }
  0x91   : > { %v837_v47 = vpop.permute.xlu0 %836 }
  0x92   : > { %v870_v53 = vpop.permute.xlu1 %869 }
  0x93   : > { %852 = vrot.lane.b32.xlu0 %v3697_v33, %s3358_s30 }
  0x94   : > { %739 = vrot.lane.b32.xlu1 %v648_v16, %s3359_s6  ;;  %v671_v16 = vrot.slane %v669_v1, 1 }
  0x95   : > { %v1012_v61 = vpop.permute.xlu0 %1011 }
  0x96   : > { %v950_v5 = vpop.permute.xlu1 %949  ;;  %v672_v27 = vsel %vm528_vm4, %v667_v15, %v671_v16  ;;  %v437_v16 = vshrl.u32 %v252_v59, 16 }
  0x97   : > { %929 = vrot.lane.b32.xlu0 %v660_v42, %s3364_s26 }
  0x98   : > { %885 = vrot.lane.b32.xlu1 %v3677_v13, %s3360_s11 }
  0x99   : > { %v914_v10 = vpop.permute.xlu0 %913 }
  0x9a   : > { %v912_v21 = vpop.permute.xlu1 %911 }
  0x9b   : > { %v1144_v22 = vsel %vm1142_vm8, %v1111_v19, %v912_v21  ;;  %997 = vrot.lane.b32.xlu0 %v3705_v46, %s3362_s15 }
  0x9c   : > { %v1177_v23 = vsel %vm1175_vm9, %v1144_v22, %v948_v43  ;;  %965 = vrot.lane.b32.xlu1 %v3731_v11, %s3361_s14 }
  0x9d   : > { %v982_v25 = vpop.permute.xlu0 %981  ;;  %v1210_v26 = vsel %vm1208_vm10, %v1177_v23, %v980_v45  ;;  %v678_v45 = vrot.slane %v676_v24, 1 }
  0x9e   : > { %v724_v30 = vpop.permute.xlu1 %723  ;;  %v1243_v34 = vsel %vm1241_vm11, %v1210_v26, %v1012_v61  ;;  %v440_v26 = vshll.u32 %v252_v59, 16 }
  0x9f   : > { %v1047_v36 = vsel %vm1043_vm5, %v3467_v38, %v724_v30  ;;  %1450 = vmatmul.mubr.bf16.vlgmr.msra.gmra.mrb[0].mxu0 %v1243_v34  ;;  %741 = vrot.lane.b32.xlu0 %v660_v42, %s3359_s6  ;;  %v681_v38 = vshll.u32 %v3750_v29, 16  ;;  %v679_v61 = vor.u32 %v678_v45, %v674_v44  ;;  %v524_v34 = vsel %vm3404_vm2, %v432_v57, 0 }
  0xa0   : > { %v1080_v43 = vsel %vm1076_vm6, %v1047_v36, %v837_v47  ;;  %1029 = vrot.lane.b32.xlu1 %v672_v27, %s3363_s22  ;;  %3157 = vmatprep.mubr.msk.bf16.mxu0 %vm1043_vm5, %v3547_v31  ;;  %v3771_v31 = vsel %vm785_vm3, %v819_v40, %v820_v41  ;;  %v822_v40 = vrot.slane %v3735_v18, 1  ;;  %v823_v41 = vrot.slane %v3750_v29, 1 }
  0xa1   : > { %v1113_v49 = vsel %vm1109_vm7, %v1080_v43, %v870_v53  ;;  %v726_v50 = vpop.permute.xlu0 %725  ;;  %v683_v62 = vrot.slane %v681_v38, 1  ;;  %v693_v38 = vshll.u32 %v524_v34, 16 }
  0xa2   : > { %v1146_v42 = vsel %vm1142_vm8, %v1113_v49, %v914_v10  ;;  %v1014_v52 = vpop.permute.xlu1 %1013  ;;  %v1049_v53 = vsel %vm1043_vm5, %v3471_v39, %v726_v50 }
  0xa3   : > { %v1179_v47 = vsel %vm1175_vm9, %v1146_v42, %v950_v5  ;;  %887 = vrot.lane.b32.xlu0 %v3705_v46, %s3360_s11  ;;  %v435_v5 = vor.u32 %v433_v55, %v432_v57  ;;  %v684_v39 = vsel %vm528_vm4, %v679_v61, %v683_v62  ;;  %v254_v42 = vld [vmem:[%s3437_s27 + $0x70] sm:$0xff]   ;;  %v3817_v57 = vsel %vm785_vm3, %v822_v40, %v823_v41 }
  0xa4   : > { %v1212_v60 = vsel %vm1208_vm10, %v1179_v47, %v982_v25  ;;  %854 = vrot.lane.b32.xlu1 %v3731_v11, %s3358_s30  ;;  %v439_v25 = vrot.slane %v437_v16, 7  ;;  %v695_v59 = vrot.slane %v693_v38, 1 }
  0xa5   : > { %v872_v63 = vpop.permute.xlu0 %871  ;;  %v1246_v1 = vsel %vm1241_vm11, %v1212_v60, %v1014_v52  ;;  %v3789_v21 = vsel %vm3404_vm2, 0, %v435_v5 }
  0xa6   : > { %v839_v3 = vpop.permute.xlu1 %838  ;;  %v688_v24 = vshll.u32 %v3789_v21, 16  ;;  %v686_v44 = vshrl.u32 %v3789_v21, 16  ;;  %v442_v49 = vor.u32 %v440_v26, %v439_v25  ;;  %v3832_v62 = vsel %vm3404_vm2, %v439_v25, 0 }
  0xa7   : > { %v1082_v8 = vsel %vm1076_vm6, %v1049_v53, %v839_v3  ;;  %1458 = vmatmul.mubr.bf16.gmra.mrb[4].mxu0 %v1246_v1  ;;  %967 = vrot.lane.b32.xlu0 %v3771_v31, %s3361_s14  ;;  %v444_v3 = vshrl.u32 %v254_v42, 16  ;;  %v447_v26 = vshll.u32 %v254_v42, 16 }
  0xa8   : > { %v1115_v10 = vsel %vm1109_vm7, %v1082_v8, %v872_v63  ;;  %931 = vrot.lane.b32.xlu1 %v672_v27, %s3364_s26  ;;  %3158 = vmatprep.mubr.msk.bf16.mxu0 %vm1043_vm5, %v3573_v51  ;;  %v690_v45 = vrot.slane %v688_v24, 1  ;;  %v826_v8 = vrot.slane %v524_v34, 1 }
  0xa9   : > { %v952_v15 = vpop.permute.xlu0 %951  ;;  %v446_v25 = vrot.slane %v444_v3, 7 }
  0xaa   : > { %v916_v19 = vpop.permute.xlu1 %915  ;;  %v691_v55 = vor.u32 %v690_v45, %v686_v44 }
  0xab   : > { %v1148_v22 = vsel %vm1142_vm8, %v1115_v10, %v916_v19  ;;  %1031 = vrot.lane.b32.xlu0 %v684_v39, %s3363_s22  ;;  %v825_v10 = vrot.slane %v3789_v21, 1  ;;  %v705_v19 = vshll.u32 %v3832_v62, 16 }
  0xac   : > { %999 = vrot.lane.b32.xlu1 %v3735_v18, %s3362_s15  ;;  %v1181_v51 = vsel %vm1175_vm9, %v1148_v22, %v952_v15  ;;  %v696_v61 = vsel %vm528_vm4, %v691_v55, %v695_v59 }
  0xad   : > { %v1016_v23 = vpop.permute.xlu0 %1015  ;;  %v3851_v34 = vsel %vm785_vm3, %v825_v10, %v826_v8 }
  0xae   : > { %v984_v30 = vpop.permute.xlu1 %983 }
  0xaf   : > { %v1214_v35 = vsel %vm1208_vm10, %v1181_v51, %v984_v30  ;;  %856 = vrot.lane.b32.xlu0 %v3771_v31, %s3358_s30  ;;  %v256_v51 = vld [vmem:[%s3437_s27 + $0x78] sm:$0xff]  }
  0xb0   : > { %743 = vrot.lane.b32.xlu1 %v672_v27, %s3359_s6  ;;  %v1249_v36 = vsel %vm1241_vm11, %v1214_v35, %v1016_v23  ;;  %v454_v55 = vshll.u32 %v256_v51, 16 }
  0xb1   : > { %1466 = vmatmul.mubr.bf16.gmra.mrb[8].mxu0 %v1249_v36  ;;  %v841_v43 = vpop.permute.xlu0 %840  ;;  %v707_v36 = vrot.slane %v705_v19, 1 }
  0xb2   : > { %v728_v50 = vpop.permute.xlu1 %727  ;;  %3159 = vmatprep.mubr.msk.bf16.mxu0 %vm1043_vm5, %v3597_v7  ;;  %v3821_v7 = vsel %vm3404_vm2, 0, %v442_v49  ;;  %v451_v49 = vshrl.u32 %v256_v51, 16 }
  0xb3   : > { %v1051_v27 = vsel %vm1043_vm5, %v3497_v58, %v728_v50  ;;  %933 = vrot.lane.b32.xlu0 %v684_v39, %s3364_s26  ;;  %v700_v60 = vshll.u32 %v3821_v7, 16  ;;  %v698_v15 = vshrl.u32 %v3821_v7, 16 }
  0xb4   : > { %v1084_v52 = vsel %vm1076_vm6, %v1051_v27, %v841_v43  ;;  %889 = vrot.lane.b32.xlu1 %v3735_v18, %s3360_s11  ;;  %v449_v43 = vor.u32 %v447_v26, %v446_v25 }
  0xb5   : > { %v918_v29 = vpop.permute.xlu0 %917  ;;  %v702_v16 = vrot.slane %v700_v60, 1 }
  0xb6   : > { %v874_v47 = vpop.permute.xlu1 %873  ;;  %v3863_v27 = vsel %vm3404_vm2, 0, %v449_v43 }
  0xb7   : > { %v1117_v58 = vsel %vm1109_vm7, %v1084_v52, %v874_v47  ;;  %1001 = vrot.lane.b32.xlu0 %v3789_v21, %s3362_s15  ;;  %v703_v35 = vor.u32 %v702_v16, %v698_v15  ;;  %v712_v52 = vshll.u32 %v3863_v27, 16 }
  0xb8   : > { %969 = vrot.lane.b32.xlu1 %v3817_v57, %s3361_s14  ;;  %v1150_v63 = vsel %vm1142_vm8, %v1117_v58, %v918_v29  ;;  %v453_v29 = vrot.slane %v451_v49, 7  ;;  %v526_v58 = vsel %vm3404_vm2, %v446_v25, 0 }
  0xb9   : > { %v986_v53 = vpop.permute.xlu0 %985  ;;  %v708_v45 = vsel %vm528_vm4, %v703_v35, %v707_v36  ;;  %v714_v8 = vrot.slane %v712_v52, 1  ;;  %v717_v10 = vshll.u32 %v526_v58, 16  ;;  %v832_v43 = vrot.slane %v526_v58, 1 }
  0xba   : > { %v954_v1 = vpop.permute.xlu1 %953  ;;  %v456_v15 = vor.u32 %v454_v55, %v453_v29 }
  0xbb   : > { %v1183_v5 = vsel %vm1175_vm9, %v1150_v63, %v954_v1  ;;  %745 = vrot.lane.b32.xlu0 %v684_v39, %s3359_s6  ;;  %v828_v63 = vrot.slane %v3821_v7, 1  ;;  %v829_v1 = vrot.slane %v3832_v62, 1 }
  0xbc   : > { %1033 = vrot.lane.b32.xlu1 %v696_v61, %s3363_s22  ;;  %v1216_v23 = vsel %vm1208_vm10, %v1183_v5, %v986_v53  ;;  %v710_v5 = vshrl.u32 %v3863_v27, 16  ;;  %v3894_v25 = vsel %vm3404_vm2, 0, %v456_v15 }
  0xbd   : > { %v730_v22 = vpop.permute.xlu0 %729  ;;  %v902_v26 = vshll.u32 %v3894_v25, 16 }
  0xbe   : > { %v1018_v24 = vpop.permute.xlu1 %1017  ;;  %v1053_v39 = vsel %vm1043_vm5, %v3528_v17, %v730_v22  ;;  %v3890_v22 = vsel %vm785_vm3, %v828_v63, %v829_v1 }
  0xbf   : > { %v1252_v30 = vsel %vm1241_vm11, %v1216_v23, %v1018_v24  ;;  %891 = vrot.lane.b32.xlu0 %v3789_v21, %s3360_s11  ;;  %v715_v23 = vor.u32 %v714_v8, %v710_v5  ;;  %v719_v24 = vrot.slane %v717_v10, 1 }
  0xc0   : > { %858 = vrot.lane.b32.xlu1 %v3817_v57, %s3358_s30  ;;  %1474 = vmatmul.mubr.bf16.gmra.mrb[12].mxu0 %v1252_v30 }
  0xc1   : > { %v876_v40 = vpop.permute.xlu0 %875  ;;  %3160 = vmatprep.mubr.msk.bf16.mxu0 %vm1043_vm5, %v3623_v28  ;;  %v720_v30 = vsel %vm528_vm4, %v715_v23, %v719_v24 }
  0xc2   : > { %v843_v41 = vpop.permute.xlu1 %842 }
  0xc3   : > { %v1086_v44 = vsel %vm1076_vm6, %v1053_v39, %v843_v41  ;;  %971 = vrot.lane.b32.xlu0 %v3851_v34, %s3361_s14  ;;  %v527_v39 = vsel %vm3404_vm2, %v453_v29, 0  ;;  %v831_v41 = vrot.slane %v3863_v27, 1 }
  0xc4   : > { %v1119_v17 = vsel %vm1109_vm7, %v1086_v44, %v876_v40  ;;  %935 = vrot.lane.b32.xlu1 %v696_v61, %s3364_s26  ;;  %v900_v44 = vshrl.u32 %v3894_v25, 16 }
  0xc5   : > { %v956_v38 = vpop.permute.xlu0 %955  ;;  %v3920_v52 = vsel %vm785_vm3, %v831_v41, %v832_v43 }
  0xc6   : > { %v920_v50 = vpop.permute.xlu1 %919 }
  0xc7   : > { %v1152_v28 = vsel %vm1142_vm8, %v1119_v17, %v920_v50  ;;  %1035 = vrot.lane.b32.xlu0 %v708_v45, %s3363_s22  ;;  %v904_v17 = vrot.slane %v902_v26, 1 }
  0xc8   : > { %1003 = vrot.lane.b32.xlu1 %v3821_v7, %s3362_s15  ;;  %v1185_v59 = vsel %vm1175_vm9, %v1152_v28, %v956_v38  ;;  %v907_v38 = vshll.u32 %v527_v39, 16 }
  0xc9   : > { %v1020_v42 = vpop.permute.xlu0 %1019  ;;  %v905_v29 = vor.u32 %v904_v17, %v900_v44 }
  0xca   : > { %v988_v47 = vpop.permute.xlu1 %987  ;;  %v909_v55 = vrot.slane %v907_v38, 1 }
  0xcb   : > { %v1218_v60 = vsel %vm1208_vm10, %v1185_v59, %v988_v47  ;;  %860 = vrot.lane.b32.xlu0 %v3851_v34, %s3358_s30 }
  0xcc   : > { %747 = vrot.lane.b32.xlu1 %v696_v61, %s3359_s6  ;;  %v1255_v53 = vsel %vm1241_vm11, %v1218_v60, %v1020_v42  ;;  %v910_v60 = vsel %vm528_vm4, %v905_v29, %v909_v55 }
  0xcd   : > { %1482 = vmatmul.mubr.bf16.gmra.mrb[16].mxu0 %v1255_v53  ;;  %v845_v3 = vpop.permute.xlu0 %844 }
  0xce   : > { %v732_v16 = vpop.permute.xlu1 %731  ;;  %3161 = vmatprep.mubr.msk.bf16.mxu0 %vm1043_vm5, %v3647_v48 }
  0xcf   : > { %v1055_v61 = vsel %vm1043_vm5, %v3555_v37, %v732_v16  ;;  %937 = vrot.lane.b32.xlu0 %v708_v45, %s3364_s26  ;;  %v944_v16 = vrot.slane %v3894_v25, 1 }
  0xd0   : > { %v1088_v19 = vsel %vm1076_vm6, %v1055_v61, %v845_v3  ;;  %893 = vrot.lane.b32.xlu1 %v3821_v7, %s3360_s11  ;;  %v945_v61 = vrot.slane %v527_v39, 1 }
  0xd1   : > { %v922_v62 = vpop.permute.xlu0 %921 }
  0xd2   : > { %v878_v48 = vpop.permute.xlu1 %877 }
  0xd3   : > { %v1121_v37 = vsel %vm1109_vm7, %v1088_v19, %v878_v48  ;;  %1005 = vrot.lane.b32.xlu0 %v3863_v27, %s3362_s15  ;;  %v3950_v48 = vsel %vm785_vm3, %v944_v16, %v945_v61 }
  0xd4   : > { %973 = vrot.lane.b32.xlu1 %v3890_v22, %s3361_s14  ;;  %v1154_v35 = vsel %vm1142_vm8, %v1121_v37, %v922_v62 }
  0xd5   : > { %v990_v51 = vpop.permute.xlu0 %989 }
  0xd6   : > { %v958_v36 = vpop.permute.xlu1 %957 }
  0xd7   : > { %v1187_v40 = vsel %vm1175_vm9, %v1154_v35, %v958_v36  ;;  %749 = vrot.lane.b32.xlu0 %v708_v45, %s3359_s6 }
  0xd8   : > { %1037 = vrot.lane.b32.xlu1 %v720_v30, %s3363_s22  ;;  %v1220_v50 = vsel %vm1208_vm10, %v1187_v40, %v990_v51 }
  0xd9   : > { %v734_v49 = vpop.permute.xlu0 %733 }
  0xda   : > { %v1022_v28 = vpop.permute.xlu1 %1021  ;;  %v1057_v45 = vsel %vm1043_vm5, %v3577_v54, %v734_v49 }
  0xdb   : > { %v1258_v42 = vsel %vm1241_vm11, %v1220_v50, %v1022_v28  ;;  %895 = vrot.lane.b32.xlu0 %v3863_v27, %s3360_s11 }
  0xdc   : > { %862 = vrot.lane.b32.xlu1 %v3890_v22, %s3358_s30  ;;  %1490 = vmatmul.mubr.bf16.gmra.mrb[20].mxu0 %v1258_v42 }
  0xdd   : > { %v880_v59 = vpop.permute.xlu0 %879  ;;  %3162 = vmatprep.mubr.msk.bf16.mxu0 %vm1043_vm5, %v3673_v9 }
  0xde   : > { %v847_v47 = vpop.permute.xlu1 %846 }
  0xdf   : > { %v1090_v58 = vsel %vm1076_vm6, %v1057_v45, %v847_v47  ;;  %975 = vrot.lane.b32.xlu0 %v3920_v52, %s3361_s14 }
  0xe0   : > { %v1123_v54 = vsel %vm1109_vm7, %v1090_v58, %v880_v59  ;;  %939 = vrot.lane.b32.xlu1 %v720_v30, %s3364_s26 }
  0xe1   : > { %v960_v53 = vpop.permute.xlu0 %959 }
  0xe2   : > { %v924_v63 = vpop.permute.xlu1 %923 }
  0xe3   : > { %v1156_v1 = vsel %vm1142_vm8, %v1123_v54, %v924_v63  ;;  %1039 = vrot.lane.b32.xlu0 %v910_v60, %s3363_s22 }
  0xe4   : > { %1007 = vrot.lane.b32.xlu1 %v3894_v25, %s3362_s15  ;;  %v1189_v3 = vsel %vm1175_vm9, %v1156_v1, %v960_v53 }
  0xe5   : > { %v1024_v9 = vpop.permute.xlu0 %1023 }
  0xe6   : > { %v992_v5 = vpop.permute.xlu1 %991 }
  0xe7   : > { %v1222_v8 = vsel %vm1208_vm10, %v1189_v3, %v992_v5  ;;  %864 = vrot.lane.b32.xlu0 %v3920_v52, %s3358_s30 }
  0xe8   : > { %751 = vrot.lane.b32.xlu1 %v720_v30, %s3359_s6  ;;  %v1261_v10 = vsel %vm1241_vm11, %v1222_v8, %v1024_v9 }
  0xe9   : > { %1498 = vmatmul.mubr.bf16.gmra.mrb[24].mxu0 %v1261_v10  ;;  %v849_v15 = vpop.permute.xlu0 %848 }
  0xea   : > { %v736_v19 = vpop.permute.xlu1 %735  ;;  %3163 = vmatprep.mubr.msk.bf16.mxu0 %vm1043_vm5, %v3697_v33 }
  0xeb   : > { %v1059_v62 = vsel %vm1043_vm5, %v3605_v14, %v736_v19  ;;  %941 = vrot.lane.b32.xlu0 %v910_v60, %s3364_s26 }
  0xec   : > { %v1092_v23 = vsel %vm1076_vm6, %v1059_v62, %v849_v15  ;;  %897 = vrot.lane.b32.xlu1 %v3894_v25, %s3360_s11 }
  0xed   : > { %v926_v24 = vpop.permute.xlu0 %925 }
  0xee   : > { %v882_v37 = vpop.permute.xlu1 %881 }
  0xef   : > { %v1125_v26 = vsel %vm1109_vm7, %v1092_v23, %v882_v37  ;;  %1009 = vrot.lane.b32.xlu0 %v3415_v4, %s3362_s15 }
  0xf0   : > { %977 = vrot.lane.b32.xlu1 %v3950_v48, %s3361_s14  ;;  %v1158_v33 = vsel %vm1142_vm8, %v1125_v26, %v926_v24 }
  0xf1   : > { %v994_v14 = vpop.permute.xlu0 %993 }
  0xf2   : > { %v962_v51 = vpop.permute.xlu1 %961 }
  0xf3   : > { %v1191_v30 = vsel %vm1175_vm9, %v1158_v33, %v962_v51 }
  0xf4   : > { %1041 = vrot.lane.b32.xlu1 %v3449_v20, %s3363_s22  ;;  %v1224_v39 = vsel %vm1208_vm10, %v1191_v30, %v994_v14 }
  0xf5   : > { %v738_v25 = vpop.permute.xlu0 %737 }
  0xf6   : > { %v1026_v35 = vpop.permute.xlu1 %1025  ;;  %v1061_v4 = vsel %vm1043_vm5, %v3627_v32, %v738_v25 }
  0xf7   : > { %v1264_v36 = vsel %vm1241_vm11, %v1224_v39, %v1026_v35 }
  0xf8   : > { %1506 = vmatmul.mubr.bf16.gmra.mrb[28].mxu0 %v1264_v36 }
  0xf9   : > { %v884_v40 = vpop.permute.xlu0 %883  ;;  %3164 = vmatprep.mubr.msk.bf16.mxu0 %vm1043_vm5, %v3731_v11 }
  0xfa   : > { %v851_v41 = vpop.permute.xlu1 %850 }
  0xfb   : > { %v1094_v43 = vsel %vm1076_vm6, %v1061_v4, %v851_v41 }
  0xfc   : > { %v1127_v44 = vsel %vm1109_vm7, %v1094_v43, %v884_v40 }
  0xfd   : > { %v964_v20 = vpop.permute.xlu0 %963 }
  0xfe   : > { %v928_v17 = vpop.permute.xlu1 %927 }
  0xff   : > { %v1160_v38 = vsel %vm1142_vm8, %v1127_v44, %v928_v17 }
 0x100   : > { %v1193_v50 = vsel %vm1175_vm9, %v1160_v38, %v964_v20 }
 0x101   : > { %v1028_v49 = vpop.permute.xlu0 %1027 }
 0x102   : > { %v996_v28 = vpop.permute.xlu1 %995 }
 0x103   : > { %v1226_v32 = vsel %vm1208_vm10, %v1193_v50, %v996_v28 }
 0x104   : > { %v1267_v42 = vsel %vm1241_vm11, %v1226_v32, %v1028_v49 }
 0x105   : > { %1514 = vmatmul.mubr.bf16.gmra.mrb[32].mxu0 %v1267_v42  ;;  %v853_v45 = vpop.permute.xlu0 %852 }
 0x106   : > { %v740_v11 = vpop.permute.xlu1 %739  ;;  %3165 = vmatprep.mubr.msk.bf16.mxu0 %vm1043_vm5, %v3771_v31 }
 0x107   : > { %v1063_v29 = vsel %vm1043_vm5, %v3655_v56, %v740_v11 }
 0x108   : > { %v1096_v55 = vsel %vm1076_vm6, %v1063_v29, %v853_v45 }
 0x109   : > { %v930_v59 = vpop.permute.xlu0 %929 }
 0x10a   : > { %v886_v47 = vpop.permute.xlu1 %885 }
 0x10b   : > { %v1129_v58 = vsel %vm1109_vm7, %v1096_v55, %v886_v47 }
 0x10c   : > { %v1162_v60 = vsel %vm1142_vm8, %v1129_v58, %v930_v59 }
 0x10d   : > { %v998_v54 = vpop.permute.xlu0 %997 }
 0x10e   : > { %v966_v53 = vpop.permute.xlu1 %965 }
 0x10f   : > { %v1195_v63 = vsel %vm1175_vm9, %v1162_v60, %v966_v53 }
 0x110   : > { %v1228_v9 = vsel %vm1208_vm10, %v1195_v63, %v998_v54 }
 0x111   : > { %v742_v1 = vpop.permute.xlu0 %741 }
 0x112   : > { %v1030_v3 = vpop.permute.xlu1 %1029  ;;  %v1065_v56 = vsel %vm1043_vm5, %v3677_v13, %v742_v1 }
 0x113   : > { %v1270_v31 = vsel %vm1241_vm11, %v1228_v9, %v1030_v3 }
 0x114   : > { %1522 = vmatmul.mubr.bf16.gmra.mrb[36].mxu0 %v1270_v31 }
 0x115   : > { %v888_v5 = vpop.permute.xlu0 %887  ;;  %3166 = vmatprep.mubr.msk.bf16.mxu0 %vm1043_vm5, %v3817_v57 }
 0x116   : > { %v855_v8 = vpop.permute.xlu1 %854 }
 0x117   : > { %v1098_v10 = vsel %vm1076_vm6, %v1065_v56, %v855_v8 }
 0x118   : > { %v1131_v15 = vsel %vm1109_vm7, %v1098_v10, %v888_v5 }
 0x119   : > { %v968_v16 = vpop.permute.xlu0 %967 }
 0x11a   : > { %v932_v61 = vpop.permute.xlu1 %931 }
 0x11b   : > { %v1164_v19 = vsel %vm1142_vm8, %v1131_v15, %v932_v61 }
 0x11c   : > { %v1197_v23 = vsel %vm1175_vm9, %v1164_v19, %v968_v16 }
 0x11d   : > { %v1032_v62 = vpop.permute.xlu0 %1031 }
 0x11e   : > { %v1000_v24 = vpop.permute.xlu1 %999 }
 0x11f   : > { %v1230_v13 = vsel %vm1208_vm10, %v1197_v23, %v1000_v24 }
 0x120   : > { %v1273_v37 = vsel %vm1241_vm11, %v1230_v13, %v1032_v62 }
 0x121   : > { %1530 = vmatmul.mubr.bf16.gmra.mrb[40].mxu0 %v1273_v37  ;;  %v857_v26 = vpop.permute.xlu0 %856 }
 0x122   : > { %v744_v57 = vpop.permute.xlu1 %743  ;;  %3167 = vmatprep.mubr.msk.bf16.mxu0 %vm1043_vm5, %v3851_v34 }
 0x123   : > { %v1067_v14 = vsel %vm1043_vm5, %v3705_v46, %v744_v57 }
 0x124   : > { %v1100_v33 = vsel %vm1076_vm6, %v1067_v14, %v857_v26 }
 0x125   : > { %v934_v51 = vpop.permute.xlu0 %933 }
 0x126   : > { %v890_v30 = vpop.permute.xlu1 %889 }
 0x127   : > { %v1133_v25 = vsel %vm1109_vm7, %v1100_v33, %v890_v30 }
 0x128   : > { %v1166_v35 = vsel %vm1142_vm8, %v1133_v25, %v934_v51  ;;  %v3307_v25 = vld [vmem:[%s4782_s3] sm:$0xff]  }
 0x129   : > { %v1002_v39 = vpop.permute.xlu0 %1001  ;;  %2649 = vmatpush1.bf16.msra.mxu1 %v3307_v25 }
 0x12a   : > { %v970_v36 = vpop.permute.xlu1 %969  ;;  %2650 = vmatprep.subr.bf16.mxu1 %v3357_v0 }
 0x12b   : > { %v1199_v4 = vsel %vm1175_vm9, %v1166_v35, %v970_v36 }
 0x12c   : > { %v1232_v41 = vsel %vm1208_vm10, %v1199_v4, %v1002_v39  ;;  %v3308_v4 = vld [vmem:[%s4782_s3 + $0x8] sm:$0xff]  }
 0x12d   : > { %v746_v40 = vpop.permute.xlu0 %745  ;;  %2651 = vmatpush1.bf16.msra.mxu1 %v3308_v4 }
 0x12e   : > { %v1034_v43 = vpop.permute.xlu1 %1033  ;;  %v1069_v46 = vsel %vm1043_vm5, %v3735_v18, %v746_v40  ;;  %2652 = vmatprep.subr.bf16.mxu1 %v3357_v0 }
 0x12f   : > { %v1276_v34 = vsel %vm1241_vm11, %v1232_v41, %v1034_v43  ;;  %v3309_v41 = vld [vmem:[%s4782_s3 + $0x10] sm:$0xff]   ;;  %v3310_v43 = vld [vmem:[%s4782_s3 + $0x18] sm:$0xff]  }
 0x130   : > { %1538 = vmatmul.mubr.bf16.gmra.mrb[44].mxu0 %v1276_v34  ;;  %v4067_v34 = vld [vmem:[%s4781_s2] ss:$0 sm:$0xff] }
 0x131   : > { %v892_v44 = vpop.permute.xlu0 %891  ;;  %3168 = vmatprep.mubr.msk.bf16.mxu0 %vm1043_vm5, %v3890_v22  ;;  %2653 = vmatpush1.bf16.msra.mxu1 %v3309_v41 }
 0x132   : > { %v859_v20 = vpop.permute.xlu1 %858  ;;  %2654 = vmatprep.subr.bf16.mxu1 %v3357_v0 }
 0x133   : > { %v1102_v17 = vsel %vm1076_vm6, %v1069_v46, %v859_v20 }
 0x134   : > { %v1135_v38 = vsel %vm1109_vm7, %v1102_v17, %v892_v44  ;;  %v3311_v44 = vld [vmem:[%s4782_s3 + $0x20] sm:$0xff]  }
 0x135   : > { %v972_v49 = vpop.permute.xlu0 %971  ;;  %2655 = vmatpush1.bf16.msra.mxu1 %v3310_v43 }
 0x136   : > { %v936_v50 = vpop.permute.xlu1 %935  ;;  %2656 = vmatprep.subr.bf16.mxu1 %v3357_v0 }
 0x137   : > { %v1168_v28 = vsel %vm1142_vm8, %v1135_v38, %v936_v50 }
 0x138   : > { %v1201_v42 = vsel %vm1175_vm9, %v1168_v28, %v972_v49  ;;  %v3312_v28 = vld [vmem:[%s4782_s3 + $0x28] sm:$0xff]  }
 0x139   : > { %v1036_v32 = vpop.permute.xlu0 %1035  ;;  %2657 = vmatpush1.bf16.msra.mxu1 %v3311_v44 }
 0x13a   : > { %v1004_v45 = vpop.permute.xlu1 %1003  ;;  %2658 = vmatprep.subr.bf16.mxu1 %v3357_v0 }
 0x13b   : > { %v1234_v18 = vsel %vm1208_vm10, %v1201_v42, %v1004_v45 }
 0x13c   : > { %v1279_v11 = vsel %vm1241_vm11, %v1234_v18, %v1036_v32 }
 0x13d   : > { %1546 = vmatmul.mubr.bf16.gmra.mrb[48].mxu0 %v1279_v11  ;;  %v861_v29 = vpop.permute.xlu0 %860  ;;  %2659 = vmatpush1.bf16.msra.mxu1 %v3312_v28  ;;  %v3313_v11 = vld [vmem:[%s4782_s3 + $0x30] sm:$0xff]  }
 0x13e   : > { %v748_v22 = vpop.permute.xlu1 %747  ;;  %3169 = vmatprep.mubr.msk.bf16.mxu0 %vm1043_vm5, %v3920_v52  ;;  %2660 = vmatprep.subr.bf16.mxu1 %v3357_v0 }
 0x13f   : > { %v1071_v55 = vsel %vm1043_vm5, %v3789_v21, %v748_v22 }
 0x140   : > { %v1104_v59 = vsel %vm1076_vm6, %v1071_v55, %v861_v29 }
 0x141   : > { %v938_v47 = vpop.permute.xlu0 %937  ;;  %2661 = vmatpush1.bf16.msra.mxu1 %v3313_v11 }
 0x142   : > { %v894_v58 = vpop.permute.xlu1 %893  ;;  %2662 = vmatprep.subr.bf16.mxu1 %v3357_v0 }
 0x143   : > { %v1137_v54 = vsel %vm1109_vm7, %v1104_v59, %v894_v58 }
 0x144   : > { %v1170_v53 = vsel %vm1142_vm8, %v1137_v54, %v938_v47 }
 0x145   : > { %v1006_v60 = vpop.permute.xlu0 %1005 }
 0x146   : > { %v974_v63 = vpop.permute.xlu1 %973 }
 0x147   : > { %v1203_v1 = vsel %vm1175_vm9, %v1170_v53, %v974_v63  ;;  %v3314_v53 = vld [vmem:[%s4782_s3 + $0x38] sm:$0xff]  }
 0x148   : > { %v1236_v3 = vsel %vm1208_vm10, %v1203_v1, %v1006_v60  ;;  %2663 = vmatpush1.bf16.msra.mxu1 %v3314_v53 }
 0x149   : > { %v750_v9 = vpop.permute.xlu0 %749  ;;  %2664 = vmatprep.subr.bf16.mxu1 %v3357_v0 }
 0x14a   : > { %v1038_v31 = vpop.permute.xlu1 %1037  ;;  %v1073_v21 = vsel %vm1043_vm5, %v3821_v7, %v750_v9 }
 0x14b   : > { %v1282_v52 = vsel %vm1241_vm11, %v1236_v3, %v1038_v31 }
 0x14c   : > { %1554 = vmatmul.mubr.bf16.gmra.mrb[52].mxu0 %v1282_v52 }
 0x14d   : > { %v896_v56 = vpop.permute.xlu0 %895  ;;  %3170 = vmatprep.mubr.msk.bf16.mxu0 %vm1043_vm5, %v3950_v48 }
 0x14e   : > { %v863_v5 = vpop.permute.xlu1 %862 }
 0x14f   : > { %v1106_v8 = vsel %vm1076_vm6, %v1073_v21, %v863_v5  ;;  %v3315_v21 = vld [vmem:[%s4782_s3 + $0x40] sm:$0xff]  }
 0x150   : > { %v1139_v10 = vsel %vm1109_vm7, %v1106_v8, %v896_v56  ;;  %2665 = vmatpush1.bf16.msra.mxu1 %v3315_v21 }
 0x151   : > { %v976_v15 = vpop.permute.xlu0 %975 }
 0x152   : > { %v940_v16 = vpop.permute.xlu1 %939 }
 0x153   : > { %v1172_v61 = vsel %vm1142_vm8, %v1139_v10, %v940_v16 }
 0x154   : > { %v1205_v62 = vsel %vm1175_vm9, %v1172_v61, %v976_v15 }
 0x155   : > { %v1040_v19 = vpop.permute.xlu0 %1039 }
 0x156   : > { %v1008_v23 = vpop.permute.xlu1 %1007 }
 0x157   : > { %v1238_v7 = vsel %vm1208_vm10, %v1205_v62, %v1008_v23 }
 0x158   : > { %v1285_v24 = vsel %vm1241_vm11, %v1238_v7, %v1040_v19 }
 0x159   : > { %1562 = vmatmul.mubr.bf16.gmra.mrb[56].mxu0 %v1285_v24  ;;  %v865_v13 = vpop.permute.xlu0 %864 }
 0x15a   : > { %v752_v48 = vpop.permute.xlu1 %751  ;;  %3171 = vmatprep.mubr.msk.bf16.mxu0 %vm1043_vm5, %v3430_v12 }
 0x15b   : > { %v1075_v37 = vsel %vm1043_vm5, %v3863_v27, %v752_v48 }
 0x15c   : > { %v1108_v26 = vsel %vm1076_vm6, %v1075_v37, %v865_v13 }
 0x15d   : > { %v942_v57 = vpop.permute.xlu0 %941 }
 0x15e   : > { %v898_v14 = vpop.permute.xlu1 %897 }
 0x15f   : > { %v1141_v33 = vsel %vm1109_vm7, %v1108_v26, %v898_v14 }
 0x160   : > { %v1174_v51 = vsel %vm1142_vm8, %v1141_v33, %v942_v57 }
 0x161   : > { %v4044_v35 = vpop.permute.xlu0 %1009 }
 0x162   : > { %v978_v30 = vpop.permute.xlu1 %977 }
 0x163   : > { %v1207_v39 = vsel %vm1175_vm9, %v1174_v51, %v978_v30 }
 0x164   : > { %v1240_v27 = vsel %vm1208_vm10, %v1207_v39, %v4044_v35 }
 0x166   : > { %v4049_v36 = vpop.permute.xlu1 %1041 }
 0x167   : > { %v1288_v40 = vsel %vm1241_vm11, %v1240_v27, %v4049_v36 }
 0x168   : > { %1570 = vmatmul.mubr.bf16.gmra.mrb[60].mxu0 %v1288_v40 }
 0x172   : > { %v1451_v46 = vpop.f32.mrb[0].mxu0 }
 0x173   : > { %v1452_v20 = vadd.f32 %v4067_v34, %v1451_v46  ;;  %v1453_v17 = vpop.f32.mrb[1].mxu0 }
 0x174   : > { %v1454_v38 = vpop.f32.mrb[2].mxu0 }
 0x175   : > { %v1455_v49 = vadd.f32 %v4067_v34, %v1454_v38  ;;  %v1456_v50 = vpop.f32.mrb[3].mxu0  ;;  %v1578_v32 = vmax.f32 %v1452_v20, 0.0 }
 0x177   : > { %v1579_v42 = vmax.f32 %v1455_v49, 0.0 }
 0x179   : > { %v1610_v45 = vpack.c.bf16 %v1579_v42, %v1578_v32 }
 0x17a   : > { %v1459_v18 = vpop.f32.mrb[4].mxu0 }
 0x17b   : > { %v1627_v29 = vshrl.u32 %v1610_v45, 16  ;;  %v1460_v22 = vadd.f32 %v4067_v34, %v1459_v18  ;;  %v1461_v55 = vpop.f32.mrb[5].mxu0  ;;  %v1630_v58 = vshll.u32 %v1610_v45, 16 }
 0x17c   : > { %v1462_v59 = vpop.f32.mrb[6].mxu0 }
 0x17d   : > { %v1629_v47 = vrot.slane %v1627_v29, 7  ;;  %v1463_v54 = vadd.f32 %v4067_v34, %v1462_v59  ;;  %v1464_v60 = vpop.f32.mrb[7].mxu0  ;;  %v1580_v9 = vmax.f32 %v1460_v22, 0.0 }
 0x17f   : > { %v1632_v63 = vor.u32 %v1630_v58, %v1629_v47  ;;  %v1786_v1 = vsel %vm3404_vm2, %v1629_v47, 0  ;;  %v1581_v3 = vmax.f32 %v1463_v54, 0.0 }
 0x180   : > { %v2043_v5 = vrot.slane %v1786_v1, 1  ;;  %v1810_v10 = vshll.u32 %v1786_v1, 16 }
 0x181   : > { %v1611_v31 = vpack.c.bf16 %v1581_v3, %v1580_v9  ;;  %v4093_v52 = vsel %vm3404_vm2, 0, %v1632_v63 }
 0x182   : > { %2118 = vrot.lane.b32.xlu0 %v4093_v52, %s3360_s11  ;;  %v2042_v56 = vrot.slane %v4093_v52, 1  ;;  %v1805_v8 = vshll.u32 %v4093_v52, 16  ;;  %v1803_v19 = vshrl.u32 %v4093_v52, 16  ;;  %v1812_v37 = vrot.slane %v1810_v10, 1 }
 0x183   : > { %v1634_v15 = vshrl.u32 %v1611_v31, 16  ;;  %v1637_v23 = vshll.u32 %v1611_v31, 16 }
 0x184   : > { %v1467_v16 = vpop.f32.mrb[8].mxu0  ;;  %v2044_v61 = vsel %vm785_vm3, %v2042_v56, %v2043_v5  ;;  %v1807_v0 = vrot.slane %v1805_v8, 1 }
 0x185   : > { %v1636_v62 = vrot.slane %v1634_v15, 7  ;;  %v1468_v7 = vadd.f32 %v4067_v34, %v1467_v16  ;;  %v1469_v24 = vpop.f32.mrb[9].mxu0 }
 0x186   : > { %2198 = vrot.lane.b32.xlu0 %v2044_v61, %s3361_s14  ;;  %v1470_v13 = vpop.f32.mrb[10].mxu0  ;;  %v1808_v48 = vor.u32 %v1807_v0, %v1803_v19 }
 0x187   : > { %v1639_v26 = vor.u32 %v1637_v23, %v1636_v62  ;;  %v1471_v57 = vadd.f32 %v4067_v34, %v1470_v13  ;;  %v1472_v14 = vpop.f32.mrb[11].mxu0  ;;  %v1787_v33 = vsel %vm3404_vm2, %v1636_v62, 0  ;;  %v1582_v25 = vmax.f32 %v1468_v7, 0.0 }
 0x188   : > { %v1813_v51 = vsel %vm528_vm4, %v1808_v48, %v1812_v37  ;;  %v1822_v27 = vshll.u32 %v1787_v33, 16  ;;  %v2046_v40 = vrot.slane %v1787_v33, 1 }
 0x189   : > { %v4113_v30 = vsel %vm3404_vm2, 0, %v1639_v26  ;;  %v1583_v39 = vmax.f32 %v1471_v57, 0.0  ;;  %2162 = vrot.lane.b32.xlu1 %v1813_v51, %s3364_s26 }
 0x18a   : > { %2087 = vrot.lane.b32.xlu0 %v2044_v61, %s3358_s30  ;;  %v2045_v4 = vrot.slane %v4113_v30, 1  ;;  %v1817_v41 = vshll.u32 %v4113_v30, 16  ;;  %v1815_v44 = vshrl.u32 %v4113_v30, 16  ;;  %v1824_v49 = vrot.slane %v1822_v27, 1 }
 0x18b   : > { %v1612_v43 = vpack.c.bf16 %v1583_v39, %v1582_v25 }
 0x18c   : > { %v2047_v46 = vsel %vm785_vm3, %v2045_v4, %v2046_v40  ;;  %v1819_v20 = vrot.slane %v1817_v41, 1 }
 0x18d   : > { %v1641_v17 = vshrl.u32 %v1612_v43, 16  ;;  %3182 = vmatprep.mubr.msk.bf16.mxu1 %vm1043_vm5, %v2047_v46  ;;  %1982 = vrot.lane.b32.xlu1 %v1813_v51, %s3359_s6  ;;  %v1644_v28 = vshll.u32 %v1612_v43, 16 }
 0x18e   : > { %v1820_v38 = vor.u32 %v1819_v20, %v1815_v44 }
 0x18f   : > { %v1643_v50 = vrot.slane %v1641_v17, 7 }
 0x190   : > { %v1825_v32 = vsel %vm528_vm4, %v1820_v38, %v1824_v49 }
 0x191   : > { %v1646_v42 = vor.u32 %v1644_v28, %v1643_v50  ;;  %2260 = vrot.lane.b32.xlu0 %v1825_v32, %s3363_s22  ;;  %2230 = vrot.lane.b32.xlu1 %v4113_v30, %s3362_s15  ;;  %v1788_v58 = vsel %vm3404_vm2, %v1643_v50, 0 }
 0x192   : > { %v1834_v9 = vshll.u32 %v1788_v58, 16  ;;  %v2049_v23 = vrot.slane %v1788_v58, 1 }
 0x193   : > { %v1475_v45 = vpop.f32.mrb[12].mxu0  ;;  %v4129_v18 = vsel %vm3404_vm2, 0, %v1646_v42 }
 0x194   : > { %v1476_v11 = vadd.f32 %v4067_v34, %v1475_v45  ;;  %v1477_v29 = vpop.f32.mrb[13].mxu0  ;;  %v1829_v22 = vshll.u32 %v4129_v18, 16  ;;  %v1827_v1 = vshrl.u32 %v4129_v18, 16  ;;  %v1836_v5 = vrot.slane %v1834_v9, 1 }
 0x195   : > { %2164 = vrot.lane.b32.xlu0 %v1825_v32, %s3364_s26  ;;  %2120 = vrot.lane.b32.xlu1 %v4113_v30, %s3360_s11  ;;  %v1478_v55 = vpop.f32.mrb[14].mxu0  ;;  %v2048_v16 = vrot.slane %v4129_v18, 1 }
 0x196   : > { %v1479_v59 = vadd.f32 %v4067_v34, %v1478_v55  ;;  %v1480_v47 = vpop.f32.mrb[15].mxu0  ;;  %v1584_v54 = vmax.f32 %v1476_v11, 0.0  ;;  %v1831_v53 = vrot.slane %v1829_v22, 1 }
 0x197   : > { %v4160_v37 = vsel %vm785_vm3, %v2048_v16, %v2049_v23 }
 0x198   : > { %v1585_v60 = vmax.f32 %v1479_v59, 0.0  ;;  %v1832_v31 = vor.u32 %v1831_v53, %v1827_v1 }
 0x199   : > { %1984 = vrot.lane.b32.xlu0 %v1825_v32, %s3359_s6  ;;  %2200 = vrot.lane.b32.xlu1 %v2047_v46, %s3361_s14 }
 0x19a   : > { %v1613_v63 = vpack.c.bf16 %v1585_v60, %v1584_v54  ;;  %v1837_v15 = vsel %vm528_vm4, %v1832_v31, %v1836_v5 }
 0x19c   : > { %v1648_v3 = vshrl.u32 %v1613_v63, 16  ;;  %v1651_v56 = vshll.u32 %v1613_v63, 16 }
 0x19d   : > { %2232 = vrot.lane.b32.xlu0 %v4129_v18, %s3362_s15  ;;  %2089 = vrot.lane.b32.xlu1 %v2047_v46, %s3358_s30 }
 0x19e   : > { %v1650_v21 = vrot.slane %v1648_v3, 7 }
 0x1a0   : > { %v1653_v8 = vor.u32 %v1651_v56, %v1650_v21  ;;  %v1483_v10 = vpop.f32.mrb[16].mxu0  ;;  %v1789_v7 = vsel %vm3404_vm2, %v1650_v21, 0 }
 0x1a1   : > { %v1484_v61 = vadd.f32 %v4067_v34, %v1483_v10  ;;  %2122 = vrot.lane.b32.xlu0 %v4129_v18, %s3360_s11  ;;  %2262 = vrot.lane.b32.xlu1 %v1837_v15, %s3363_s22  ;;  %v1485_v19 = vpop.f32.mrb[17].mxu0  ;;  %v1846_v51 = vshll.u32 %v1789_v7, 16  ;;  %v2052_v45 = vrot.slane %v1789_v7, 1 }
 0x1a2   : > { %v4153_v0 = vsel %vm3404_vm2, 0, %v1653_v8  ;;  %v1486_v62 = vpop.f32.mrb[18].mxu0 }
 0x1a3   : > { %v1487_v24 = vadd.f32 %v4067_v34, %v1486_v62  ;;  %v1488_v13 = vpop.f32.mrb[19].mxu0  ;;  %v1841_v48 = vshll.u32 %v4153_v0, 16  ;;  %v1586_v26 = vmax.f32 %v1484_v61, 0.0  ;;  %v1839_v33 = vshrl.u32 %v4153_v0, 16 }
 0x1a4   : > { %v1848_v4 = vrot.slane %v1846_v51, 1  ;;  %v2051_v49 = vrot.slane %v4153_v0, 1 }
 0x1a5   : > { %v1587_v57 = vmax.f32 %v1487_v24, 0.0  ;;  %2202 = vrot.lane.b32.xlu0 %v4160_v37, %s3361_s14  ;;  %2166 = vrot.lane.b32.xlu1 %v1837_v15, %s3364_s26  ;;  %v1843_v14 = vrot.slane %v1841_v48, 1 }
 0x1a6   : > { %v4187_v55 = vsel %vm785_vm3, %v2051_v49, %v2052_v45 }
 0x1a7   : > { %v1614_v25 = vpack.c.bf16 %v1587_v57, %v1586_v26  ;;  %v1844_v39 = vor.u32 %v1843_v14, %v1839_v33 }
 0x1a9   : > { %v1655_v27 = vshrl.u32 %v1614_v25, 16  ;;  %2091 = vrot.lane.b32.xlu0 %v4160_v37, %s3358_s30  ;;  %1986 = vrot.lane.b32.xlu1 %v1837_v15, %s3359_s6  ;;  %v1658_v41 = vshll.u32 %v1614_v25, 16  ;;  %v1849_v43 = vsel %vm528_vm4, %v1844_v39, %v1848_v4 }
 0x1ab   : > { %v1657_v40 = vrot.slane %v1655_v27, 7 }
 0x1ad   : > { %v1660_v46 = vor.u32 %v1658_v41, %v1657_v40  ;;  %2264 = vrot.lane.b32.xlu0 %v1849_v43, %s3363_s22  ;;  %2234 = vrot.lane.b32.xlu1 %v4153_v0, %s3362_s15  ;;  %v1790_v11 = vsel %vm3404_vm2, %v1657_v40, 0 }
 0x1ae   : > { %v1858_v54 = vshll.u32 %v1790_v11, 16  ;;  %v2055_v16 = vrot.slane %v1790_v11, 1 }
 0x1af   : > { %v1491_v44 = vpop.f32.mrb[20].mxu0  ;;  %v4175_v20 = vsel %vm3404_vm2, 0, %v1660_v46 }
 0x1b0   : > { %v1492_v17 = vadd.f32 %v4067_v34, %v1491_v44  ;;  %v1493_v38 = vpop.f32.mrb[21].mxu0  ;;  %v1853_v50 = vshll.u32 %v4175_v20, 16  ;;  %v1851_v58 = vshrl.u32 %v4175_v20, 16  ;;  %v1860_v9 = vrot.slane %v1858_v54, 1 }
 0x1b1   : > { %2168 = vrot.lane.b32.xlu0 %v1849_v43, %s3364_s26  ;;  %2124 = vrot.lane.b32.xlu1 %v4153_v0, %s3360_s11  ;;  %v1494_v28 = vpop.f32.mrb[22].mxu0  ;;  %v2054_v56 = vrot.slane %v4175_v20, 1 }
 0x1b2   : > { %v1495_v32 = vadd.f32 %v4067_v34, %v1494_v28  ;;  %v1496_v42 = vpop.f32.mrb[23].mxu0  ;;  %v1588_v29 = vmax.f32 %v1492_v17, 0.0  ;;  %v1855_v59 = vrot.slane %v1853_v50, 1 }
 0x1b3   : > { %v4212_v7 = vsel %vm785_vm3, %v2054_v56, %v2055_v16 }
 0x1b4   : > { %v1589_v22 = vmax.f32 %v1495_v32, 0.0  ;;  %v1856_v53 = vor.u32 %v1855_v59, %v1851_v58 }
 0x1b5   : > { %1988 = vrot.lane.b32.xlu0 %v1849_v43, %s3359_s6  ;;  %2204 = vrot.lane.b32.xlu1 %v4187_v55, %s3361_s14 }
 0x1b6   : > { %v1615_v47 = vpack.c.bf16 %v1589_v22, %v1588_v29  ;;  %v1861_v21 = vsel %vm528_vm4, %v1856_v53, %v1860_v9 }
 0x1b8   : > { %v1662_v60 = vshrl.u32 %v1615_v47, 16  ;;  %v1665_v1 = vshll.u32 %v1615_v47, 16 }
 0x1b9   : > { %2236 = vrot.lane.b32.xlu0 %v4175_v20, %s3362_s15  ;;  %2093 = vrot.lane.b32.xlu1 %v4187_v55, %s3358_s30 }
 0x1ba   : > { %v1664_v63 = vrot.slane %v1662_v60, 7 }
 0x1bc   : > { %v1667_v3 = vor.u32 %v1665_v1, %v1664_v63  ;;  %v1499_v31 = vpop.f32.mrb[24].mxu0  ;;  %v1791_v61 = vsel %vm3404_vm2, %v1664_v63, 0 }
 0x1bd   : > { %v1500_v5 = vadd.f32 %v4067_v34, %v1499_v31  ;;  %2126 = vrot.lane.b32.xlu0 %v4175_v20, %s3360_s11  ;;  %2266 = vrot.lane.b32.xlu1 %v1861_v21, %s3363_s22  ;;  %v1501_v8 = vpop.f32.mrb[25].mxu0  ;;  %v1870_v57 = vshll.u32 %v1791_v61, 16  ;;  %v2058_v32 = vrot.slane %v1791_v61, 1 }
 0x1be   : > { %v4205_v10 = vsel %vm3404_vm2, 0, %v1667_v3  ;;  %v1502_v15 = vpop.f32.mrb[26].mxu0 }
 0x1bf   : > { %v1503_v19 = vadd.f32 %v4067_v34, %v1502_v15  ;;  %v1504_v62 = vpop.f32.mrb[27].mxu0  ;;  %v1865_v23 = vshll.u32 %v4205_v10, 16  ;;  %v1590_v24 = vmax.f32 %v1500_v5, 0.0  ;;  %v1863_v26 = vshrl.u32 %v4205_v10, 16 }
 0x1c0   : > { %v1872_v25 = vrot.slane %v1870_v57, 1  ;;  %v2057_v17 = vrot.slane %v4205_v10, 1 }
 0x1c1   : > { %v1591_v13 = vmax.f32 %v1503_v19, 0.0  ;;  %2206 = vrot.lane.b32.xlu0 %v4212_v7, %s3361_s14  ;;  %2170 = vrot.lane.b32.xlu1 %v1861_v21, %s3364_s26  ;;  %v1867_v48 = vrot.slane %v1865_v23, 1 }
 0x1c2   : > { %v4239_v29 = vsel %vm785_vm3, %v2057_v17, %v2058_v32 }
 0x1c3   : > { %v1616_v14 = vpack.c.bf16 %v1591_v13, %v1590_v24  ;;  %v1868_v33 = vor.u32 %v1867_v48, %v1863_v26 }
 0x1c5   : > { %v1669_v51 = vshrl.u32 %v1616_v14, 16  ;;  %2095 = vrot.lane.b32.xlu0 %v4212_v7, %s3358_s30  ;;  %1990 = vrot.lane.b32.xlu1 %v1861_v21, %s3359_s6  ;;  %v1672_v27 = vshll.u32 %v1616_v14, 16  ;;  %v1873_v4 = vsel %vm528_vm4, %v1868_v33, %v1872_v25 }
 0x1c7   : > { %v1671_v39 = vrot.slane %v1669_v51, 7 }
 0x1c9   : > { %v1674_v40 = vor.u32 %v1672_v27, %v1671_v39  ;;  %2268 = vrot.lane.b32.xlu0 %v1873_v4, %s3363_s22  ;;  %2238 = vrot.lane.b32.xlu1 %v4205_v10, %s3362_s15  ;;  %v1792_v42 = vsel %vm3404_vm2, %v1671_v39, 0 }
 0x1ca   : > { %v1882_v58 = vshll.u32 %v1792_v42, 16  ;;  %v2061_v16 = vrot.slane %v1792_v42, 1 }
 0x1cb   : > { %v1507_v41 = vpop.f32.mrb[28].mxu0  ;;  %v4227_v43 = vsel %vm3404_vm2, 0, %v1674_v40 }
 0x1cc   : > { %v1508_v46 = vadd.f32 %v4067_v34, %v1507_v41  ;;  %v1509_v44 = vpop.f32.mrb[29].mxu0  ;;  %v1877_v38 = vshll.u32 %v4227_v43, 16  ;;  %v1875_v47 = vshrl.u32 %v4227_v43, 16  ;;  %v1884_v1 = vrot.slane %v1882_v58, 1 }
 0x1cd   : > { %2172 = vrot.lane.b32.xlu0 %v1873_v4, %s3364_s26  ;;  %2128 = vrot.lane.b32.xlu1 %v4205_v10, %s3360_s11  ;;  %v1510_v49 = vpop.f32.mrb[30].mxu0  ;;  %v2060_v21 = vrot.slane %v4227_v43, 1 }
 0x1ce   : > { %v1511_v50 = vadd.f32 %v4067_v34, %v1510_v49  ;;  %v1512_v28 = vpop.f32.mrb[31].mxu0  ;;  %v1592_v45 = vmax.f32 %v1508_v46, 0.0  ;;  %v1879_v22 = vrot.slane %v1877_v38, 1 }
 0x1cf   : > { %v4264_v24 = vsel %vm785_vm3, %v2060_v21, %v2061_v16 }
 0x1d0   : > { %v1593_v11 = vmax.f32 %v1511_v50, 0.0  ;;  %v1880_v60 = vor.u32 %v1879_v22, %v1875_v47 }
 0x1d1   : > { %1992 = vrot.lane.b32.xlu0 %v1873_v4, %s3359_s6  ;;  %2208 = vrot.lane.b32.xlu1 %v4239_v29, %s3361_s14 }
 0x1d2   : > { %v1617_v59 = vpack.c.bf16 %v1593_v11, %v1592_v45  ;;  %v1885_v31 = vsel %vm528_vm4, %v1880_v60, %v1884_v1 }
 0x1d4   : > { %v1676_v54 = vshrl.u32 %v1617_v59, 16  ;;  %v1679_v63 = vshll.u32 %v1617_v59, 16 }
 0x1d5   : > { %2240 = vrot.lane.b32.xlu0 %v4227_v43, %s3362_s15  ;;  %2097 = vrot.lane.b32.xlu1 %v4239_v29, %s3358_s30 }
 0x1d6   : > { %v1678_v53 = vrot.slane %v1676_v54, 7 }
 0x1d8   : > { %v1681_v9 = vor.u32 %v1679_v63, %v1678_v53  ;;  %v1515_v3 = vpop.f32.mrb[32].mxu0  ;;  %v1793_v61 = vsel %vm3404_vm2, %v1678_v53, 0 }
 0x1d9   : > { %v1516_v56 = vadd.f32 %v4067_v34, %v1515_v3  ;;  %2130 = vrot.lane.b32.xlu0 %v4227_v43, %s3360_s11  ;;  %2270 = vrot.lane.b32.xlu1 %v1885_v31, %s3363_s22  ;;  %v1517_v5 = vpop.f32.mrb[33].mxu0  ;;  %v1894_v14 = vshll.u32 %v1793_v61, 16  ;;  %v2064_v45 = vrot.slane %v1793_v61, 1 }
 0x1da   : > { %v4257_v8 = vsel %vm3404_vm2, 0, %v1681_v9  ;;  %v1518_v15 = vpop.f32.mrb[34].mxu0 }
 0x1db   : > { %v1519_v19 = vadd.f32 %v4067_v34, %v1518_v15  ;;  %v1520_v62 = vpop.f32.mrb[35].mxu0  ;;  %v1889_v23 = vshll.u32 %v4257_v8, 16  ;;  %v1594_v13 = vmax.f32 %v1516_v56, 0.0  ;;  %v1887_v57 = vshrl.u32 %v4257_v8, 16 }
 0x1dc   : > { %v1896_v39 = vrot.slane %v1894_v14, 1  ;;  %v2063_v49 = vrot.slane %v4257_v8, 1 }
 0x1dd   : > { %v1595_v48 = vmax.f32 %v1519_v19, 0.0  ;;  %2210 = vrot.lane.b32.xlu0 %v4264_v24, %s3361_s14  ;;  %2174 = vrot.lane.b32.xlu1 %v1885_v31, %s3364_s26  ;;  %v1891_v26 = vrot.slane %v1889_v23, 1 }
 0x1de   : > { %v4291_v47 = vsel %vm785_vm3, %v2063_v49, %v2064_v45 }
 0x1df   : > { %v1618_v33 = vpack.c.bf16 %v1595_v48, %v1594_v13  ;;  %v1892_v51 = vor.u32 %v1891_v26, %v1887_v57 }
 0x1e1   : > { %v1683_v25 = vshrl.u32 %v1618_v33, 16  ;;  %2099 = vrot.lane.b32.xlu0 %v4264_v24, %s3358_s30  ;;  %1994 = vrot.lane.b32.xlu1 %v1885_v31, %s3359_s6  ;;  %v1686_v4 = vshll.u32 %v1618_v33, 16  ;;  %v1897_v40 = vsel %vm528_vm4, %v1892_v51, %v1896_v39 }
 0x1e3   : > { %v1685_v27 = vrot.slane %v1683_v25, 7 }
 0x1e5   : > { %v1688_v41 = vor.u32 %v1686_v4, %v1685_v27  ;;  %2272 = vrot.lane.b32.xlu0 %v1897_v40, %s3363_s22  ;;  %2242 = vrot.lane.b32.xlu1 %v4257_v8, %s3362_s15  ;;  %v1794_v11 = vsel %vm3404_vm2, %v1685_v27, 0 }
 0x1e6   : > { %v1906_v53 = vshll.u32 %v1794_v11, 16  ;;  %v2067_v13 = vrot.slane %v1794_v11, 1 }
 0x1e7   : > { %v1523_v46 = vpop.f32.mrb[36].mxu0  ;;  %v4279_v44 = vsel %vm3404_vm2, 0, %v1688_v41 }
 0x1e8   : > { %v1524_v17 = vadd.f32 %v4067_v34, %v1523_v46  ;;  %v1525_v38 = vpop.f32.mrb[37].mxu0  ;;  %v1901_v50 = vshll.u32 %v4279_v44, 16  ;;  %v1899_v60 = vshrl.u32 %v4279_v44, 16  ;;  %v1908_v31 = vrot.slane %v1906_v53, 1 }
 0x1e9   : > { %2176 = vrot.lane.b32.xlu0 %v1897_v40, %s3364_s26  ;;  %2132 = vrot.lane.b32.xlu1 %v4257_v8, %s3360_s11  ;;  %v1526_v28 = vpop.f32.mrb[38].mxu0  ;;  %v2066_v16 = vrot.slane %v4279_v44, 1 }
 0x1ea   : > { %v1527_v32 = vadd.f32 %v4067_v34, %v1526_v28  ;;  %v1528_v42 = vpop.f32.mrb[39].mxu0  ;;  %v1596_v22 = vmax.f32 %v1524_v17, 0.0  ;;  %v1903_v58 = vrot.slane %v1901_v50, 1 }
 0x1eb   : > { %v4316_v33 = vsel %vm785_vm3, %v2066_v16, %v2067_v13 }
 0x1ec   : > { %v1597_v59 = vmax.f32 %v1527_v32, 0.0  ;;  %v1904_v1 = vor.u32 %v1903_v58, %v1899_v60 }
 0x1ed   : > { %1996 = vrot.lane.b32.xlu0 %v1897_v40, %s3359_s6  ;;  %2212 = vrot.lane.b32.xlu1 %v4291_v47, %s3361_s14 }
 0x1ee   : > { %v1619_v54 = vpack.c.bf16 %v1597_v59, %v1596_v22  ;;  %v1909_v15 = vsel %vm528_vm4, %v1904_v1, %v1908_v31 }
 0x1f0   : > { %v1690_v63 = vshrl.u32 %v1619_v54, 16  ;;  %v1693_v3 = vshll.u32 %v1619_v54, 16 }
 0x1f1   : > { %2244 = vrot.lane.b32.xlu0 %v4279_v44, %s3362_s15  ;;  %2101 = vrot.lane.b32.xlu1 %v4291_v47, %s3358_s30 }
 0x1f2   : > { %v1692_v9 = vrot.slane %v1690_v63, 7 }
 0x1f4   : > { %v1695_v21 = vor.u32 %v1693_v3, %v1692_v9  ;;  %v2119_v56 = vpop.permute.xlu0 %2118  ;;  %v1531_v5 = vpop.f32.mrb[40].mxu0  ;;  %v1795_v48 = vsel %vm3404_vm2, %v1692_v9, 0 }
 0x1f5   : > { %v1532_v61 = vadd.f32 %v4067_v34, %v1531_v5  ;;  %2134 = vrot.lane.b32.xlu0 %v4279_v44, %s3360_s11  ;;  %2274 = vrot.lane.b32.xlu1 %v1909_v15, %s3363_s22  ;;  %v1533_v19 = vpop.f32.mrb[41].mxu0  ;;  %v1918_v40 = vshll.u32 %v1795_v48, 16  ;;  %v2351_v45 = vsel %vm1109_vm7, %v3724_v6, %v2119_v56  ;;  %v2070_v16 = vrot.slane %v1795_v48, 1 }
 0x1f6   : > { %v4309_v62 = vsel %vm3404_vm2, 0, %v1695_v21  ;;  %v1534_v23 = vpop.f32.mrb[42].mxu0 }
 0x1f7   : > { %v1535_v26 = vadd.f32 %v4067_v34, %v1534_v23  ;;  %v1536_v57 = vpop.f32.mrb[43].mxu0  ;;  %v1913_v14 = vshll.u32 %v4309_v62, 16  ;;  %v1598_v51 = vmax.f32 %v1532_v61, 0.0  ;;  %v1911_v4 = vshrl.u32 %v4309_v62, 16 }
 0x1f8   : > { %v2199_v39 = vpop.permute.xlu0 %2198  ;;  %v1920_v49 = vrot.slane %v1918_v40, 1  ;;  %v2069_v9 = vrot.slane %v4309_v62, 1 }
 0x1f9   : > { %v1599_v25 = vmax.f32 %v1535_v26, 0.0  ;;  %2214 = vrot.lane.b32.xlu0 %v4316_v33, %s3361_s14  ;;  %2178 = vrot.lane.b32.xlu1 %v1909_v15, %s3364_s26  ;;  %v1915_v27 = vrot.slane %v1913_v14, 1 }
 0x1fa   : > { %v4351_v57 = vsel %vm785_vm3, %v2069_v9, %v2070_v16 }
 0x1fb   : > { %v1620_v41 = vpack.c.bf16 %v1599_v25, %v1598_v51  ;;  %v2163_v46 = vpop.permute.xlu1 %2162  ;;  %v1916_v17 = vor.u32 %v1915_v27, %v1911_v4 }
 0x1fc   : > { %v2088_v32 = vpop.permute.xlu0 %2087  ;;  %v2383_v59 = vsel %vm1142_vm8, %v2351_v45, %v2163_v46 }
 0x1fd   : > { %v1697_v38 = vshrl.u32 %v1620_v41, 16  ;;  %2103 = vrot.lane.b32.xlu0 %v4316_v33, %s3358_s30  ;;  %1998 = vrot.lane.b32.xlu1 %v1909_v15, %s3359_s6  ;;  %v1700_v28 = vshll.u32 %v1620_v41, 16  ;;  %v1921_v11 = vsel %vm528_vm4, %v1916_v17, %v1920_v49  ;;  %v2415_v6 = vsel %vm1175_vm9, %v2383_v59, %v2199_v39 }
 0x1ff   : > { %v1699_v50 = vrot.slane %v1697_v38, 7  ;;  %v1983_v42 = vpop.permute.xlu1 %1982 }
 0x200   : > { %v2291_v39 = vsel %vm1043_vm5, %v4093_v52, %v1983_v42 }
 0x201   : > { %v1702_v22 = vor.u32 %v1700_v28, %v1699_v50  ;;  %2276 = vrot.lane.b32.xlu0 %v1921_v11, %s3363_s22  ;;  %2246 = vrot.lane.b32.xlu1 %v4309_v62, %s3362_s15  ;;  %v1796_v61 = vsel %vm3404_vm2, %v1699_v50, 0  ;;  %v2321_v17 = vsel %vm1076_vm6, %v2291_v39, %v2088_v32 }
 0x202   : > { %v1930_v25 = vshll.u32 %v1796_v61, 16 }
 0x203   : > { %v2261_v58 = vpop.permute.xlu0 %2260  ;;  %v1539_v54 = vpop.f32.mrb[44].mxu0  ;;  %v4334_v60 = vsel %vm3404_vm2, 0, %v1702_v22 }
 0x204   : > { %v1540_v53 = vadd.f32 %v4067_v34, %v1539_v54  ;;  %v2231_v63 = vpop.permute.xlu1 %2230  ;;  %v1541_v1 = vpop.f32.mrb[45].mxu0  ;;  %v1925_v3 = vshll.u32 %v4334_v60, 16  ;;  %v1923_v51 = vshrl.u32 %v4334_v60, 16  ;;  %v1932_v38 = vrot.slane %v1930_v25, 1 }
 0x205   : > { %v2447_v31 = vsel %vm1208_vm10, %v2415_v6, %v2231_v63  ;;  %2180 = vrot.lane.b32.xlu0 %v1921_v11, %s3364_s26  ;;  %2136 = vrot.lane.b32.xlu1 %v4309_v62, %s3360_s11  ;;  %v1542_v21 = vpop.f32.mrb[46].mxu0 }
 0x206   : > { %v1543_v56 = vadd.f32 %v4067_v34, %v1542_v21  ;;  %v1544_v5 = vpop.f32.mrb[47].mxu0  ;;  %v2478_v15 = vsel %vm1241_vm11, %v2447_v31, %v2261_v58  ;;  %v1600_v23 = vmax.f32 %v1540_v53, 0.0  ;;  %v1927_v14 = vrot.slane %v1925_v3, 1 }
 0x207   : > { %2681 = vmatmul.mubr.bf16.vlgmr.msra.gmra.mrb[0].mxu1 %v2478_v15  ;;  %v2165_v19 = vpop.permute.xlu0 %2164  ;;  %v2073_v53 = vrot.slane %v1796_v61, 1 }
 0x208   : > { %v1601_v13 = vmax.f32 %v1543_v56, 0.0  ;;  %3183 = vmatprep.mubr.msk.bf16.mxu1 %vm1043_vm5, %v4160_v37  ;;  %v2121_v26 = vpop.permute.xlu1 %2120  ;;  %v1928_v40 = vor.u32 %v1927_v14, %v1923_v51 }
 0x209   : > { %2000 = vrot.lane.b32.xlu0 %v1921_v11, %s3359_s6  ;;  %2216 = vrot.lane.b32.xlu1 %v4351_v57, %s3361_s14  ;;  %v2353_v49 = vsel %vm1109_vm7, %v2321_v17, %v2121_v26  ;;  %v2072_v11 = vrot.slane %v4334_v60, 1 }
 0x20a   : > { %v1621_v48 = vpack.c.bf16 %v1601_v13, %v1600_v23  ;;  %v1933_v45 = vsel %vm528_vm4, %v1928_v40, %v1932_v38  ;;  %v2385_v58 = vsel %vm1142_vm8, %v2353_v49, %v2165_v19 }
 0x20b   : > { %v1985_v27 = vpop.permute.xlu0 %1984  ;;  %v4385_v5 = vsel %vm785_vm3, %v2072_v11, %v2073_v53 }
 0x20c   : > { %v1704_v4 = vshrl.u32 %v1621_v48, 16  ;;  %v2201_v37 = vpop.permute.xlu1 %2200  ;;  %v1707_v46 = vshll.u32 %v1621_v48, 16  ;;  %v2293_v39 = vsel %vm1043_vm5, %v4113_v30, %v1985_v27 }
 0x20d   : > { %2248 = vrot.lane.b32.xlu0 %v4334_v60, %s3362_s15  ;;  %2105 = vrot.lane.b32.xlu1 %v4351_v57, %s3358_s30  ;;  %v2417_v63 = vsel %vm1175_vm9, %v2385_v58, %v2201_v37 }
 0x20e   : > { %v1706_v41 = vrot.slane %v1704_v4, 7 }
 0x20f   : > { %v2233_v50 = vpop.permute.xlu0 %2232 }
 0x210   : > { %v1709_v28 = vor.u32 %v1707_v46, %v1706_v41  ;;  %v2090_v52 = vpop.permute.xlu1 %2089  ;;  %v1547_v42 = vpop.f32.mrb[48].mxu0  ;;  %v4378_v6 = vsel %vm3404_vm2, %v1706_v41, 0  ;;  %v2449_v21 = vsel %vm1208_vm10, %v2417_v63, %v2233_v50 }
 0x211   : > { %v1548_v22 = vadd.f32 %v4067_v34, %v1547_v42  ;;  %2138 = vrot.lane.b32.xlu0 %v4334_v60, %s3360_s11  ;;  %2278 = vrot.lane.b32.xlu1 %v1933_v45, %s3363_s22  ;;  %v1549_v59 = vpop.f32.mrb[49].mxu0  ;;  %v1942_v13 = vshll.u32 %v4378_v6, 16  ;;  %v2323_v37 = vsel %vm1076_vm6, %v2293_v39, %v2090_v52 }
 0x212   : > { %v4373_v32 = vsel %vm3404_vm2, 0, %v1709_v28  ;;  %v1550_v54 = vpop.f32.mrb[50].mxu0 }
 0x213   : > { %v1551_v1 = vadd.f32 %v4067_v34, %v1550_v54  ;;  %v2123_v9 = vpop.permute.xlu0 %2122  ;;  %v1552_v3 = vpop.f32.mrb[51].mxu0  ;;  %v1937_v31 = vshll.u32 %v4373_v32, 16  ;;  %v1602_v15 = vmax.f32 %v1548_v22, 0.0  ;;  %v1935_v23 = vshrl.u32 %v4373_v32, 16 }
 0x214   : > { %v2263_v56 = vpop.permute.xlu1 %2262  ;;  %v1944_v4 = vrot.slane %v1942_v13, 1  ;;  %v2075_v22 = vrot.slane %v4373_v32, 1 }
 0x215   : > { %v1603_v16 = vmax.f32 %v1551_v1, 0.0  ;;  %2218 = vrot.lane.b32.xlu0 %v4385_v5, %s3361_s14  ;;  %2182 = vrot.lane.b32.xlu1 %v1933_v45, %s3364_s26  ;;  %v2481_v61 = vsel %vm1241_vm11, %v2449_v21, %v2263_v56  ;;  %v1939_v19 = vrot.slane %v1937_v31, 1 }
 0x216   : > { %2689 = vmatmul.mubr.bf16.gmra.mrb[4].mxu1 %v2481_v61 }
 0x217   : > { %v1622_v26 = vpack.c.bf16 %v1603_v16, %v1602_v15  ;;  %3184 = vmatprep.mubr.msk.bf16.mxu1 %vm1043_vm5, %v4187_v55  ;;  %v2203_v14 = vpop.permute.xlu0 %2202  ;;  %v1940_v51 = vor.u32 %v1939_v19, %v1935_v23  ;;  %v2355_v55 = vsel %vm1109_vm7, %v2323_v37, %v2123_v9  ;;  %v2076_v9 = vrot.slane %v4378_v6, 1 }
 0x218   : > { %v2167_v48 = vpop.permute.xlu1 %2166 }
 0x219   : > { %v1711_v25 = vshrl.u32 %v1622_v26, 16  ;;  %2107 = vrot.lane.b32.xlu0 %v4385_v5, %s3358_s30  ;;  %2002 = vrot.lane.b32.xlu1 %v1933_v45, %s3359_s6  ;;  %v1714_v41 = vshll.u32 %v1622_v26, 16  ;;  %v1945_v38 = vsel %vm528_vm4, %v1940_v51, %v1944_v4  ;;  %v2387_v50 = vsel %vm1142_vm8, %v2355_v55, %v2167_v48 }
 0x21a   : > { %v2419_v42 = vsel %vm1175_vm9, %v2387_v50, %v2203_v14  ;;  %v4427_v16 = vsel %vm785_vm3, %v2075_v22, %v2076_v9 }
 0x21b   : > { %v1713_v40 = vrot.slane %v1711_v25, 7  ;;  %v2092_v46 = vpop.permute.xlu0 %2091 }
 0x21c   : > { %v1987_v17 = vpop.permute.xlu1 %1986 }
 0x21d   : > { %v1716_v49 = vor.u32 %v1714_v41, %v1713_v40  ;;  %2280 = vrot.lane.b32.xlu0 %v1945_v38, %s3363_s22  ;;  %2250 = vrot.lane.b32.xlu1 %v4373_v32, %s3362_s15  ;;  %v1798_v3 = vsel %vm3404_vm2, %v1713_v40, 0  ;;  %v2295_v13 = vsel %vm1043_vm5, %v4129_v18, %v1987_v17 }
 0x21e   : > { %v1954_v23 = vshll.u32 %v1798_v3, 16  ;;  %v2325_v39 = vsel %vm1076_vm6, %v2295_v13, %v2092_v46 }
 0x21f   : > { %v2265_v30 = vpop.permute.xlu0 %2264  ;;  %v1555_v27 = vpop.f32.mrb[52].mxu0  ;;  %v4409_v28 = vsel %vm3404_vm2, 0, %v1716_v49 }
 0x220   : > { %v1556_v52 = vadd.f32 %v4067_v34, %v1555_v27  ;;  %v2235_v45 = vpop.permute.xlu1 %2234  ;;  %v1557_v11 = vpop.f32.mrb[53].mxu0  ;;  %v1949_v59 = vshll.u32 %v4409_v28, 16  ;;  %v1947_v19 = vshrl.u32 %v4409_v28, 16  ;;  %v1956_v4 = vrot.slane %v1954_v23, 1 }
 0x221   : > { %v2451_v58 = vsel %vm1208_vm10, %v2419_v42, %v2235_v45  ;;  %2184 = vrot.lane.b32.xlu0 %v1945_v38, %s3364_s26  ;;  %2140 = vrot.lane.b32.xlu1 %v4373_v32, %s3360_s11  ;;  %v1558_v54 = vpop.f32.mrb[54].mxu0 }
 0x222   : > { %v1559_v53 = vadd.f32 %v4067_v34, %v1558_v54  ;;  %v1560_v63 = vpop.f32.mrb[55].mxu0  ;;  %v2484_v1 = vsel %vm1241_vm11, %v2451_v58, %v2265_v30  ;;  %v1604_v21 = vmax.f32 %v1556_v52, 0.0  ;;  %v1951_v61 = vrot.slane %v1949_v59, 1 }
 0x223   : > { %2697 = vmatmul.mubr.bf16.gmra.mrb[8].mxu1 %v2484_v1  ;;  %v2169_v31 = vpop.permute.xlu0 %2168  ;;  %v2079_v52 = vrot.slane %v1798_v3, 1 }
 0x224   : > { %v1605_v56 = vmax.f32 %v1559_v53, 0.0  ;;  %3185 = vmatprep.mubr.msk.bf16.mxu1 %vm1043_vm5, %v4212_v7  ;;  %v2125_v15 = vpop.permute.xlu1 %2124  ;;  %v1952_v48 = vor.u32 %v1951_v61, %v1947_v19 }
 0x225   : > { %2004 = vrot.lane.b32.xlu0 %v1945_v38, %s3359_s6  ;;  %2220 = vrot.lane.b32.xlu1 %v4427_v16, %s3361_s14  ;;  %v2357_v37 = vsel %vm1109_vm7, %v2325_v39, %v2125_v15  ;;  %v2078_v38 = vrot.slane %v4409_v28, 1 }
 0x226   : > { %v1623_v6 = vpack.c.bf16 %v1605_v56, %v1604_v21  ;;  %v1957_v17 = vsel %vm528_vm4, %v1952_v48, %v1956_v4  ;;  %v2389_v30 = vsel %vm1142_vm8, %v2357_v37, %v2169_v31 }
 0x227   : > { %v1989_v26 = vpop.permute.xlu0 %1988  ;;  %v4461_v63 = vsel %vm785_vm3, %v2078_v38, %v2079_v52 }
 0x228   : > { %v1718_v14 = vshrl.u32 %v1623_v6, 16  ;;  %v2205_v7 = vpop.permute.xlu1 %2204  ;;  %v1721_v25 = vshll.u32 %v1623_v6, 16  ;;  %v2297_v23 = vsel %vm1043_vm5, %v4153_v0, %v1989_v26 }
 0x229   : > { %2252 = vrot.lane.b32.xlu0 %v4409_v28, %s3362_s15  ;;  %2109 = vrot.lane.b32.xlu1 %v4427_v16, %s3358_s30  ;;  %v2421_v45 = vsel %vm1175_vm9, %v2389_v30, %v2205_v7 }
 0x22a   : > { %v1720_v51 = vrot.slane %v1718_v14, 7 }
 0x22b   : > { %v2237_v40 = vpop.permute.xlu0 %2236 }
 0x22c   : > { %v1723_v41 = vor.u32 %v1721_v25, %v1720_v51  ;;  %v2094_v18 = vpop.permute.xlu1 %2093  ;;  %v1563_v55 = vpop.f32.mrb[56].mxu0  ;;  %v4454_v42 = vsel %vm3404_vm2, %v1720_v51, 0  ;;  %v2453_v54 = vsel %vm1208_vm10, %v2421_v45, %v2237_v40 }
 0x22d   : > { %v1564_v49 = vadd.f32 %v4067_v34, %v1563_v55  ;;  %2142 = vrot.lane.b32.xlu0 %v4409_v28, %s3360_s11  ;;  %2282 = vrot.lane.b32.xlu1 %v1957_v17, %s3363_s22  ;;  %v1565_v50 = vpop.f32.mrb[57].mxu0  ;;  %v1966_v21 = vshll.u32 %v4454_v42, 16  ;;  %v2327_v14 = vsel %vm1076_vm6, %v2297_v23, %v2094_v18 }
 0x22e   : > { %v4449_v46 = vsel %vm3404_vm2, 0, %v1723_v41  ;;  %v1566_v27 = vpop.f32.mrb[58].mxu0  ;;  %v3332_v41 = vld [vmem:[%s4781_s2] ss:$0 sm:$0xff] }
 0x22f   : > { %v1567_v11 = vadd.f32 %v4067_v34, %v1566_v27  ;;  %v2127_v22 = vpop.permute.xlu0 %2126  ;;  %v1568_v59 = vpop.f32.mrb[59].mxu0  ;;  %v1961_v58 = vshll.u32 %v4449_v46, 16  ;;  %v1606_v1 = vmax.f32 %v1564_v49, 0.0  ;;  %v1959_v31 = vshrl.u32 %v4449_v46, 16 }
 0x230   : > { %v2267_v53 = vpop.permute.xlu1 %2266  ;;  %v1968_v13 = vrot.slane %v1966_v21, 1  ;;  %v2081_v49 = vrot.slane %v4449_v46, 1 }
 0x231   : > { %v1607_v9 = vmax.f32 %v1567_v11, 0.0  ;;  %2222 = vrot.lane.b32.xlu0 %v4461_v63, %s3361_s14  ;;  %2186 = vrot.lane.b32.xlu1 %v1957_v17, %s3364_s26  ;;  %v2487_v3 = vsel %vm1241_vm11, %v2453_v54, %v2267_v53  ;;  %v1963_v34 = vrot.slane %v1961_v58, 1 }
 0x232   : > { %2705 = vmatmul.mubr.bf16.gmra.mrb[12].mxu1 %v2487_v3 }
 0x233   : > { %v1624_v56 = vpack.c.bf16 %v1607_v9, %v1606_v1  ;;  %3186 = vmatprep.mubr.msk.bf16.mxu1 %vm1043_vm5, %v4239_v29  ;;  %v2207_v15 = vpop.permute.xlu0 %2206  ;;  %v1964_v6 = vor.u32 %v1963_v34, %v1959_v31  ;;  %v2359_v29 = vsel %vm1109_vm7, %v2327_v14, %v2127_v22  ;;  %v2082_v22 = vrot.slane %v4454_v42, 1 }
 0x234   : > { %v2171_v61 = vpop.permute.xlu1 %2170 }
 0x235   : > { %v1725_v19 = vshrl.u32 %v1624_v56, 16  ;;  %2111 = vrot.lane.b32.xlu0 %v4461_v63, %s3358_s30  ;;  %2006 = vrot.lane.b32.xlu1 %v1957_v17, %s3359_s6  ;;  %v1728_v48 = vshll.u32 %v1624_v56, 16  ;;  %v1969_v39 = vsel %vm528_vm4, %v1964_v6, %v1968_v13  ;;  %v2391_v37 = vsel %vm1142_vm8, %v2359_v29, %v2171_v61 }
 0x236   : > { %v2423_v55 = vsel %vm1175_vm9, %v2391_v37, %v2207_v15  ;;  %v4504_v9 = vsel %vm785_vm3, %v2081_v49, %v2082_v22 }
 0x237   : > { %v1727_v7 = vrot.slane %v1725_v19, 7  ;;  %v2096_v51 = vpop.permute.xlu0 %2095 }
 0x238   : > { %v1991_v25 = vpop.permute.xlu1 %1990 }
 0x239   : > { %v1730_v4 = vor.u32 %v1728_v48, %v1727_v7  ;;  %2284 = vrot.lane.b32.xlu0 %v1969_v39, %s3363_s22  ;;  %2254 = vrot.lane.b32.xlu1 %v4449_v46, %s3362_s15  ;;  %v1800_v59 = vsel %vm3404_vm2, %v1727_v7, 0  ;;  %v2299_v21 = vsel %vm1043_vm5, %v4175_v20, %v1991_v25 }
 0x23a   : > { %v1978_v31 = vshll.u32 %v1800_v59, 16  ;;  %v2329_v23 = vsel %vm1076_vm6, %v2299_v21, %v2096_v51  ;;  %v2085_v37 = vrot.slane %v1800_v59, 1 }
 0x23b   : > { %v2269_v0 = vpop.permute.xlu0 %2268  ;;  %v1571_v26 = vpop.f32.mrb[60].mxu0  ;;  %v4485_v40 = vsel %vm3404_vm2, 0, %v1730_v4 }
 0x23c   : > { %v1572_v18 = vadd.f32 %v3332_v41, %v1571_v26  ;;  %v2239_v17 = vpop.permute.xlu1 %2238  ;;  %v1573_v38 = vpop.f32.mrb[61].mxu0  ;;  %v1973_v50 = vshll.u32 %v4485_v40, 16  ;;  %v1971_v34 = vshrl.u32 %v4485_v40, 16  ;;  %v1980_v13 = vrot.slane %v1978_v31, 1 }
 0x23d   : > { %v2455_v30 = vsel %vm1208_vm10, %v2423_v55, %v2239_v17  ;;  %2188 = vrot.lane.b32.xlu0 %v1969_v39, %s3364_s26  ;;  %2144 = vrot.lane.b32.xlu1 %v4449_v46, %s3360_s11  ;;  %v1574_v27 = vpop.f32.mrb[62].mxu0 }
 0x23e   : > { %v1575_v52 = vadd.f32 %v3332_v41, %v1574_v27  ;;  %v1576_v45 = vpop.f32.mrb[63].mxu0  ;;  %v2490_v11 = vsel %vm1241_vm11, %v2455_v30, %v2269_v0  ;;  %v1608_v54 = vmax.f32 %v1572_v18, 0.0  ;;  %v1975_v3 = vrot.slane %v1973_v50, 1 }
 0x23f   : > { %2713 = vmatmul.mubr.bf16.gmra.mrb[16].mxu1 %v2490_v11  ;;  %v2173_v58 = vpop.permute.xlu0 %2172 }
 0x240   : > { %v1609_v53 = vmax.f32 %v1575_v52, 0.0  ;;  %3187 = vmatprep.mubr.msk.bf16.mxu1 %vm1043_vm5, %v4264_v24  ;;  %v2129_v1 = vpop.permute.xlu1 %2128  ;;  %v1976_v61 = vor.u32 %v1975_v3, %v1971_v34 }
 0x241   : > { %2008 = vrot.lane.b32.xlu0 %v1969_v39, %s3359_s6  ;;  %2224 = vrot.lane.b32.xlu1 %v4504_v9, %s3361_s14  ;;  %v2361_v14 = vsel %vm1109_vm7, %v2329_v23, %v2129_v1  ;;  %v2084_v39 = vrot.slane %v4485_v40, 1 }
 0x242   : > { %v1625_v42 = vpack.c.bf16 %v1609_v53, %v1608_v54  ;;  %v1981_v25 = vsel %vm528_vm4, %v1976_v61, %v1980_v13  ;;  %v2393_v4 = vsel %vm1142_vm8, %v2361_v14, %v2173_v58 }
 0x243   : > { %v1993_v56 = vpop.permute.xlu0 %1992  ;;  %v4531_v38 = vsel %vm785_vm3, %v2084_v39, %v2085_v37 }
 0x244   : > { %v1732_v15 = vshrl.u32 %v1625_v42, 16  ;;  %v2209_v24 = vpop.permute.xlu1 %2208  ;;  %v1735_v19 = vshll.u32 %v1625_v42, 16  ;;  %v2301_v22 = vsel %vm1043_vm5, %v4205_v10, %v1993_v56 }
 0x245   : > { %2256 = vrot.lane.b32.xlu0 %v4485_v40, %s3362_s15  ;;  %2113 = vrot.lane.b32.xlu1 %v4504_v9, %s3358_s30  ;;  %v2425_v0 = vsel %vm1175_vm9, %v2393_v4, %v2209_v24 }
 0x246   : > { %v1734_v6 = vrot.slane %v1732_v15, 7 }
 0x247   : > { %v2241_v7 = vpop.permute.xlu0 %2240 }
 0x248   : > { %v1737_v48 = vor.u32 %v1735_v19, %v1734_v6  ;;  %v1801_v20 = vsel %vm3404_vm2, %v1734_v6, 0  ;;  %v2098_v29 = vpop.permute.xlu1 %2097  ;;  %v2457_v55 = vsel %vm1208_vm10, %v2425_v0, %v2241_v7 }
 0x249   : > { %2146 = vrot.lane.b32.xlu0 %v4485_v40, %s3360_s11  ;;  %2286 = vrot.lane.b32.xlu1 %v1981_v25, %s3363_s22  ;;  %v2158_v18 = vshll.u32 %v1801_v20, 16  ;;  %v2331_v59 = vsel %vm1076_vm6, %v2301_v22, %v2098_v29  ;;  %v2196_v21 = vrot.slane %v1801_v20, 1 }
 0x24a   : > { %v1785_v51 = vsel %vm3404_vm2, 0, %v1737_v48 }
 0x24b   : > { %v2131_v26 = vpop.permute.xlu0 %2130  ;;  %v2153_v41 = vshll.u32 %v1785_v51, 16  ;;  %v2151_v49 = vshrl.u32 %v1785_v51, 16  ;;  %v2160_v52 = vrot.slane %v2158_v18, 1  ;;  %v2195_v10 = vrot.slane %v1785_v51, 1 }
 0x24c   : > { %v2271_v17 = vpop.permute.xlu1 %2270  ;;  %v2363_v54 = vsel %vm1109_vm7, %v2331_v59, %v2131_v26 }
 0x24d   : > { %2226 = vrot.lane.b32.xlu0 %v4531_v38, %s3361_s14  ;;  %2190 = vrot.lane.b32.xlu1 %v1981_v25, %s3364_s26  ;;  %v2493_v2 = vsel %vm1241_vm11, %v2457_v55, %v2271_v17  ;;  %v2155_v50 = vrot.slane %v2153_v41, 1  ;;  %v4558_v24 = vsel %vm785_vm3, %v2195_v10, %v2196_v21 }
 0x24e   : > { %2721 = vmatmul.mubr.bf16.gmra.mrb[20].mxu1 %v2493_v2 }
 0x24f   : > { %3188 = vmatprep.mubr.msk.bf16.mxu1 %vm1043_vm5, %v4291_v47  ;;  %v2211_v30 = vpop.permute.xlu0 %2210  ;;  %v2156_v27 = vor.u32 %v2155_v50, %v2151_v49 }
 0x250   : > { %v2175_v45 = vpop.permute.xlu1 %2174 }
 0x251   : > { %2010 = vrot.lane.b32.xlu1 %v1981_v25, %s3359_s6  ;;  %v2161_v11 = vsel %vm528_vm4, %v2156_v27, %v2160_v52  ;;  %v2395_v47 = vsel %vm1142_vm8, %v2363_v54, %v2175_v45 }
 0x252   : > { %2288 = vrot.lane.b32.xlu0 %v2161_v11, %s3363_s22  ;;  %v2427_v3 = vsel %vm1175_vm9, %v2395_v47, %v2211_v30 }
 0x253   : > { %v2100_v58 = vpop.permute.xlu0 %2099 }
 0x254   : > { %v1995_v53 = vpop.permute.xlu1 %1994 }
 0x255   : > { %2258 = vrot.lane.b32.xlu1 %v1785_v51, %s3362_s15  ;;  %v2303_v61 = vsel %vm1043_vm5, %v4227_v43, %v1995_v53  ;;  %s4665_s15 = scalar_lea.vmem %s4784_s5, %s3232_s24 }
 0x256   : > { %2115 = vrot.lane.b32.xlu0 %v4531_v38, %s3358_s30  ;;  %v2333_v23 = vsel %vm1076_vm6, %v2303_v61, %v2100_v58 }
 0x257   : > { %v2273_v1 = vpop.permute.xlu0 %2272 }
 0x258   : > { %v2243_v42 = vpop.permute.xlu1 %2242 }
 0x259   : > { %v2459_v34 = vsel %vm1208_vm10, %v2427_v3, %v2243_v42  ;;  %2148 = vrot.lane.b32.xlu1 %v1785_v51, %s3360_s11 }
 0x25a   : > { %2192 = vrot.lane.b32.xlu0 %v2161_v11, %s3364_s26  ;;  %v2496_v31 = vsel %vm1241_vm11, %v2459_v34, %v2273_v1 }
 0x25b   : > { %2729 = vmatmul.mubr.bf16.gmra.mrb[24].mxu1 %v2496_v31  ;;  %v2177_v56 = vpop.permute.xlu0 %2176 }
 0x25c   : > { %3189 = vmatprep.mubr.msk.bf16.mxu1 %vm1043_vm5, %v4316_v33  ;;  %v2133_v15 = vpop.permute.xlu1 %2132 }
 0x25d   : > { %2228 = vrot.lane.b32.xlu1 %v4558_v24, %s3361_s14  ;;  %v2365_v13 = vsel %vm1109_vm7, %v2333_v23, %v2133_v15 }
 0x25e   : > { %v2397_v33 = vsel %vm1142_vm8, %v2365_v13, %v2177_v56 }
 0x25f   : > { %v1997_v6 = vpop.permute.xlu0 %1996 }
 0x260   : > { %v2213_v19 = vpop.permute.xlu1 %2212  ;;  %v2305_v4 = vsel %vm1043_vm5, %v4257_v8, %v1997_v6 }
 0x261   : > { %v2429_v48 = vsel %vm1175_vm9, %v2397_v33, %v2213_v19 }
 0x263   : > { %v2245_v14 = vpop.permute.xlu0 %2244 }
 0x264   : > { %v2102_v7 = vpop.permute.xlu1 %2101  ;;  %v2461_v29 = vsel %vm1208_vm10, %v2429_v48, %v2245_v14 }
 0x265   : > { %v2335_v37 = vsel %vm1076_vm6, %v2305_v4, %v2102_v7 }
 0x267   : > { %v2135_v20 = vpop.permute.xlu0 %2134 }
 0x268   : > { %v2275_v25 = vpop.permute.xlu1 %2274  ;;  %v2367_v26 = vsel %vm1109_vm7, %v2335_v37, %v2135_v20 }
 0x269   : > { %v2499_v39 = vsel %vm1241_vm11, %v2461_v29, %v2275_v25 }
 0x26a   : > { %2737 = vmatmul.mubr.bf16.gmra.mrb[28].mxu1 %v2499_v39 }
 0x26b   : > { %3190 = vmatprep.mubr.msk.bf16.mxu1 %vm1043_vm5, %v4351_v57  ;;  %v2215_v43 = vpop.permute.xlu0 %2214 }
 0x26c   : > { %v2179_v51 = vpop.permute.xlu1 %2178 }
 0x26d   : > { %v2399_v18 = vsel %vm1142_vm8, %v2367_v26, %v2179_v51 }
 0x26e   : > { %v2431_v17 = vsel %vm1175_vm9, %v2399_v18, %v2215_v43 }
 0x26f   : > { %v2104_v0 = vpop.permute.xlu0 %2103 }
 0x270   : > { %v1999_v41 = vpop.permute.xlu1 %1998 }
 0x271   : > { %v2307_v30 = vsel %vm1043_vm5, %v4279_v44, %v1999_v41 }
 0x272   : > { %v2337_v45 = vsel %vm1076_vm6, %v2307_v30, %v2104_v0 }
 0x273   : > { %v2277_v55 = vpop.permute.xlu0 %2276 }
 0x274   : > { %v2247_v2 = vpop.permute.xlu1 %2246 }
 0x275   : > { %v2463_v49 = vsel %vm1208_vm10, %v2431_v17, %v2247_v2 }
 0x276   : > { %v2502_v57 = vsel %vm1241_vm11, %v2463_v49, %v2277_v55 }
 0x277   : > { %2745 = vmatmul.mubr.bf16.gmra.mrb[32].mxu1 %v2502_v57  ;;  %v2181_v50 = vpop.permute.xlu0 %2180 }
 0x278   : > { %3191 = vmatprep.mubr.msk.bf16.mxu1 %vm1043_vm5, %v4385_v5  ;;  %v2137_v8 = vpop.permute.xlu1 %2136 }
 0x279   : > { %v2369_v11 = vsel %vm1109_vm7, %v2337_v45, %v2137_v8 }
 0x27a   : > { %v2401_v58 = vsel %vm1142_vm8, %v2369_v11, %v2181_v50 }
 0x27b   : > { %v2001_v27 = vpop.permute.xlu0 %2000 }
 0x27c   : > { %v2217_v52 = vpop.permute.xlu1 %2216  ;;  %v2309_v42 = vsel %vm1043_vm5, %v4309_v62, %v2001_v27 }
 0x27d   : > { %v2433_v54 = vsel %vm1175_vm9, %v2401_v58, %v2217_v52 }
 0x27f   : > { %v2249_v22 = vpop.permute.xlu0 %2248 }
 0x280   : > { %v2106_v59 = vpop.permute.xlu1 %2105  ;;  %v2465_v47 = vsel %vm1208_vm10, %v2433_v54, %v2249_v22 }
 0x281   : > { %v2339_v10 = vsel %vm1076_vm6, %v2309_v42, %v2106_v59 }
 0x283   : > { %v2139_v53 = vpop.permute.xlu0 %2138 }
 0x284   : > { %v2279_v5 = vpop.permute.xlu1 %2278  ;;  %v2371_v31 = vsel %vm1109_vm7, %v2339_v10, %v2139_v53 }
 0x285   : > { %v2505_v1 = vsel %vm1241_vm11, %v2465_v47, %v2279_v5 }
 0x286   : > { %2753 = vmatmul.mubr.bf16.gmra.mrb[36].mxu1 %v2505_v1 }
 0x287   : > { %3192 = vmatprep.mubr.msk.bf16.mxu1 %vm1043_vm5, %v4427_v16  ;;  %v2219_v44 = vpop.permute.xlu0 %2218 }
 0x288   : > { %v2183_v3 = vpop.permute.xlu1 %2182 }
 0x289   : > { %v2403_v56 = vsel %vm1142_vm8, %v2371_v31, %v2183_v3 }
 0x28a   : > { %v2435_v61 = vsel %vm1175_vm9, %v2403_v56, %v2219_v44 }
 0x28b   : > { %v2108_v34 = vpop.permute.xlu0 %2107 }
 0x28c   : > { %v2003_v21 = vpop.permute.xlu1 %2002 }
 0x28d   : > { %v2311_v13 = vsel %vm1043_vm5, %v4334_v60, %v2003_v21 }
 0x28e   : > { %v2341_v33 = vsel %vm1076_vm6, %v2311_v13, %v2108_v34 }
 0x28f   : > { %v2281_v15 = vpop.permute.xlu0 %2280 }
 0x290   : > { %v2251_v6 = vpop.permute.xlu1 %2250 }
 0x291   : > { %v2467_v19 = vsel %vm1208_vm10, %v2435_v61, %v2251_v6 }
 0x292   : > { %v2508_v16 = vsel %vm1241_vm11, %v2467_v19, %v2281_v15 }
 0x293   : > { %2761 = vmatmul.mubr.bf16.gmra.mrb[40].mxu1 %v2508_v16  ;;  %v2185_v23 = vpop.permute.xlu0 %2184 }
 0x294   : > { %3193 = vmatprep.mubr.msk.bf16.mxu1 %vm1043_vm5, %v4461_v63  ;;  %v2141_v62 = vpop.permute.xlu1 %2140 }
 0x295   : > { %v2373_v48 = vsel %vm1109_vm7, %v2341_v33, %v2141_v62  ;;  %v3333_v33 = vld [vmem:[%s3437_s27] sm:$0xff]  }
 0x296   : > { %v2405_v25 = vsel %vm1142_vm8, %v2373_v48, %v2185_v23  ;;  %v2809_v48 = vunpack.c.l.bf16 %v3333_v33 }
 0x297   : > { %v2005_v14 = vpop.permute.xlu0 %2004 }
 0x298   : > { %v2221_v7 = vpop.permute.xlu1 %2220  ;;  %v2313_v0 = vsel %vm1043_vm5, %v4373_v32, %v2005_v14 }
 0x299   : > { %v2437_v39 = vsel %vm1175_vm9, %v2405_v25, %v2221_v7 }
 0x29b   : > { %v2253_v20 = vpop.permute.xlu0 %2252 }
 0x29c   : > { %v2110_v29 = vpop.permute.xlu1 %2109  ;;  %v2469_v51 = vsel %vm1208_vm10, %v2437_v39, %v2253_v20  ;;  %v2810_v39 = vunpack.c.h.bf16 %v3333_v33 }
 0x29d   : > { %v2343_v26 = vsel %vm1076_vm6, %v2313_v0, %v2110_v29 }
 0x29f   : > { %v2143_v43 = vpop.permute.xlu0 %2142 }
 0x2a0   : > { %v2283_v63 = vpop.permute.xlu1 %2282  ;;  %v2375_v18 = vsel %vm1109_vm7, %v2343_v26, %v2143_v43  ;;  %v3334_v26 = vld [vmem:[%s3437_s27 + $0x8] sm:$0xff]  }
 0x2a1   : > { %v2511_v4 = vsel %vm1241_vm11, %v2469_v51, %v2283_v63 }
 0x2a2   : > { %2769 = vmatmul.mubr.bf16.gmra.mrb[44].mxu1 %v2511_v4 }
 0x2a3   : > { %3194 = vmatprep.mubr.msk.bf16.mxu1 %vm1043_vm5, %v4504_v9  ;;  %v2223_v60 = vpop.permute.xlu0 %2222 }
 0x2a4   : > { %v2187_v37 = vpop.permute.xlu1 %2186 }
 0x2a5   : > { %v2407_v17 = vsel %vm1142_vm8, %v2375_v18, %v2187_v37 }
 0x2a6   : > { %v2439_v49 = vsel %vm1175_vm9, %v2407_v17, %v2223_v60 }
 0x2a7   : > { %v2112_v41 = vpop.permute.xlu0 %2111 }
 0x2a8   : > { %v2007_v55 = vpop.permute.xlu1 %2006 }
 0x2a9   : > { %v2315_v30 = vsel %vm1043_vm5, %v4409_v28, %v2007_v55 }
 0x2aa   : > { %v2345_v45 = vsel %vm1076_vm6, %v2315_v30, %v2112_v41  ;;  %v2811_v41 = vunpack.c.l.bf16 %v3334_v26 }
 0x2ab   : > { %v2285_v2 = vpop.permute.xlu0 %2284 }
 0x2ac   : > { %v2255_v57 = vpop.permute.xlu1 %2254 }
 0x2ad   : > { %v2471_v50 = vsel %vm1208_vm10, %v2439_v49, %v2255_v57 }
 0x2ae   : > { %v2514_v9 = vsel %vm1241_vm11, %v2471_v50, %v2285_v2  ;;  %v2812_v2 = vunpack.c.h.bf16 %v3334_v26 }
 0x2af   : > { %2777 = vmatmul.mubr.bf16.gmra.mrb[48].mxu1 %v2514_v9  ;;  %v2189_v8 = vpop.permute.xlu0 %2188 }
 0x2b0   : > { %3195 = vmatprep.mubr.msk.bf16.mxu1 %vm1043_vm5, %v4531_v38  ;;  %v2145_v32 = vpop.permute.xlu1 %2144 }
 0x2b1   : > { %v2377_v11 = vsel %vm1109_vm7, %v2345_v45, %v2145_v32  ;;  %v3335_v45 = vld [vmem:[%s3437_s27 + $0x10] sm:$0xff]  }
 0x2b2   : > { %v2409_v58 = vsel %vm1142_vm8, %v2377_v11, %v2189_v8  ;;  %v2813_v11 = vunpack.c.l.bf16 %v3335_v45 }
 0x2b3   : > { %v2009_v27 = vpop.permute.xlu0 %2008 }
 0x2b4   : > { %v2225_v52 = vpop.permute.xlu1 %2224  ;;  %v2317_v44 = vsel %vm1043_vm5, %v4449_v46, %v2009_v27 }
 0x2b5   : > { %v2441_v54 = vsel %vm1175_vm9, %v2409_v58, %v2225_v52 }
 0x2b7   : > { %v2257_v22 = vpop.permute.xlu0 %2256 }
 0x2b8   : > { %v2114_v59 = vpop.permute.xlu1 %2113  ;;  %v2473_v47 = vsel %vm1208_vm10, %v2441_v54, %v2257_v22  ;;  %v2814_v54 = vunpack.c.h.bf16 %v3335_v45 }
 0x2b9   : > { %v2347_v3 = vsel %vm1076_vm6, %v2317_v44, %v2114_v59 }
 0x2bb   : > { %v2147_v53 = vpop.permute.xlu0 %2146 }
 0x2bc   : > { %v2287_v38 = vpop.permute.xlu1 %2286  ;;  %v2379_v42 = vsel %vm1109_vm7, %v2347_v3, %v2147_v53 }
 0x2bd   : > { %v2517_v5 = vsel %vm1241_vm11, %v2473_v47, %v2287_v38 }
 0x2be   : > { %2785 = vmatmul.mubr.bf16.gmra.mrb[52].mxu1 %v2517_v5 }
 0x2bf   : > { %3196 = vmatprep.mubr.msk.bf16.mxu1 %vm1043_vm5, %v4558_v24  ;;  %v2227_v28 = vpop.permute.xlu0 %2226 }
 0x2c0   : > { %v2191_v1 = vpop.permute.xlu1 %2190 }
 0x2c1   : > { %v2411_v31 = vsel %vm1142_vm8, %v2379_v42, %v2191_v1 }
 0x2c2   : > { %v2443_v21 = vsel %vm1175_vm9, %v2411_v31, %v2227_v28 }
 0x2c4   : > { %v2011_v10 = vpop.permute.xlu1 %2010  ;;  %v2289_v34 = vpop.permute.xlu0 %2288 }
 0x2c5   : > { %v2319_v46 = vsel %vm1043_vm5, %v4485_v40, %v2011_v10  ;;  %v3336_v10 = vld [vmem:[%s3437_s27 + $0x18] sm:$0xff]  }
 0x2c8   : > { %v2259_v56 = vpop.permute.xlu1 %2258  ;;  %v2116_v15 = vpop.permute.xlu0 %2115 }
 0x2c9   : > { %v2475_v61 = vsel %vm1208_vm10, %v2443_v21, %v2259_v56  ;;  %v2349_v6 = vsel %vm1076_vm6, %v2319_v46, %v2116_v15  ;;  %v2816_v15 = vunpack.c.h.bf16 %v3336_v10 }
 0x2ca   : > { %v2520_v24 = vsel %vm1241_vm11, %v2475_v61, %v2289_v34  ;;  %v2815_v34 = vunpack.c.l.bf16 %v3336_v10 }
 0x2cb   : > { %2793 = vmatmul.mubr.bf16.gmra.mrb[56].mxu1 %v2520_v24 }
 0x2cc   : > { %v2149_v19 = vpop.permute.xlu1 %2148  ;;  %3197 = vmatprep.mubr.msk.bf16.mxu1 %vm1043_vm5, %v3430_v12  ;;  %v2193_v23 = vpop.permute.xlu0 %2192  ;;  %v4655_v12 = vld [vmem:[%s4783_s4] ss:$0 sm:$0xff] }
 0x2cd   : > { %v2381_v16 = vsel %vm1109_vm7, %v2349_v6, %v2149_v19 }
 0x2ce   : > { %v2413_v62 = vsel %vm1142_vm8, %v2381_v16, %v2193_v23 }
 0x2d0   : > { %v2229_v13 = vpop.permute.xlu1 %2228 }
 0x2d1   : > { %v2445_v14 = vsel %vm1175_vm9, %v2413_v62, %v2229_v13 }
 0x2d2   : > { %v2476_v7 = vsel %vm1208_vm10, %v2445_v14, %v4044_v35  ;;  %v3337_v14 = vld [vmem:[%s3437_s27 + $0x20] sm:$0xff]  }
 0x2d3   : > { %v2522_v40 = vsel %vm1241_vm11, %v2476_v7, %v4049_v36  ;;  %v2817_v7 = vunpack.c.l.bf16 %v3337_v14 }
 0x2d4   : > { %2801 = vmatmul.mubr.bf16.gmra.mrb[60].mxu1 %v2522_v40 }
 0x2da   : > { %v2682_v20 = vpop.f32.mrb[0].mxu1 }
 0x2db   : > { %v2683_v29 = vadd.f32 %v4655_v12, %v2682_v20  ;;  %v2684_v25 = vpop.f32.mrb[1].mxu1  ;;  %v2818_v20 = vunpack.c.h.bf16 %v3337_v14 }
 0x2dc   : > { %v2685_v43 = vpop.f32.mrb[2].mxu1 }
 0x2dd   : > { %v2841_v35 = vadd.f32 %v2809_v48, %v2683_v29  ;;  %v2686_v51 = vadd.f32 %v4655_v12, %v2685_v43  ;;  %v2687_v63 = vpop.f32.mrb[3].mxu1 }
 0x2df   : > { %v2873_v36 = vmax.f32 %v2841_v35, 0.0  ;;  %v2842_v4 = vadd.f32 %v2810_v39, %v2686_v51 }
 0x2e1   : > { %v3234_v60 = vpack.c.bf16 %v2873_v36, %v2873_v36  ;;  %v2874_v37 = vmax.f32 %v2842_v4, 0.0 }
 0x2e3   : > { %3034 = vst.msk [vmem:[%s4665_s15] sm:$0xf] %vm3033_vm12, %v3234_v60  ;;  %v3235_v0 = vpack.c.bf16 %v2874_v37, %v2874_v37  ;;  %v3338_v60 = vld [vmem:[%s3437_s27 + $0x28] sm:$0xff]  }
 0x2e4   : > { %v2819_v37 = vunpack.c.l.bf16 %v3338_v60 }
 0x2e5   : > { %3035 = vst.msk [vmem:[%s4665_s15 + $0x4] sm:$0xf] %vm3033_vm12, %v3235_v0 }
 0x2e9   : > { %v2690_v18 = vpop.f32.mrb[4].mxu1 }
 0x2ea   : > { %v2691_v55 = vadd.f32 %v4655_v12, %v2690_v18  ;;  %v2692_v17 = vpop.f32.mrb[5].mxu1  ;;  %v2820_v18 = vunpack.c.h.bf16 %v3338_v60 }
 0x2eb   : > { %v2693_v49 = vpop.f32.mrb[6].mxu1 }
 0x2ec   : > { %v2843_v57 = vadd.f32 %v2811_v41, %v2691_v55  ;;  %v2694_v50 = vadd.f32 %v4655_v12, %v2693_v49  ;;  %v2695_v9 = vpop.f32.mrb[7].mxu1 }
 0x2ee   : > { %v2875_v8 = vmax.f32 %v2843_v57, 0.0  ;;  %v2844_v32 = vadd.f32 %v2812_v2, %v2694_v50 }
 0x2f0   : > { %v3236_v30 = vpack.c.bf16 %v2875_v8, %v2875_v8  ;;  %v2876_v27 = vmax.f32 %v2844_v32, 0.0 }
 0x2f2   : > { %3036 = vst.msk [vmem:[%s4665_s15 + $0x8] sm:$0xf] %vm3033_vm12, %v3236_v30  ;;  %v3237_v52 = vpack.c.bf16 %v2876_v27, %v2876_v27  ;;  %v3339_v30 = vld [vmem:[%s3437_s27 + $0x30] sm:$0xff]  }
 0x2f3   : > { %v2821_v27 = vunpack.c.l.bf16 %v3339_v30 }
 0x2f4   : > { %3037 = vst.msk [vmem:[%s4665_s15 + $0xc] sm:$0xf] %vm3033_vm12, %v3237_v52 }
 0x2f6   : > { %v2698_v22 = vpop.f32.mrb[8].mxu1 }
 0x2f7   : > { %v2699_v59 = vadd.f32 %v4655_v12, %v2698_v22  ;;  %v2700_v58 = vpop.f32.mrb[9].mxu1  ;;  %v2822_v22 = vunpack.c.h.bf16 %v3339_v30 }
 0x2f8   : > { %v2701_v53 = vpop.f32.mrb[10].mxu1 }
 0x2f9   : > { %v2845_v47 = vadd.f32 %v2813_v11, %v2699_v59  ;;  %v2702_v38 = vadd.f32 %v4655_v12, %v2701_v53  ;;  %v2703_v5 = vpop.f32.mrb[11].mxu1 }
 0x2fb   : > { %v2877_v28 = vmax.f32 %v2845_v47, 0.0  ;;  %v2846_v1 = vadd.f32 %v2814_v54, %v2702_v38 }
 0x2fd   : > { %v3238_v44 = vpack.c.bf16 %v2877_v28, %v2877_v28  ;;  %v2878_v3 = vmax.f32 %v2846_v1, 0.0 }
 0x2ff   : > { %3038 = vst.msk [vmem:[%s4665_s15 + $0x10] sm:$0xf] %vm3033_vm12, %v3238_v44  ;;  %v3239_v42 = vpack.c.bf16 %v2878_v3, %v2878_v3  ;;  %v3340_v44 = vld [vmem:[%s3437_s27 + $0x38] sm:$0xff]  }
 0x300   : > { %v2823_v3 = vunpack.c.l.bf16 %v3340_v44 }
 0x301   : > { %3039 = vst.msk [vmem:[%s4665_s15 + $0x14] sm:$0xf] %vm3033_vm12, %v3239_v42 }
 0x305   : > { %v2706_v31 = vpop.f32.mrb[12].mxu1 }
 0x306   : > { %v2707_v21 = vadd.f32 %v4655_v12, %v2706_v31  ;;  %v2708_v56 = vpop.f32.mrb[13].mxu1  ;;  %v2824_v31 = vunpack.c.h.bf16 %v3340_v44 }
 0x307   : > { %v2709_v61 = vpop.f32.mrb[14].mxu1 }
 0x308   : > { %v2847_v24 = vadd.f32 %v2815_v34, %v2707_v21  ;;  %v2710_v46 = vadd.f32 %v4655_v12, %v2709_v61  ;;  %v2711_v6 = vpop.f32.mrb[15].mxu1 }
 0x30a   : > { %v2879_v19 = vmax.f32 %v2847_v24, 0.0  ;;  %v2848_v16 = vadd.f32 %v2816_v15, %v2710_v46 }
 0x30c   : > { %v3240_v23 = vpack.c.bf16 %v2879_v19, %v2879_v19  ;;  %v2880_v62 = vmax.f32 %v2848_v16, 0.0 }
 0x30e   : > { %3040 = vst.msk [vmem:[%s4665_s15 + $0x18] sm:$0xf] %vm3033_vm12, %v3240_v23  ;;  %v3241_v13 = vpack.c.bf16 %v2880_v62, %v2880_v62  ;;  %v3341_v23 = vld [vmem:[%s3437_s27 + $0x40] sm:$0xff]  }
 0x30f   : > { %v2825_v62 = vunpack.c.l.bf16 %v3341_v23 }
 0x310   : > { %3041 = vst.msk [vmem:[%s4665_s15 + $0x1c] sm:$0xf] %vm3033_vm12, %v3241_v13 }
 0x312   : > { %v2714_v40 = vpop.f32.mrb[16].mxu1 }
 0x313   : > { %v2715_v33 = vadd.f32 %v4655_v12, %v2714_v40  ;;  %v2716_v48 = vpop.f32.mrb[17].mxu1  ;;  %v2826_v40 = vunpack.c.h.bf16 %v3341_v23 }
 0x314   : > { %v2717_v29 = vpop.f32.mrb[18].mxu1 }
 0x315   : > { %v2849_v25 = vadd.f32 %v2817_v7, %v2715_v33  ;;  %v2718_v39 = vadd.f32 %v4655_v12, %v2717_v29  ;;  %v2719_v43 = vpop.f32.mrb[19].mxu1 }
 0x317   : > { %v2881_v35 = vmax.f32 %v2849_v25, 0.0  ;;  %v2850_v51 = vadd.f32 %v2818_v20, %v2718_v39 }
 0x319   : > { %v3242_v63 = vpack.c.bf16 %v2881_v35, %v2881_v35  ;;  %v2882_v36 = vmax.f32 %v2850_v51, 0.0 }
 0x31b   : > { %3042 = vst.msk [vmem:[%s4665_s15 + $0x20] sm:$0xf] %vm3033_vm12, %v3242_v63  ;;  %v3243_v4 = vpack.c.bf16 %v2882_v36, %v2882_v36  ;;  %v3342_v63 = vld [vmem:[%s3437_s27 + $0x48] sm:$0xff]  }
 0x31c   : > { %v2827_v36 = vunpack.c.l.bf16 %v3342_v63 }
 0x31d   : > { %3043 = vst.msk [vmem:[%s4665_s15 + $0x24] sm:$0xf] %vm3033_vm12, %v3243_v4 }
 0x321   : > { %v2722_v0 = vpop.f32.mrb[20].mxu1 }
 0x322   : > { %v2723_v26 = vadd.f32 %v4655_v12, %v2722_v0  ;;  %v2724_v41 = vpop.f32.mrb[21].mxu1  ;;  %v2828_v0 = vunpack.c.h.bf16 %v3342_v63 }
 0x323   : > { %v2725_v55 = vpop.f32.mrb[22].mxu1 }
 0x324   : > { %v2851_v17 = vadd.f32 %v2819_v37, %v2723_v26  ;;  %v2726_v2 = vadd.f32 %v4655_v12, %v2725_v55  ;;  %v2727_v49 = vpop.f32.mrb[23].mxu1 }
 0x326   : > { %v2883_v57 = vmax.f32 %v2851_v17, 0.0  ;;  %v2852_v50 = vadd.f32 %v2820_v18, %v2726_v2 }
 0x328   : > { %v3244_v9 = vpack.c.bf16 %v2883_v57, %v2883_v57  ;;  %v2884_v8 = vmax.f32 %v2852_v50, 0.0 }
 0x32a   : > { %3044 = vst.msk [vmem:[%s4665_s15 + $0x28] sm:$0xf] %vm3033_vm12, %v3244_v9  ;;  %v3245_v32 = vpack.c.bf16 %v2884_v8, %v2884_v8  ;;  %v3343_v9 = vld [vmem:[%s3437_s27 + $0x50] sm:$0xff]  }
 0x32b   : > { %v2829_v8 = vunpack.c.l.bf16 %v3343_v9 }
 0x32c   : > { %3045 = vst.msk [vmem:[%s4665_s15 + $0x2c] sm:$0xf] %vm3033_vm12, %v3245_v32 }
 0x32e   : > { %v2730_v52 = vpop.f32.mrb[24].mxu1 }
 0x32f   : > { %v2731_v45 = vadd.f32 %v4655_v12, %v2730_v52  ;;  %v2732_v11 = vpop.f32.mrb[25].mxu1  ;;  %v2830_v52 = vunpack.c.h.bf16 %v3343_v9 }
 0x330   : > { %v2733_v59 = vpop.f32.mrb[26].mxu1 }
 0x331   : > { %v2853_v58 = vadd.f32 %v2821_v27, %v2731_v45  ;;  %v2734_v54 = vadd.f32 %v4655_v12, %v2733_v59  ;;  %v2735_v53 = vpop.f32.mrb[27].mxu1 }
 0x333   : > { %v2885_v47 = vmax.f32 %v2853_v58, 0.0  ;;  %v2854_v38 = vadd.f32 %v2822_v22, %v2734_v54 }
 0x335   : > { %v3246_v5 = vpack.c.bf16 %v2885_v47, %v2885_v47  ;;  %v2886_v28 = vmax.f32 %v2854_v38, 0.0 }
 0x337   : > { %3046 = vst.msk [vmem:[%s4665_s15 + $0x30] sm:$0xf] %vm3033_vm12, %v3246_v5  ;;  %v3247_v1 = vpack.c.bf16 %v2886_v28, %v2886_v28  ;;  %v3344_v5 = vld [vmem:[%s3437_s27 + $0x58] sm:$0xff]  }
 0x338   : > { %v2831_v28 = vunpack.c.l.bf16 %v3344_v5 }
 0x339   : > { %3047 = vst.msk [vmem:[%s4665_s15 + $0x34] sm:$0xf] %vm3033_vm12, %v3247_v1 }
 0x33d   : > { %v2738_v42 = vpop.f32.mrb[28].mxu1 }
 0x33e   : > { %v2739_v10 = vadd.f32 %v4655_v12, %v2738_v42  ;;  %v2740_v34 = vpop.f32.mrb[29].mxu1  ;;  %v2832_v42 = vunpack.c.h.bf16 %v3344_v5 }
 0x33f   : > { %v2741_v21 = vpop.f32.mrb[30].mxu1 }
 0x340   : > { %v2855_v56 = vadd.f32 %v2823_v3, %v2739_v10  ;;  %v2742_v15 = vadd.f32 %v4655_v12, %v2741_v21  ;;  %v2743_v61 = vpop.f32.mrb[31].mxu1 }
 0x342   : > { %v2887_v24 = vmax.f32 %v2855_v56, 0.0  ;;  %v2856_v46 = vadd.f32 %v2824_v31, %v2742_v15 }
 0x344   : > { %v3248_v6 = vpack.c.bf16 %v2887_v24, %v2887_v24  ;;  %v2888_v19 = vmax.f32 %v2856_v46, 0.0 }
 0x346   : > { %3048 = vst.msk [vmem:[%s4665_s15 + $0x38] sm:$0xf] %vm3033_vm12, %v3248_v6  ;;  %v3249_v16 = vpack.c.bf16 %v2888_v19, %v2888_v19  ;;  %v3345_v6 = vld [vmem:[%s3437_s27 + $0x60] sm:$0xff]  }
 0x347   : > { %v2833_v19 = vunpack.c.l.bf16 %v3345_v6 }
 0x348   : > { %3049 = vst.msk [vmem:[%s4665_s15 + $0x3c] sm:$0xf] %vm3033_vm12, %v3249_v16 }
 0x34a   : > { %v2746_v13 = vpop.f32.mrb[32].mxu1 }
 0x34b   : > { %v2747_v14 = vadd.f32 %v4655_v12, %v2746_v13  ;;  %v2748_v7 = vpop.f32.mrb[33].mxu1  ;;  %v2834_v13 = vunpack.c.h.bf16 %v3345_v6 }
 0x34c   : > { %v2749_v33 = vpop.f32.mrb[34].mxu1 }
 0x34d   : > { %v2857_v48 = vadd.f32 %v2825_v62, %v2747_v14  ;;  %v2750_v20 = vadd.f32 %v4655_v12, %v2749_v33  ;;  %v2751_v29 = vpop.f32.mrb[35].mxu1 }
 0x34f   : > { %v2889_v25 = vmax.f32 %v2857_v48, 0.0  ;;  %v2858_v39 = vadd.f32 %v2826_v40, %v2750_v20 }
 0x351   : > { %v3250_v43 = vpack.c.bf16 %v2889_v25, %v2889_v25  ;;  %v2890_v35 = vmax.f32 %v2858_v39, 0.0 }
 0x353   : > { %3050 = vst.msk [vmem:[%s4665_s15 + $0x40] sm:$0xf] %vm3033_vm12, %v3250_v43  ;;  %v3251_v51 = vpack.c.bf16 %v2890_v35, %v2890_v35  ;;  %v3346_v43 = vld [vmem:[%s3437_s27 + $0x68] sm:$0xff]  }
 0x354   : > { %v2835_v35 = vunpack.c.l.bf16 %v3346_v43 }
 0x355   : > { %3051 = vst.msk [vmem:[%s4665_s15 + $0x44] sm:$0xf] %vm3033_vm12, %v3251_v51 }
 0x359   : > { %v2754_v4 = vpop.f32.mrb[36].mxu1 }
 0x35a   : > { %v2755_v60 = vadd.f32 %v4655_v12, %v2754_v4  ;;  %v2756_v37 = vpop.f32.mrb[37].mxu1  ;;  %v2836_v4 = vunpack.c.h.bf16 %v3346_v43 }
 0x35b   : > { %v2757_v26 = vpop.f32.mrb[38].mxu1 }
 0x35c   : > { %v2859_v41 = vadd.f32 %v2827_v36, %v2755_v60  ;;  %v2758_v18 = vadd.f32 %v4655_v12, %v2757_v26  ;;  %v2759_v55 = vpop.f32.mrb[39].mxu1 }
 0x35e   : > { %v2891_v17 = vmax.f32 %v2859_v41, 0.0  ;;  %v2860_v2 = vadd.f32 %v2828_v0, %v2758_v18 }
 0x360   : > { %v3252_v49 = vpack.c.bf16 %v2891_v17, %v2891_v17  ;;  %v2892_v57 = vmax.f32 %v2860_v2, 0.0 }
 0x362   : > { %3052 = vst.msk [vmem:[%s4665_s15 + $0x48] sm:$0xf] %vm3033_vm12, %v3252_v49  ;;  %v3253_v50 = vpack.c.bf16 %v2892_v57, %v2892_v57  ;;  %v3347_v49 = vld [vmem:[%s3437_s27 + $0x70] sm:$0xff]  }
 0x363   : > { %v2837_v57 = vunpack.c.l.bf16 %v3347_v49 }
 0x364   : > { %3053 = vst.msk [vmem:[%s4665_s15 + $0x4c] sm:$0xf] %vm3033_vm12, %v3253_v50 }
 0x366   : > { %v2762_v32 = vpop.f32.mrb[40].mxu1 }
 0x367   : > { %v2763_v30 = vadd.f32 %v4655_v12, %v2762_v32  ;;  %v2764_v27 = vpop.f32.mrb[41].mxu1  ;;  %v2838_v32 = vunpack.c.h.bf16 %v3347_v49 }
 0x368   : > { %v2765_v45 = vpop.f32.mrb[42].mxu1 }
 0x369   : > { %v2861_v11 = vadd.f32 %v2829_v8, %v2763_v30  ;;  %v2766_v22 = vadd.f32 %v4655_v12, %v2765_v45  ;;  %v2767_v59 = vpop.f32.mrb[43].mxu1 }
 0x36b   : > { %v2893_v58 = vmax.f32 %v2861_v11, 0.0  ;;  %v2862_v54 = vadd.f32 %v2830_v52, %v2766_v22 }
 0x36d   : > { %v3254_v53 = vpack.c.bf16 %v2893_v58, %v2893_v58  ;;  %v2894_v47 = vmax.f32 %v2862_v54, 0.0  ;;  %v3348_v54 = vld [vmem:[%s3437_s27 + $0x78] sm:$0xff]  }
 0x36f   : > { %3054 = vst.msk [vmem:[%s4665_s15 + $0x50] sm:$0xf] %vm3033_vm12, %v3254_v53  ;;  %v3255_v38 = vpack.c.bf16 %v2894_v47, %v2894_v47  ;;  %v2839_v53 = vunpack.c.l.bf16 %v3348_v54 }
 0x371   : > { %3055 = vst.msk [vmem:[%s4665_s15 + $0x54] sm:$0xf] %vm3033_vm12, %v3255_v38 }
 0x375   : > { %v2770_v1 = vpop.f32.mrb[44].mxu1 }
 0x376   : > { %v2771_v44 = vadd.f32 %v4655_v12, %v2770_v1  ;;  %v2772_v3 = vpop.f32.mrb[45].mxu1  ;;  %v2840_v1 = vunpack.c.h.bf16 %v3348_v54 }
 0x377   : > { %v2773_v10 = vpop.f32.mrb[46].mxu1 }
 0x378   : > { %v2863_v34 = vadd.f32 %v2831_v28, %v2771_v44  ;;  %v2774_v31 = vadd.f32 %v4655_v12, %v2773_v10  ;;  %v2775_v21 = vpop.f32.mrb[47].mxu1 }
 0x37a   : > { %v2895_v56 = vmax.f32 %v2863_v34, 0.0  ;;  %v2864_v15 = vadd.f32 %v2832_v42, %v2774_v31 }
 0x37c   : > { %v3256_v61 = vpack.c.bf16 %v2895_v56, %v2895_v56  ;;  %v2896_v24 = vmax.f32 %v2864_v15, 0.0 }
 0x37e   : > { %3056 = vst.msk [vmem:[%s4665_s15 + $0x58] sm:$0xf] %vm3033_vm12, %v3256_v61  ;;  %v3257_v46 = vpack.c.bf16 %v2896_v24, %v2896_v24 }
 0x380   : > { %3057 = vst.msk [vmem:[%s4665_s15 + $0x5c] sm:$0xf] %vm3033_vm12, %v3257_v46 }
 0x382   : > { %v2778_v16 = vpop.f32.mrb[48].mxu1 }
 0x383   : > { %v2779_v23 = vadd.f32 %v4655_v12, %v2778_v16  ;;  %v2780_v62 = vpop.f32.mrb[49].mxu1 }
 0x384   : > { %v2781_v14 = vpop.f32.mrb[50].mxu1 }
 0x385   : > { %v2865_v7 = vadd.f32 %v2833_v19, %v2779_v23  ;;  %v2782_v40 = vadd.f32 %v4655_v12, %v2781_v14  ;;  %v2783_v33 = vpop.f32.mrb[51].mxu1 }
 0x387   : > { %v2897_v48 = vmax.f32 %v2865_v7, 0.0  ;;  %v2866_v20 = vadd.f32 %v2834_v13, %v2782_v40 }
 0x389   : > { %v3258_v29 = vpack.c.bf16 %v2897_v48, %v2897_v48  ;;  %v2898_v25 = vmax.f32 %v2866_v20, 0.0 }
 0x38b   : > { %3058 = vst.msk [vmem:[%s4665_s15 + $0x60] sm:$0xf] %vm3033_vm12, %v3258_v29  ;;  %v3259_v39 = vpack.c.bf16 %v2898_v25, %v2898_v25 }
 0x38d   : > { %3059 = vst.msk [vmem:[%s4665_s15 + $0x64] sm:$0xf] %vm3033_vm12, %v3259_v39 }
 0x391   : > { %v2786_v51 = vpop.f32.mrb[52].mxu1 }
 0x392   : > { %v2787_v63 = vadd.f32 %v4655_v12, %v2786_v51  ;;  %v2788_v36 = vpop.f32.mrb[53].mxu1 }
 0x393   : > { %v2789_v60 = vpop.f32.mrb[54].mxu1 }
 0x394   : > { %v2867_v37 = vadd.f32 %v2835_v35, %v2787_v63  ;;  %v2790_v0 = vadd.f32 %v4655_v12, %v2789_v60  ;;  %v2791_v26 = vpop.f32.mrb[55].mxu1 }
 0x396   : > { %v2899_v41 = vmax.f32 %v2867_v37, 0.0  ;;  %v2868_v18 = vadd.f32 %v2836_v4, %v2790_v0 }
 0x398   : > { %v3260_v55 = vpack.c.bf16 %v2899_v41, %v2899_v41  ;;  %v2900_v17 = vmax.f32 %v2868_v18, 0.0 }
 0x39a   : > { %3060 = vst.msk [vmem:[%s4665_s15 + $0x68] sm:$0xf] %vm3033_vm12, %v3260_v55  ;;  %v3261_v2 = vpack.c.bf16 %v2900_v17, %v2900_v17 }
 0x39c   : > { %3061 = vst.msk [vmem:[%s4665_s15 + $0x6c] sm:$0xf] %vm3033_vm12, %v3261_v2 }
 0x39e   : > { %v2794_v50 = vpop.f32.mrb[56].mxu1 }
 0x39f   : > { %v2795_v9 = vadd.f32 %v4655_v12, %v2794_v50  ;;  %v2796_v8 = vpop.f32.mrb[57].mxu1 }
 0x3a0   : > { %v2797_v30 = vpop.f32.mrb[58].mxu1 }
 0x3a1   : > { %v2869_v27 = vadd.f32 %v2837_v57, %v2795_v9  ;;  %v2798_v52 = vadd.f32 %v4655_v12, %v2797_v30  ;;  %v2799_v45 = vpop.f32.mrb[59].mxu1 }
 0x3a3   : > { %v2901_v11 = vmax.f32 %v2869_v27, 0.0  ;;  %v2870_v22 = vadd.f32 %v2838_v32, %v2798_v52 }
 0x3a5   : > { %v3262_v59 = vpack.c.bf16 %v2901_v11, %v2901_v11  ;;  %v2902_v58 = vmax.f32 %v2870_v22, 0.0 }
 0x3a7   : > { %3062 = vst.msk [vmem:[%s4665_s15 + $0x70] sm:$0xf] %vm3033_vm12, %v3262_v59  ;;  %v3263_v47 = vpack.c.bf16 %v2902_v58, %v2902_v58  ;;  %v2802_v38 = vpop.f32.mrb[60].mxu1 }
 0x3a8   : > { %v2803_v5 = vadd.f32 %v4655_v12, %v2802_v38  ;;  %v2804_v28 = vpop.f32.mrb[61].mxu1 }
 0x3a9   : > { %3063 = vst.msk [vmem:[%s4665_s15 + $0x74] sm:$0xf] %vm3033_vm12, %v3263_v47  ;;  %v2805_v44 = vpop.f32.mrb[62].mxu1 }
 0x3aa   : > { %v2871_v3 = vadd.f32 %v2839_v53, %v2803_v5  ;;  %v2806_v42 = vadd.f32 %v4655_v12, %v2805_v44  ;;  %v2807_v10 = vpop.f32.mrb[63].mxu1 }
 0x3ac   : > { %v2903_v34 = vmax.f32 %v2871_v3, 0.0  ;;  %v2872_v31 = vadd.f32 %v2840_v1, %v2806_v42 }
 0x3ae   : > { %v3264_v21 = vpack.c.bf16 %v2903_v34, %v2903_v34  ;;  %v2904_v56 = vmax.f32 %v2872_v31, 0.0 }
 0x3b0   : > { %3064 = vst.msk [vmem:[%s4665_s15 + $0x78] sm:$0xf] %vm3033_vm12, %v3264_v21  ;;  %v3265_v15 = vpack.c.bf16 %v2904_v56, %v2904_v56 }
 0x3b2   : > { %3065 = vst.msk [vmem:[%s4665_s15 + $0x7c] sm:$0xf] %vm3033_vm12, %v3265_v15 }
 0x3b3 PF: > { %s15_s18 = sadd.s32 1, %s3355_s18  }
 0x3b4   : > { %p12_p4 = scmp.ge.s32.totalorder %s15_s18, 4  }
 0x3b6   :  { %14 = sbr.rel (!%p12_p4) target bundleno = 1 (0x1), region = 70 }

</bundles_post_ra>
